<compile_context>
chip_gen: v6e
topology: v6e:2x2x1
jax: 0.10.0
libtpu: 0.0.40
codegen_flags: <defaults>
</compile_context>

<pallas_src>
import jax
import jax.numpy as jnp
from jax import lax
from jax.experimental import pallas as pl
from jax.experimental.pallas import tpu as pltpu


def _round_up(x, m):
    return (x + m - 1) // m * m


# ----------------------------------------------------------------------------- encoder
def _encoder_kernel(x2_ref, valid_ref,
                    wih_f_ref, whh_f_ref, b_f_ref,
                    wih_b_ref, whh_b_ref, b_b_ref,
                    wh2h_ref, wc2c_ref,
                    hs_ref, h0_ref, c0_ref,
                    gxf_s, gxb_s, hf_s, cf_s, hb_s, cb_s):
    S, B, _ = valid_ref.shape
    H = whh_f_ref.shape[0]                    # whh_* are (H, 4H), pre-transposed
    H3 = 3 * H

    # Recurrence-independent input projections: ONE big MXU matmul per direction,
    # bf16 operands, f32 accumulation, bias folded in.  Rows are (t, b) flattened.
    x2 = x2_ref[...]                                                   # (S*B, E) bf16
    gxf_s[...] = (jnp.dot(x2, wih_f_ref[...], preferred_element_type=jnp.float32)
                  + b_f_ref[...])
    gxb_s[...] = (jnp.dot(x2, wih_b_ref[...], preferred_element_type=jnp.float32)
                  + b_b_ref[...])

    hf_s[...] = jnp.zeros_like(hf_s)
    cf_s[...] = jnp.zeros_like(cf_s)
    hb_s[...] = jnp.zeros_like(hb_s)
    cb_s[...] = jnp.zeros_like(cb_s)

    def lstm_step(gx, h, c, v, whh_ref):
        # gate columns are pre-ordered [i | f | o | g]: one sigmoid + one tanh dispatch
        gates = gx + jnp.dot(h.astype(jnp.bfloat16), whh_ref[...],
                             preferred_element_type=jnp.float32)
        sig = jax.nn.sigmoid(gates[:, :H3])
        g = jnp.tanh(gates[:, H3:])
        c_new = sig[:, H:2 * H] * c + sig[:, :H] * g
        h_new = sig[:, 2 * H:H3] * jnp.tanh(c_new)
        # freeze state past the sequence end (pack_padded semantics)
        return v * h_new + (1.0 - v) * h, v * c_new + (1.0 - v) * c

    # Both directions advance in the same loop: forward reads t, backward reads S-1-t.
    def body(t, carry):
        tb = S - 1 - t
        v_f = valid_ref[t]                    # (B, 1): 1.0 while position < src_len
        v_b = valid_ref[tb]
        rf = pl.multiple_of(t * B, B)
        rb = pl.multiple_of(tb * B, B)
        h_f, c_f = lstm_step(gxf_s[pl.ds(rf, B), :], hf_s[...], cf_s[...], v_f, whh_f_ref)
        h_b, c_b = lstm_step(gxb_s[pl.ds(rb, B), :], hb_s[...], cb_s[...], v_b, whh_b_ref)
        hf_s[...] = h_f
        cf_s[...] = c_f
        hb_s[...] = h_b
        cb_s[...] = c_b
        # packed-seq outputs are zero at pads; fwd -> [:H], bwd -> [H:] of one output.
        hs_ref[t, :, 0:H] = h_f * v_f
        hs_ref[tb, :, H:2 * H] = h_b * v_b
        return carry

    # Short static trip count -> full unroll for scheduler visibility.
    lax.fori_loop(0, S, body, 0, unroll=True)

    hf16 = hf_s[...].astype(jnp.bfloat16)
    hb16 = hb_s[...].astype(jnp.bfloat16)
    cf16 = cf_s[...].astype(jnp.bfloat16)
    cb16 = cb_s[...].astype(jnp.bfloat16)
    # Linear(concat([h_fwd, h_bwd])) == h_fwd @ W[:H] + h_bwd @ W[H:]
    h0_ref[...] = (jnp.dot(hf16, wh2h_ref[0:H, :], preferred_element_type=jnp.float32)
                   + jnp.dot(hb16, wh2h_ref[H:2 * H, :], preferred_element_type=jnp.float32))
    c0_ref[...] = (jnp.dot(cf16, wc2c_ref[0:H, :], preferred_element_type=jnp.float32)
                   + jnp.dot(cb16, wc2c_ref[H:2 * H, :], preferred_element_type=jnp.float32))


# ----------------------------------------------------------------------------- decoder
def _decoder_kernel(ye2_ref, hs_ref, hsT_ref, pbias_ref, h0_ref, c0_ref,
                    wih_o_ref, wih_x_ref, whh_ref, b_ref,
                    watt_ref, wcomb_a_ref, wcomb_h_ref,
                    comb_ref,
                    gy_s, h_s, c_s, o_s):
    T, B, H = comb_ref.shape
    H3 = 3 * H

    # Recurrence-independent part of the decoder LSTM input projection (embeddings),
    # done once as a big MXU matmul with the bias folded in.
    gy_s[...] = (jnp.dot(ye2_ref[...], wih_x_ref[...],
                         preferred_element_type=jnp.float32) + b_ref[...])

    pbias = pbias_ref[...]                    # (B,1,S) additive pad mask (tiny -> hoist)
    h_s[...] = h0_ref[...]
    c_s[...] = c0_ref[...]
    o_s[...] = jnp.zeros_like(o_s)            # combined_output_init = zeros

    def body(t, carry):
        h = h_s[...]
        c = c_s[...]
        o_prev = o_s[...]
        row = pl.multiple_of(t * B, B)

        # decoder LSTM step on cat([combined_prev, embed]) without materializing concat
        gates = (gy_s[pl.ds(row, B), :]
                 + jnp.dot(o_prev.astype(jnp.bfloat16), wih_o_ref[...],
                           preferred_element_type=jnp.float32)
                 + jnp.dot(h.astype(jnp.bfloat16), whh_ref[...],
                           preferred_element_type=jnp.float32))
        sig = jax.nn.sigmoid(gates[:, :H3])   # [i | f | o] in one EUP dispatch
        g = jnp.tanh(gates[:, H3:])
        c_new = sig[:, H:2 * H] * c + sig[:, :H] * g
        h_new = sig[:, 2 * H:H3] * jnp.tanh(c_new)
        h16 = h_new.astype(jnp.bfloat16)

        # attention scores: hs . (h @ Watt) as a batched MXU matmul against the
        # pre-transposed hs_T (B, 2H, S) layout (no per-step transpose).
        q = jnp.dot(h16, watt_ref[...], preferred_element_type=jnp.float32)      # (B,2H)
        q3 = q[:, None, :].astype(jnp.bfloat16)                                  # (B,1,2H)
        s3 = jnp.einsum('bqk,bks->bqs', q3, hsT_ref[...],
                        preferred_element_type=jnp.float32) + pbias              # (B,1,S)
        # module applies nn.LogSoftmax(dim=1) to the attention scores
        m = jnp.max(s3, axis=-1, keepdims=True)
        sh = s3 - m
        att = sh - jnp.log(jnp.sum(jnp.exp(sh), axis=-1, keepdims=True))         # (B,1,S)
        ao = jnp.einsum('bqs,bsk->bqk', att.astype(jnp.bfloat16), hs_ref[...],
                        preferred_element_type=jnp.float32)                      # (B,1,2H)
        att_out = ao[:, 0, :].astype(jnp.bfloat16)                               # (B,2H)

        combined = jnp.tanh(
            jnp.dot(att_out, wcomb_a_ref[...], preferred_element_type=jnp.float32)
            + jnp.dot(h16, wcomb_h_ref[...], preferred_element_type=jnp.float32))
        # TODO(synk): nn.Dropout (training-mode RNG) treated as identity (eval mode).

        comb_ref[t] = combined
        h_s[...] = h_new
        c_s[...] = c_new
        o_s[...] = combined
        return carry

    lax.fori_loop(0, T, body, 0, unroll=True)


# ------------------------------------------------------------------- vocab projection
def _matmul_kernel(a_ref, b_ref, o_ref):
    # Full-K single-step reduction: no k grid axis, no accumulator init pass.
    o_ref[...] = jnp.dot(a_ref[...], b_ref[...], preferred_element_type=jnp.float32)


def vocab_projection_pallas(a, w_pad, n_out):
    """(M, K) @ pre-padded bf16 (Kp, Np) weight; adaptive M tile, lane-dense N tiles."""
    M, K = a.shape
    Kp, Np = w_pad.shape
    tm = min(128, _round_up(M, 8))            # don't pad tiny M up to 128 rows of zeros
    Mp = _round_up(M, tm)
    tn = min(512, Np)                         # Np is a multiple of 128 (and of 512 if >512)
    a_p = jnp.zeros((Mp, Kp), jnp.bfloat16).at[:M, :K].set(a.astype(jnp.bfloat16))
    out = pl.pallas_call(
        _matmul_kernel,
        out_shape=jax.ShapeDtypeStruct((Mp, Np), jnp.float32),
        grid_spec=pltpu.PrefetchScalarGridSpec(
            num_scalar_prefetch=0,
            grid=(Mp // tm, Np // tn),
            in_specs=[pl.BlockSpec((tm, Kp), lambda i, j: (i, 0)),
                      pl.BlockSpec((Kp, tn), lambda i, j: (0, j))],
            out_specs=pl.BlockSpec((tm, tn), lambda i, j: (i, j))),
        compiler_params=pltpu.CompilerParams(
            dimension_semantics=("parallel", "parallel"),
            vmem_limit_bytes=48 * 1024 * 1024),
    )(a_p, w_pad)
    return out[:M, :n_out]


# ----------------------------------------------------------------------------- wrappers
def _vmem_spec():
    return pl.BlockSpec(memory_space=pltpu.MemorySpace.VMEM)


def encode_pallas(x2, valid, wih_f, whh_f, b_f, wih_b, whh_b, b_b, wh2h, wc2c):
    S, Bp, _ = valid.shape
    H = whh_f.shape[0]
    out_shape = (
        jax.ShapeDtypeStruct((S, Bp, 2 * H), jnp.float32),   # bi-LSTM hidden states
        jax.ShapeDtypeStruct((Bp, H), jnp.float32),          # decoder h init
        jax.ShapeDtypeStruct((Bp, H), jnp.float32),          # decoder c init
    )
    return pl.pallas_call(
        _encoder_kernel,
        out_shape=out_shape,
        in_specs=[_vmem_spec() for _ in range(10)],
        out_specs=tuple(_vmem_spec() for _ in range(3)),
        scratch_shapes=[pltpu.VMEM((S * Bp, 4 * H), jnp.float32),    # fwd input gates
                        pltpu.VMEM((S * Bp, 4 * H), jnp.float32),    # bwd input gates
                        pltpu.VMEM((Bp, H), jnp.float32),
                        pltpu.VMEM((Bp, H), jnp.float32),
                        pltpu.VMEM((Bp, H), jnp.float32),
                        pltpu.VMEM((Bp, H), jnp.float32)],
        compiler_params=pltpu.CompilerParams(vmem_limit_bytes=48 * 1024 * 1024),
    )(x2, valid, wih_f, whh_f, b_f, wih_b, whh_b, b_b, wh2h, wc2c)


def decode_pallas(ye2, hs, hsT, pbias, h0, c0, wih_o, wih_x, whh, b,
                  watt, wcomb_a, wcomb_h):
    Bp, S, _ = hs.shape
    H = whh.shape[0]
    T = ye2.shape[0] // Bp
    return pl.pallas_call(
        _decoder_kernel,
        out_shape=jax.ShapeDtypeStruct((T, Bp, H), jnp.float32),
        in_specs=[_vmem_spec() for _ in range(13)],
        out_specs=_vmem_spec(),
        scratch_shapes=[pltpu.VMEM((T * Bp, 4 * H), jnp.float32),    # precomputed ye@Wih
                        pltpu.VMEM((Bp, H), jnp.float32),
                        pltpu.VMEM((Bp, H), jnp.float32),
                        pltpu.VMEM((Bp, H), jnp.float32)],
        compiler_params=pltpu.CompilerParams(vmem_limit_bytes=48 * 1024 * 1024),
    )(ye2, hs, hsT, pbias, h0, c0, wih_o, wih_x, whh, b, watt, wcomb_a, wcomb_h)


def attention_seq2seq_forward(params, src_sents, tgt_sents, src_lens):
    B, S = src_sents.shape
    H = params["whh_f"].shape[0]
    Bp = max(8, _round_up(B, 8))              # sublane-aligned batch for the kernels
    # TODO(synk): for production shapes also pad H to a multiple of 128 and add a
    # batch-parallel / time-chunked grid (v7x: 2 TCs, 64 MiB VMEM); fine at demo sizes.

    # ---- encode ----
    src_emb = jnp.take(params["src_emb"], src_sents, axis=0)        # (B, S, E) bf16
    x_tm = jnp.transpose(src_emb, (1, 0, 2))                        # (S, B, E)
    x_tm = jnp.pad(x_tm, ((0, 0), (0, Bp - B), (0, 0)))
    x2 = x_tm.reshape(S * Bp, -1)                                   # (S*Bp, E) bf16

    lens = jnp.asarray(src_lens, jnp.int32)
    valid = (jnp.arange(S)[:, None] < lens[None, :]).astype(jnp.float32)   # (S, B)
    valid = jnp.pad(valid, ((0, 0), (0, Bp - B)))[:, :, None]              # (S, Bp, 1)

    pad_mask = (src_sents == params["src_pad_id"]).astype(jnp.float32)     # (B, S)
    pad_bias = (jnp.pad(pad_mask, ((0, Bp - B), (0, 0)))[:, None, :]
                * jnp.float32(-1e30))                                      # (Bp, 1, S)

    hs_tm, h0, c0 = encode_pallas(
        x2, valid,
        params["wih_f"], params["whh_f"], params["b_f"],
        params["wih_b"], params["whh_b"], params["b_b"],
        params["wh2h"], params["wc2c"])

    # Both layouts computed ONCE (outside the serial T loop); bf16 for the MXU.
    hs = jnp.transpose(hs_tm, (1, 0, 2)).astype(jnp.bfloat16)       # (Bp, S, 2H) readout
    hsT = jnp.transpose(hs_tm, (1, 2, 0)).astype(jnp.bfloat16)      # (Bp, 2H, S) scores

    # ---- decode (emit per-step combined outputs only) ----
    tgt_in = tgt_sents[:, :-1]
    tgt_emb = jnp.take(params["tgt_emb"], tgt_in, axis=0)           # (B, T-1, E) bf16
    ye_tm = jnp.transpose(tgt_emb, (1, 0, 2))                       # (T-1, B, E)
    ye_tm = jnp.pad(ye_tm, ((0, 0), (0, Bp - B), (0, 0)))
    Tm1 = ye_tm.shape[0]
    ye2 = ye_tm.reshape(Tm1 * Bp, -1)                               # (T-1*Bp, E) bf16

    comb_tm = decode_pallas(
        ye2, hs, hsT, pad_bias, h0, c0,
        params["wih_o"], params["wih_x"], params["whh_d"], params["b_d"],
        params["watt"], params["wcomb_a"], params["wcomb_h"])       # (T-1, Bp, H) f32

    # ---- vocab projection as a separate tiled MXU matmul (padded rows dropped) ----
    comb_flat = comb_tm[:, :B, :].reshape(Tm1 * B, H)
    scores_flat = vocab_projection_pallas(comb_flat, params["wvocab_pad"],
                                          params["tgt_V"])          # (T-1*B, V)
    scores_tm = scores_flat.reshape(Tm1, B, -1)
    return jnp.transpose(scores_tm, (1, 0, 2))                      # (B, T-1, tgt_V)


# ----------------------------------------------------------------------------- params
def init_params(key, E, H, src_V, tgt_V, src_pad_id=0, tgt_pad_id=0):
    keys = jax.random.split(key, 16)

    def nrm(k, shape, scale=0.1):
        return (scale * jax.random.normal(k, shape)).astype(jnp.float32)

    def reorder(w):
        # Gate columns from PyTorch LSTM order [i | f | g | o] to kernel order
        # [i | f | o | g] (one contiguous sigmoid block + one tanh block).
        i, f, g, o = jnp.split(w, 4, axis=-1)
        return jnp.concatenate([i, f, o, g], axis=-1)

    def bf(w):
        return w.astype(jnp.bfloat16)

    src_emb = nrm(keys[0], (src_V, E), 1.0).at[src_pad_id].set(0.0)  # padding_idx row = 0
    tgt_emb = nrm(keys[1], (tgt_V, E), 1.0).at[tgt_pad_id].set(0.0)

    # decoder LSTM: input = [combined(H), embed(E)] -> W_ih (4H, H+E) -> (H+E, 4H)
    wih_d = nrm(keys[10], (H + E, 4 * H))
    # combined_output_projection (H, 3H) -> (3H, H), split into attention / hidden parts
    wcomb = nrm(keys[14], (3 * H, H))
    # decode2vocab (V, H) -> (H, V), pre-padded + bf16 ONCE (avoids per-call HBM churn)
    wvocab = nrm(keys[15], (H, tgt_V))
    Kp = _round_up(H, 128)
    Np = _round_up(tgt_V, 512) if tgt_V > 512 else _round_up(tgt_V, 128)
    wvocab_pad = jnp.zeros((Kp, Np), jnp.bfloat16).at[:H, :tgt_V].set(bf(wvocab))

    # All weight matrices stored pre-transposed (input-dim major), bf16 for the MXU.
    params = dict(
        src_emb=bf(src_emb), tgt_emb=bf(tgt_emb),
        # encoder bi-LSTM: W_ih (4H,E)->(E,4H), W_hh (4H,H)->(H,4H), b = b_ih + b_hh
        wih_f=bf(reorder(nrm(keys[2], (E, 4 * H)))),
        whh_f=bf(reorder(nrm(keys[3], (H, 4 * H)))),
        b_f=reorder(nrm(keys[4], (1, 4 * H))),
        wih_b=bf(reorder(nrm(keys[5], (E, 4 * H)))),
        whh_b=bf(reorder(nrm(keys[6], (H, 4 * H)))),
        b_b=reorder(nrm(keys[7], (1, 4 * H))),
        # encode_{hid,cell}2decode_{hid,cell}_init: (H, 2H) -> (2H, H)
        wh2h=bf(nrm(keys[8], (2 * H, H))),
        wc2c=bf(nrm(keys[9], (2 * H, H))),
        # decoder LSTM input rows split host-side: [:H]=prev combined, [H:]=embedding
        wih_o=bf(reorder(wih_d[:H, :])),
        wih_x=bf(reorder(wih_d[H:, :])),
        whh_d=bf(reorder(nrm(keys[11], (H, 4 * H)))),
        b_d=reorder(nrm(keys[12], (1, 4 * H))),
        # attention_projection (H, 2H) kept untransposed (used as h @ Watt)
        watt=bf(nrm(keys[13], (H, 2 * H))),
        wcomb_a=bf(wcomb[:2 * H, :]),
        wcomb_h=bf(wcomb[2 * H:, :]),
        wvocab_pad=wvocab_pad,
        tgt_V=tgt_V,
        src_pad_id=src_pad_id, tgt_pad_id=tgt_pad_id,
    )
    return params


if __name__ == "__main__":
    key = jax.random.PRNGKey(0)
    B, S, T = 2, 10, 8          # batch, src_seq_len, tgt_seq_len
    E, H = 16, 32               # embed_size, hidden_size
    src_V, tgt_V = 48, 56       # synthetic vocab sizes (pad id = 0 for both)

    params = init_params(key, E, H, src_V, tgt_V)

    k1, k2 = jax.random.split(jax.random.fold_in(key, 7), 2)
    src_sents = jax.random.randint(k1, (B, S), 2, src_V, dtype=jnp.int32)
    tgt_sents = jax.random.randint(k2, (B, T), 2, tgt_V, dtype=jnp.int32)
    # Second sentence shorter (lengths sorted descending); pad its tail so the
    # masked-attention / packed-sequence paths are exercised.
    src_lens = [S, S - 3]
    src_sents = src_sents.at[1, S - 3:].set(params["src_pad_id"])

    scores = attention_seq2seq_forward(params, src_sents, tgt_sents, src_lens)
    scores = jax.block_until_ready(scores)

    assert scores.shape == (B, T - 1, tgt_V), scores.shape
    assert bool(jnp.all(jnp.isfinite(scores)))
    print("KERNEL_OK")
</pallas_src>

<mosaic_0001>
module attributes {stable_mosaic.version = 11 : i64} {
  func.func @_encoder_kernel(%arg0: memref<80x16xbf16, #tpu.memory_space<vmem>>, %arg1: memref<10x8x1xf32, #tpu.memory_space<vmem>>, %arg2: memref<16x128xbf16, #tpu.memory_space<vmem>>, %arg3: memref<32x128xbf16, #tpu.memory_space<vmem>>, %arg4: memref<1x128xf32, #tpu.memory_space<vmem>>, %arg5: memref<16x128xbf16, #tpu.memory_space<vmem>>, %arg6: memref<32x128xbf16, #tpu.memory_space<vmem>>, %arg7: memref<1x128xf32, #tpu.memory_space<vmem>>, %arg8: memref<64x32xbf16, #tpu.memory_space<vmem>>, %arg9: memref<64x32xbf16, #tpu.memory_space<vmem>>, %arg10: memref<10x8x64xf32, #tpu.memory_space<vmem>>, %arg11: memref<8x32xf32, #tpu.memory_space<vmem>>, %arg12: memref<8x32xf32, #tpu.memory_space<vmem>>, %arg13: memref<80x128xf32, #tpu.memory_space<vmem>>, %arg14: memref<80x128xf32, #tpu.memory_space<vmem>>, %arg15: memref<8x32xf32, #tpu.memory_space<vmem>>, %arg16: memref<8x32xf32, #tpu.memory_space<vmem>>, %arg17: memref<8x32xf32, #tpu.memory_space<vmem>>, %arg18: memref<8x32xf32, #tpu.memory_space<vmem>>) attributes {dimension_semantics = [], scalar_prefetch = 0 : i64, scratch_operands = 6 : i64, tpu.core_type = #tpu.core_type<tc>} {
    %c0 = arith.constant 0 : index
    %c0_0 = arith.constant 0 : index
    %0 = vector.load %arg0[%c0, %c0_0] : memref<80x16xbf16, #tpu.memory_space<vmem>>, vector<80x16xbf16>
    %c0_1 = arith.constant 0 : index
    %c0_2 = arith.constant 0 : index
    %1 = vector.load %arg2[%c0_1, %c0_2] : memref<16x128xbf16, #tpu.memory_space<vmem>>, vector<16x128xbf16>
    %cst = arith.constant dense<0.000000e+00> : vector<80x128xf32>
    %2 = tpu.matmul %0, %1, %cst {dimension_numbers = #tpu.dot_dimension_numbers<[1], [0], [0], [1], [0, 0, 1, 1], [], []>} : vector<80x16xbf16>, vector<16x128xbf16>, vector<80x128xf32> -> vector<80x128xf32>
    %c0_3 = arith.constant 0 : index
    %c0_4 = arith.constant 0 : index
    %3 = vector.load %arg4[%c0_3, %c0_4] : memref<1x128xf32, #tpu.memory_space<vmem>>, vector<1x128xf32>
    %4 = vector.broadcast %3 : vector<1x128xf32> to vector<80x128xf32>
    %5 = arith.addf %2, %4 : vector<80x128xf32>
    %c0_5 = arith.constant 0 : index
    %c0_6 = arith.constant 0 : index
    %6 = vector.load %arg13[%c0_5, %c0_6] : memref<80x128xf32, #tpu.memory_space<vmem>>, vector<80x128xf32>
    tpu.vector_store %arg13[%c0_5, %c0_6], %5 {strides = array<i32>} : memref<80x128xf32, #tpu.memory_space<vmem>>, vector<80x128xf32>,
    %c0_7 = arith.constant 0 : index
    %c0_8 = arith.constant 0 : index
    %7 = vector.load %arg5[%c0_7, %c0_8] : memref<16x128xbf16, #tpu.memory_space<vmem>>, vector<16x128xbf16>
    %cst_9 = arith.constant dense<0.000000e+00> : vector<80x128xf32>
    %8 = tpu.matmul %0, %7, %cst_9 {dimension_numbers = #tpu.dot_dimension_numbers<[1], [0], [0], [1], [0, 0, 1, 1], [], []>} : vector<80x16xbf16>, vector<16x128xbf16>, vector<80x128xf32> -> vector<80x128xf32>
    %c0_10 = arith.constant 0 : index
    %c0_11 = arith.constant 0 : index
    %9 = vector.load %arg7[%c0_10, %c0_11] : memref<1x128xf32, #tpu.memory_space<vmem>>, vector<1x128xf32>
    %10 = vector.broadcast %9 : vector<1x128xf32> to vector<80x128xf32>
    %11 = arith.addf %8, %10 : vector<80x128xf32>
    %c0_12 = arith.constant 0 : index
    %c0_13 = arith.constant 0 : index
    %12 = vector.load %arg14[%c0_12, %c0_13] : memref<80x128xf32, #tpu.memory_space<vmem>>, vector<80x128xf32>
    tpu.vector_store %arg14[%c0_12, %c0_13], %11 {strides = array<i32>} : memref<80x128xf32, #tpu.memory_space<vmem>>, vector<80x128xf32>,
    %cst_14 = arith.constant 0.000000e+00 : f32
    %13 = vector.broadcast %cst_14 : f32 to vector<8x32xf32>
    %c0_15 = arith.constant 0 : index
    %c0_16 = arith.constant 0 : index
    %14 = vector.load %arg15[%c0_15, %c0_16] : memref<8x32xf32, #tpu.memory_space<vmem>>, vector<8x32xf32>
    tpu.vector_store %arg15[%c0_15, %c0_16], %13 {strides = array<i32>} : memref<8x32xf32, #tpu.memory_space<vmem>>, vector<8x32xf32>,
    %cst_17 = arith.constant 0.000000e+00 : f32
    %15 = vector.broadcast %cst_17 : f32 to vector<8x32xf32>
    %c0_18 = arith.constant 0 : index
    %c0_19 = arith.constant 0 : index
    %16 = vector.load %arg16[%c0_18, %c0_19] : memref<8x32xf32, #tpu.memory_space<vmem>>, vector<8x32xf32>
    tpu.vector_store %arg16[%c0_18, %c0_19], %15 {strides = array<i32>} : memref<8x32xf32, #tpu.memory_space<vmem>>, vector<8x32xf32>,
    %cst_20 = arith.constant 0.000000e+00 : f32
    %17 = vector.broadcast %cst_20 : f32 to vector<8x32xf32>
    %c0_21 = arith.constant 0 : index
    %c0_22 = arith.constant 0 : index
    %18 = vector.load %arg17[%c0_21, %c0_22] : memref<8x32xf32, #tpu.memory_space<vmem>>, vector<8x32xf32>
    tpu.vector_store %arg17[%c0_21, %c0_22], %17 {strides = array<i32>} : memref<8x32xf32, #tpu.memory_space<vmem>>, vector<8x32xf32>,
    %cst_23 = arith.constant 0.000000e+00 : f32
    %19 = vector.broadcast %cst_23 : f32 to vector<8x32xf32>
    %c0_24 = arith.constant 0 : index
    %c0_25 = arith.constant 0 : index
    %20 = vector.load %arg18[%c0_24, %c0_25] : memref<8x32xf32, #tpu.memory_space<vmem>>, vector<8x32xf32>
    tpu.vector_store %arg18[%c0_24, %c0_25], %19 {strides = array<i32>} : memref<8x32xf32, #tpu.memory_space<vmem>>, vector<8x32xf32>,
    %c0_i32 = arith.constant 0 : i32
    %c9_i32 = arith.constant 9 : i32
    %21 = arith.subi %c9_i32, %c0_i32 : i32
    %22 = arith.index_cast %c0_i32 : i32 to index
    %c0_26 = arith.constant 0 : index
    %c0_27 = arith.constant 0 : index
    %23 = vector.load %arg1[%22, %c0_26, %c0_27] : memref<10x8x1xf32, #tpu.memory_space<vmem>>, vector<1x8x1xf32>
    %24 = vector.shape_cast %23 : vector<1x8x1xf32> to vector<8x1xf32>
    %25 = arith.index_cast %21 : i32 to index
    %c0_28 = arith.constant 0 : index
    %c0_29 = arith.constant 0 : index
    %26 = vector.load %arg1[%25, %c0_28, %c0_29] : memref<10x8x1xf32, #tpu.memory_space<vmem>>, vector<1x8x1xf32>
    %27 = vector.shape_cast %26 : vector<1x8x1xf32> to vector<8x1xf32>
    %c8_i32 = arith.constant 8 : i32
    %28 = arith.muli %c0_i32, %c8_i32 : i32
    %29 = tpu.assume_multiple %28, 8 : i32
    %c8_i32_30 = arith.constant 8 : i32
    %30 = arith.muli %21, %c8_i32_30 : i32
    %31 = tpu.assume_multiple %30, 8 : i32
    %32 = arith.index_cast %29 : i32 to index
    %c0_31 = arith.constant 0 : index
    %33 = vector.load %arg13[%32, %c0_31] : memref<80x128xf32, #tpu.memory_space<vmem>>, vector<8x128xf32>
    %c0_32 = arith.constant 0 : index
    %c0_33 = arith.constant 0 : index
    %34 = vector.load %arg15[%c0_32, %c0_33] : memref<8x32xf32, #tpu.memory_space<vmem>>, vector<8x32xf32>
    %c0_34 = arith.constant 0 : index
    %c0_35 = arith.constant 0 : index
    %35 = vector.load %arg16[%c0_34, %c0_35] : memref<8x32xf32, #tpu.memory_space<vmem>>, vector<8x32xf32>
    %36 = arith.truncf %34 : vector<8x32xf32> to vector<8x32xbf16>
    %c0_36 = arith.constant 0 : index
    %c0_37 = arith.constant 0 : index
    %37 = vector.load %arg3[%c0_36, %c0_37] : memref<32x128xbf16, #tpu.memory_space<vmem>>, vector<32x128xbf16>
    %cst_38 = arith.constant dense<0.000000e+00> : vector<8x128xf32>
    %38 = tpu.matmul %36, %37, %cst_38 {dimension_numbers = #tpu.dot_dimension_numbers<[1], [0], [0], [1], [0, 0, 1, 1], [], []>} : vector<8x32xbf16>, vector<32x128xbf16>, vector<8x128xf32> -> vector<8x128xf32>
    %39 = arith.addf %33, %38 : vector<8x128xf32>
    %40 = vector.extract_strided_slice %39 {offsets = [0, 0], sizes = [8, 96], strides = [1, 1]} : vector<8x128xf32> to vector<8x96xf32>
    %41 = arith.negf %40 : vector<8x96xf32>
    %42 = math.exp %41 : vector<8x96xf32>
    %cst_39 = arith.constant 1.000000e+00 : f32
    %43 = vector.broadcast %cst_39 : f32 to vector<8x96xf32>
    %44 = arith.addf %43, %42 : vector<8x96xf32>
    %45 = arith.divf %43, %44 : vector<8x96xf32>
    %46 = vector.extract_strided_slice %39 {offsets = [0, 96], sizes = [8, 32], strides = [1, 1]} : vector<8x128xf32> to vector<8x32xf32>
    %47 = math.tanh %46 : vector<8x32xf32>
    %48 = vector.extract_strided_slice %45 {offsets = [0, 32], sizes = [8, 32], strides = [1, 1]} : vector<8x96xf32> to vector<8x32xf32>
    %49 = arith.mulf %48, %35 : vector<8x32xf32>
    %50 = vector.extract_strided_slice %45 {offsets = [0, 0], sizes = [8, 32], strides = [1, 1]} : vector<8x96xf32> to vector<8x32xf32>
    %51 = arith.mulf %50, %47 : vector<8x32xf32>
    %52 = arith.addf %49, %51 : vector<8x32xf32>
    %53 = vector.extract_strided_slice %45 {offsets = [0, 64], sizes = [8, 32], strides = [1, 1]} : vector<8x96xf32> to vector<8x32xf32>
    %54 = math.tanh %52 : vector<8x32xf32>
    %55 = arith.mulf %53, %54 : vector<8x32xf32>
    %56 = vector.broadcast %24 : vector<8x1xf32> to vector<8x32xf32>
    %57 = arith.mulf %56, %55 : vector<8x32xf32>
    %cst_40 = arith.constant 1.000000e+00 : f32
    %58 = vector.broadcast %cst_40 : f32 to vector<8x1xf32>
    %59 = arith.subf %58, %24 : vector<8x1xf32>
    %60 = vector.broadcast %59 : vector<8x1xf32> to vector<8x32xf32>
    %61 = arith.mulf %60, %34 : vector<8x32xf32>
    %62 = arith.addf %57, %61 : vector<8x32xf32>
    %63 = vector.broadcast %24 : vector<8x1xf32> to vector<8x32xf32>
    %64 = arith.mulf %63, %52 : vector<8x32xf32>
    %cst_41 = arith.constant 1.000000e+00 : f32
    %65 = vector.broadcast %cst_41 : f32 to vector<8x1xf32>
    %66 = arith.subf %65, %24 : vector<8x1xf32>
    %67 = vector.broadcast %66 : vector<8x1xf32> to vector<8x32xf32>
    %68 = arith.mulf %67, %35 : vector<8x32xf32>
    %69 = arith.addf %64, %68 : vector<8x32xf32>
    %70 = arith.index_cast %31 : i32 to index
    %c0_42 = arith.constant 0 : index
    %71 = vector.load %arg14[%70, %c0_42] : memref<80x128xf32, #tpu.memory_space<vmem>>, vector<8x128xf32>
    %c0_43 = arith.constant 0 : index
    %c0_44 = arith.constant 0 : index
    %72 = vector.load %arg17[%c0_43, %c0_44] : memref<8x32xf32, #tpu.memory_space<vmem>>, vector<8x32xf32>
    %c0_45 = arith.constant 0 : index
    %c0_46 = arith.constant 0 : index
    %73 = vector.load %arg18[%c0_45, %c0_46] : memref<8x32xf32, #tpu.memory_space<vmem>>, vector<8x32xf32>
    %74 = arith.truncf %72 : vector<8x32xf32> to vector<8x32xbf16>
    %c0_47 = arith.constant 0 : index
    %c0_48 = arith.constant 0 : index
    %75 = vector.load %arg6[%c0_47, %c0_48] : memref<32x128xbf16, #tpu.memory_space<vmem>>, vector<32x128xbf16>
    %cst_49 = arith.constant dense<0.000000e+00> : vector<8x128xf32>
    %76 = tpu.matmul %74, %75, %cst_49 {dimension_numbers = #tpu.dot_dimension_numbers<[1], [0], [0], [1], [0, 0, 1, 1], [], []>} : vector<8x32xbf16>, vector<32x128xbf16>, vector<8x128xf32> -> vector<8x128xf32>
    %77 = arith.addf %71, %76 : vector<8x128xf32>
    %78 = vector.extract_strided_slice %77 {offsets = [0, 0], sizes = [8, 96], strides = [1, 1]} : vector<8x128xf32> to vector<8x96xf32>
    %79 = arith.negf %78 : vector<8x96xf32>
    %80 = math.exp %79 : vector<8x96xf32>
    %cst_50 = arith.constant 1.000000e+00 : f32
    %81 = vector.broadcast %cst_50 : f32 to vector<8x96xf32>
    %82 = arith.addf %81, %80 : vector<8x96xf32>
    %83 = arith.divf %81, %82 : vector<8x96xf32>
    %84 = vector.extract_strided_slice %77 {offsets = [0, 96], sizes = [8, 32], strides = [1, 1]} : vector<8x128xf32> to vector<8x32xf32>
    %85 = math.tanh %84 : vector<8x32xf32>
    %86 = vector.extract_strided_slice %83 {offsets = [0, 32], sizes = [8, 32], strides = [1, 1]} : vector<8x96xf32> to vector<8x32xf32>
    %87 = arith.mulf %86, %73 : vector<8x32xf32>
    %88 = vector.extract_strided_slice %83 {offsets = [0, 0], sizes = [8, 32], strides = [1, 1]} : vector<8x96xf32> to vector<8x32xf32>
    %89 = arith.mulf %88, %85 : vector<8x32xf32>
    %90 = arith.addf %87, %89 : vector<8x32xf32>
    %91 = vector.extract_strided_slice %83 {offsets = [0, 64], sizes = [8, 32], strides = [1, 1]} : vector<8x96xf32> to vector<8x32xf32>
    %92 = math.tanh %90 : vector<8x32xf32>
    %93 = arith.mulf %91, %92 : vector<8x32xf32>
    %94 = vector.broadcast %27 : vector<8x1xf32> to vector<8x32xf32>
    %95 = arith.mulf %94, %93 : vector<8x32xf32>
    %cst_51 = arith.constant 1.000000e+00 : f32
    %96 = vector.broadcast %cst_51 : f32 to vector<8x1xf32>
    %97 = arith.subf %96, %27 : vector<8x1xf32>
    %98 = vector.broadcast %97 : vector<8x1xf32> to vector<8x32xf32>
    %99 = arith.mulf %98, %72 : vector<8x32xf32>
    %100 = arith.addf %95, %99 : vector<8x32xf32>
    %101 = vector.broadcast %27 : vector<8x1xf32> to vector<8x32xf32>
    %102 = arith.mulf %101, %90 : vector<8x32xf32>
    %cst_52 = arith.constant 1.000000e+00 : f32
    %103 = vector.broadcast %cst_52 : f32 to vector<8x1xf32>
    %104 = arith.subf %103, %27 : vector<8x1xf32>
    %105 = vector.broadcast %104 : vector<8x1xf32> to vector<8x32xf32>
    %106 = arith.mulf %105, %73 : vector<8x32xf32>
    %107 = arith.addf %102, %106 : vector<8x32xf32>
    %c0_53 = arith.constant 0 : index
    %c0_54 = arith.constant 0 : index
    %108 = vector.load %arg15[%c0_53, %c0_54] : memref<8x32xf32, #tpu.memory_space<vmem>>, vector<8x32xf32>
    tpu.vector_store %arg15[%c0_53, %c0_54], %62 {strides = array<i32>} : memref<8x32xf32, #tpu.memory_space<vmem>>, vector<8x32xf32>,
    %c0_55 = arith.constant 0 : index
    %c0_56 = arith.constant 0 : index
    %109 = vector.load %arg16[%c0_55, %c0_56] : memref<8x32xf32, #tpu.memory_space<vmem>>, vector<8x32xf32>
    tpu.vector_store %arg16[%c0_55, %c0_56], %69 {strides = array<i32>} : memref<8x32xf32, #tpu.memory_space<vmem>>, vector<8x32xf32>,
    %c0_57 = arith.constant 0 : index
    %c0_58 = arith.constant 0 : index
    %110 = vector.load %arg17[%c0_57, %c0_58] : memref<8x32xf32, #tpu.memory_space<vmem>>, vector<8x32xf32>
    tpu.vector_store %arg17[%c0_57, %c0_58], %100 {strides = array<i32>} : memref<8x32xf32, #tpu.memory_space<vmem>>, vector<8x32xf32>,
    %c0_59 = arith.constant 0 : index
    %c0_60 = arith.constant 0 : index
    %111 = vector.load %arg18[%c0_59, %c0_60] : memref<8x32xf32, #tpu.memory_space<vmem>>, vector<8x32xf32>
    tpu.vector_store %arg18[%c0_59, %c0_60], %107 {strides = array<i32>} : memref<8x32xf32, #tpu.memory_space<vmem>>, vector<8x32xf32>,
    %112 = vector.broadcast %24 : vector<8x1xf32> to vector<8x32xf32>
    %113 = arith.mulf %62, %112 : vector<8x32xf32>
    %114 = arith.index_cast %c0_i32 : i32 to index
    %c0_61 = arith.constant 0 : index
    %c0_62 = arith.constant 0 : index
    %115 = vector.load %arg10[%114, %c0_61, %c0_62] : memref<10x8x64xf32, #tpu.memory_space<vmem>>, vector<1x8x32xf32>
    %116 = vector.shape_cast %115 : vector<1x8x32xf32> to vector<8x32xf32>
    %117 = vector.shape_cast %113 : vector<8x32xf32> to vector<1x8x32xf32>
    tpu.vector_store %arg10[%114, %c0_61, %c0_62], %117 {strides = array<i32>} : memref<10x8x64xf32, #tpu.memory_space<vmem>>, vector<1x8x32xf32>,
    %118 = vector.broadcast %27 : vector<8x1xf32> to vector<8x32xf32>
    %119 = arith.mulf %100, %118 : vector<8x32xf32>
    %120 = arith.index_cast %21 : i32 to index
    %c0_63 = arith.constant 0 : index
    %c32 = arith.constant 32 : index
    %121 = vector.load %arg10[%120, %c0_63, %c32] : memref<10x8x64xf32, #tpu.memory_space<vmem>>, vector<1x8x32xf32>
    %122 = vector.shape_cast %121 : vector<1x8x32xf32> to vector<8x32xf32>
    %123 = vector.shape_cast %119 : vector<8x32xf32> to vector<1x8x32xf32>
    tpu.vector_store %arg10[%120, %c0_63, %c32], %123 {strides = array<i32>} : memref<10x8x64xf32, #tpu.memory_space<vmem>>, vector<1x8x32xf32>,
    %c1_i32 = arith.constant 1 : i32
    %c9_i32_64 = arith.constant 9 : i32
    %124 = arith.subi %c9_i32_64, %c1_i32 : i32
    %125 = arith.index_cast %c1_i32 : i32 to index
    %c0_65 = arith.constant 0 : index
    %c0_66 = arith.constant 0 : index
    %126 = vector.load %arg1[%125, %c0_65, %c0_66] : memref<10x8x1xf32, #tpu.memory_space<vmem>>, vector<1x8x1xf32>
    %127 = vector.shape_cast %126 : vector<1x8x1xf32> to vector<8x1xf32>
    %128 = arith.index_cast %124 : i32 to index
    %c0_67 = arith.constant 0 : index
    %c0_68 = arith.constant 0 : index
    %129 = vector.load %arg1[%128, %c0_67, %c0_68] : memref<10x8x1xf32, #tpu.memory_space<vmem>>, vector<1x8x1xf32>
    %130 = vector.shape_cast %129 : vector<1x8x1xf32> to vector<8x1xf32>
    %c8_i32_69 = arith.constant 8 : i32
    %131 = arith.muli %c1_i32, %c8_i32_69 : i32
    %132 = tpu.assume_multiple %131, 8 : i32
    %c8_i32_70 = arith.constant 8 : i32
    %133 = arith.muli %124, %c8_i32_70 : i32
    %134 = tpu.assume_multiple %133, 8 : i32
    %135 = arith.index_cast %132 : i32 to index
    %c0_71 = arith.constant 0 : index
    %136 = vector.load %arg13[%135, %c0_71] : memref<80x128xf32, #tpu.memory_space<vmem>>, vector<8x128xf32>
    %c0_72 = arith.constant 0 : index
    %c0_73 = arith.constant 0 : index
    %137 = vector.load %arg15[%c0_72, %c0_73] : memref<8x32xf32, #tpu.memory_space<vmem>>, vector<8x32xf32>
    %c0_74 = arith.constant 0 : index
    %c0_75 = arith.constant 0 : index
    %138 = vector.load %arg16[%c0_74, %c0_75] : memref<8x32xf32, #tpu.memory_space<vmem>>, vector<8x32xf32>
    %139 = arith.truncf %137 : vector<8x32xf32> to vector<8x32xbf16>
    %c0_76 = arith.constant 0 : index
    %c0_77 = arith.constant 0 : index
    %140 = vector.load %arg3[%c0_76, %c0_77] : memref<32x128xbf16, #tpu.memory_space<vmem>>, vector<32x128xbf16>
    %cst_78 = arith.constant dense<0.000000e+00> : vector<8x128xf32>
    %141 = tpu.matmul %139, %140, %cst_78 {dimension_numbers = #tpu.dot_dimension_numbers<[1], [0], [0], [1], [0, 0, 1, 1], [], []>} : vector<8x32xbf16>, vector<32x128xbf16>, vector<8x128xf32> -> vector<8x128xf32>
    %142 = arith.addf %136, %141 : vector<8x128xf32>
    %143 = vector.extract_strided_slice %142 {offsets = [0, 0], sizes = [8, 96], strides = [1, 1]} : vector<8x128xf32> to vector<8x96xf32>
    %144 = arith.negf %143 : vector<8x96xf32>
    %145 = math.exp %144 : vector<8x96xf32>
    %cst_79 = arith.constant 1.000000e+00 : f32
    %146 = vector.broadcast %cst_79 : f32 to vector<8x96xf32>
    %147 = arith.addf %146, %145 : vector<8x96xf32>
    %148 = arith.divf %146, %147 : vector<8x96xf32>
    %149 = vector.extract_strided_slice %142 {offsets = [0, 96], sizes = [8, 32], strides = [1, 1]} : vector<8x128xf32> to vector<8x32xf32>
    %150 = math.tanh %149 : vector<8x32xf32>
    %151 = vector.extract_strided_slice %148 {offsets = [0, 32], sizes = [8, 32], strides = [1, 1]} : vector<8x96xf32> to vector<8x32xf32>
    %152 = arith.mulf %151, %138 : vector<8x32xf32>
    %153 = vector.extract_strided_slice %148 {offsets = [0, 0], sizes = [8, 32], strides = [1, 1]} : vector<8x96xf32> to vector<8x32xf32>
    %154 = arith.mulf %153, %150 : vector<8x32xf32>
    %155 = arith.addf %152, %154 : vector<8x32xf32>
    %156 = vector.extract_strided_slice %148 {offsets = [0, 64], sizes = [8, 32], strides = [1, 1]} : vector<8x96xf32> to vector<8x32xf32>
    %157 = math.tanh %155 : vector<8x32xf32>
    %158 = arith.mulf %156, %157 : vector<8x32xf32>
    %159 = vector.broadcast %127 : vector<8x1xf32> to vector<8x32xf32>
    %160 = arith.mulf %159, %158 : vector<8x32xf32>
    %cst_80 = arith.constant 1.000000e+00 : f32
    %161 = vector.broadcast %cst_80 : f32 to vector<8x1xf32>
    %162 = arith.subf %161, %127 : vector<8x1xf32>
    %163 = vector.broadcast %162 : vector<8x1xf32> to vector<8x32xf32>
    %164 = arith.mulf %163, %137 : vector<8x32xf32>
    %165 = arith.addf %160, %164 : vector<8x32xf32>
    %166 = vector.broadcast %127 : vector<8x1xf32> to vector<8x32xf32>
    %167 = arith.mulf %166, %155 : vector<8x32xf32>
    %cst_81 = arith.constant 1.000000e+00 : f32
    %168 = vector.broadcast %cst_81 : f32 to vector<8x1xf32>
    %169 = arith.subf %168, %127 : vector<8x1xf32>
    %170 = vector.broadcast %169 : vector<8x1xf32> to vector<8x32xf32>
    %171 = arith.mulf %170, %138 : vector<8x32xf32>
    %172 = arith.addf %167, %171 : vector<8x32xf32>
    %173 = arith.index_cast %134 : i32 to index
    %c0_82 = arith.constant 0 : index
    %174 = vector.load %arg14[%173, %c0_82] : memref<80x128xf32, #tpu.memory_space<vmem>>, vector<8x128xf32>
    %c0_83 = arith.constant 0 : index
    %c0_84 = arith.constant 0 : index
    %175 = vector.load %arg17[%c0_83, %c0_84] : memref<8x32xf32, #tpu.memory_space<vmem>>, vector<8x32xf32>
    %c0_85 = arith.constant 0 : index
    %c0_86 = arith.constant 0 : index
    %176 = vector.load %arg18[%c0_85, %c0_86] : memref<8x32xf32, #tpu.memory_space<vmem>>, vector<8x32xf32>
    %177 = arith.truncf %175 : vector<8x32xf32> to vector<8x32xbf16>
    %c0_87 = arith.constant 0 : index
    %c0_88 = arith.constant 0 : index
    %178 = vector.load %arg6[%c0_87, %c0_88] : memref<32x128xbf16, #tpu.memory_space<vmem>>, vector<32x128xbf16>
    %cst_89 = arith.constant dense<0.000000e+00> : vector<8x128xf32>
    %179 = tpu.matmul %177, %178, %cst_89 {dimension_numbers = #tpu.dot_dimension_numbers<[1], [0], [0], [1], [0, 0, 1, 1], [], []>} : vector<8x32xbf16>, vector<32x128xbf16>, vector<8x128xf32> -> vector<8x128xf32>
    %180 = arith.addf %174, %179 : vector<8x128xf32>
    %181 = vector.extract_strided_slice %180 {offsets = [0, 0], sizes = [8, 96], strides = [1, 1]} : vector<8x128xf32> to vector<8x96xf32>
    %182 = arith.negf %181 : vector<8x96xf32>
    %183 = math.exp %182 : vector<8x96xf32>
    %cst_90 = arith.constant 1.000000e+00 : f32
    %184 = vector.broadcast %cst_90 : f32 to vector<8x96xf32>
    %185 = arith.addf %184, %183 : vector<8x96xf32>
    %186 = arith.divf %184, %185 : vector<8x96xf32>
    %187 = vector.extract_strided_slice %180 {offsets = [0, 96], sizes = [8, 32], strides = [1, 1]} : vector<8x128xf32> to vector<8x32xf32>
    %188 = math.tanh %187 : vector<8x32xf32>
    %189 = vector.extract_strided_slice %186 {offsets = [0, 32], sizes = [8, 32], strides = [1, 1]} : vector<8x96xf32> to vector<8x32xf32>
    %190 = arith.mulf %189, %176 : vector<8x32xf32>
    %191 = vector.extract_strided_slice %186 {offsets = [0, 0], sizes = [8, 32], strides = [1, 1]} : vector<8x96xf32> to vector<8x32xf32>
    %192 = arith.mulf %191, %188 : vector<8x32xf32>
    %193 = arith.addf %190, %192 : vector<8x32xf32>
    %194 = vector.extract_strided_slice %186 {offsets = [0, 64], sizes = [8, 32], strides = [1, 1]} : vector<8x96xf32> to vector<8x32xf32>
    %195 = math.tanh %193 : vector<8x32xf32>
    %196 = arith.mulf %194, %195 : vector<8x32xf32>
    %197 = vector.broadcast %130 : vector<8x1xf32> to vector<8x32xf32>
    %198 = arith.mulf %197, %196 : vector<8x32xf32>
    %cst_91 = arith.constant 1.000000e+00 : f32
    %199 = vector.broadcast %cst_91 : f32 to vector<8x1xf32>
    %200 = arith.subf %199, %130 : vector<8x1xf32>
    %201 = vector.broadcast %200 : vector<8x1xf32> to vector<8x32xf32>
    %202 = arith.mulf %201, %175 : vector<8x32xf32>
    %203 = arith.addf %198, %202 : vector<8x32xf32>
    %204 = vector.broadcast %130 : vector<8x1xf32> to vector<8x32xf32>
    %205 = arith.mulf %204, %193 : vector<8x32xf32>
    %cst_92 = arith.constant 1.000000e+00 : f32
    %206 = vector.broadcast %cst_92 : f32 to vector<8x1xf32>
    %207 = arith.subf %206, %130 : vector<8x1xf32>
    %208 = vector.broadcast %207 : vector<8x1xf32> to vector<8x32xf32>
    %209 = arith.mulf %208, %176 : vector<8x32xf32>
    %210 = arith.addf %205, %209 : vector<8x32xf32>
    %c0_93 = arith.constant 0 : index
    %c0_94 = arith.constant 0 : index
    %211 = vector.load %arg15[%c0_93, %c0_94] : memref<8x32xf32, #tpu.memory_space<vmem>>, vector<8x32xf32>
    tpu.vector_store %arg15[%c0_93, %c0_94], %165 {strides = array<i32>} : memref<8x32xf32, #tpu.memory_space<vmem>>, vector<8x32xf32>,
    %c0_95 = arith.constant 0 : index
    %c0_96 = arith.constant 0 : index
    %212 = vector.load %arg16[%c0_95, %c0_96] : memref<8x32xf32, #tpu.memory_space<vmem>>, vector<8x32xf32>
    tpu.vector_store %arg16[%c0_95, %c0_96], %172 {strides = array<i32>} : memref<8x32xf32, #tpu.memory_space<vmem>>, vector<8x32xf32>,
    %c0_97 = arith.constant 0 : index
    %c0_98 = arith.constant 0 : index
    %213 = vector.load %arg17[%c0_97, %c0_98] : memref<8x32xf32, #tpu.memory_space<vmem>>, vector<8x32xf32>
    tpu.vector_store %arg17[%c0_97, %c0_98], %203 {strides = array<i32>} : memref<8x32xf32, #tpu.memory_space<vmem>>, vector<8x32xf32>,
    %c0_99 = arith.constant 0 : index
    %c0_100 = arith.constant 0 : index
    %214 = vector.load %arg18[%c0_99, %c0_100] : memref<8x32xf32, #tpu.memory_space<vmem>>, vector<8x32xf32>
    tpu.vector_store %arg18[%c0_99, %c0_100], %210 {strides = array<i32>} : memref<8x32xf32, #tpu.memory_space<vmem>>, vector<8x32xf32>,
    %215 = vector.broadcast %127 : vector<8x1xf32> to vector<8x32xf32>
    %216 = arith.mulf %165, %215 : vector<8x32xf32>
    %217 = arith.index_cast %c1_i32 : i32 to index
    %c0_101 = arith.constant 0 : index
    %c0_102 = arith.constant 0 : index
    %218 = vector.load %arg10[%217, %c0_101, %c0_102] : memref<10x8x64xf32, #tpu.memory_space<vmem>>, vector<1x8x32xf32>
    %219 = vector.shape_cast %218 : vector<1x8x32xf32> to vector<8x32xf32>
    %220 = vector.shape_cast %216 : vector<8x32xf32> to vector<1x8x32xf32>
    tpu.vector_store %arg10[%217, %c0_101, %c0_102], %220 {strides = array<i32>} : memref<10x8x64xf32, #tpu.memory_space<vmem>>, vector<1x8x32xf32>,
    %221 = vector.broadcast %130 : vector<8x1xf32> to vector<8x32xf32>
    %222 = arith.mulf %203, %221 : vector<8x32xf32>
    %223 = arith.index_cast %124 : i32 to index
    %c0_103 = arith.constant 0 : index
    %c32_104 = arith.constant 32 : index
    %224 = vector.load %arg10[%223, %c0_103, %c32_104] : memref<10x8x64xf32, #tpu.memory_space<vmem>>, vector<1x8x32xf32>
    %225 = vector.shape_cast %224 : vector<1x8x32xf32> to vector<8x32xf32>
    %226 = vector.shape_cast %222 : vector<8x32xf32> to vector<1x8x32xf32>
    tpu.vector_store %arg10[%223, %c0_103, %c32_104], %226 {strides = array<i32>} : memref<10x8x64xf32, #tpu.memory_space<vmem>>, vector<1x8x32xf32>,
    %c2_i32 = arith.constant 2 : i32
    %c9_i32_105 = arith.constant 9 : i32
    %227 = arith.subi %c9_i32_105, %c2_i32 : i32
    %228 = arith.index_cast %c2_i32 : i32 to index
    %c0_106 = arith.constant 0 : index
    %c0_107 = arith.constant 0 : index
    %229 = vector.load %arg1[%228, %c0_106, %c0_107] : memref<10x8x1xf32, #tpu.memory_space<vmem>>, vector<1x8x1xf32>
    %230 = vector.shape_cast %229 : vector<1x8x1xf32> to vector<8x1xf32>
    %231 = arith.index_cast %227 : i32 to index
    %c0_108 = arith.constant 0 : index
    %c0_109 = arith.constant 0 : index
    %232 = vector.load %arg1[%231, %c0_108, %c0_109] : memref<10x8x1xf32, #tpu.memory_space<vmem>>, vector<1x8x1xf32>
    %233 = vector.shape_cast %232 : vector<1x8x1xf32> to vector<8x1xf32>
    %c8_i32_110 = arith.constant 8 : i32
    %234 = arith.muli %c2_i32, %c8_i32_110 : i32
    %235 = tpu.assume_multiple %234, 8 : i32
    %c8_i32_111 = arith.constant 8 : i32
    %236 = arith.muli %227, %c8_i32_111 : i32
    %237 = tpu.assume_multiple %236, 8 : i32
    %238 = arith.index_cast %235 : i32 to index
    %c0_112 = arith.constant 0 : index
    %239 = vector.load %arg13[%238, %c0_112] : memref<80x128xf32, #tpu.memory_space<vmem>>, vector<8x128xf32>
    %c0_113 = arith.constant 0 : index
    %c0_114 = arith.constant 0 : index
    %240 = vector.load %arg15[%c0_113, %c0_114] : memref<8x32xf32, #tpu.memory_space<vmem>>, vector<8x32xf32>
    %c0_115 = arith.constant 0 : index
    %c0_116 = arith.constant 0 : index
    %241 = vector.load %arg16[%c0_115, %c0_116] : memref<8x32xf32, #tpu.memory_space<vmem>>, vector<8x32xf32>
    %242 = arith.truncf %240 : vector<8x32xf32> to vector<8x32xbf16>
    %c0_117 = arith.constant 0 : index
    %c0_118 = arith.constant 0 : index
    %243 = vector.load %arg3[%c0_117, %c0_118] : memref<32x128xbf16, #tpu.memory_space<vmem>>, vector<32x128xbf16>
    %cst_119 = arith.constant dense<0.000000e+00> : vector<8x128xf32>
    %244 = tpu.matmul %242, %243, %cst_119 {dimension_numbers = #tpu.dot_dimension_numbers<[1], [0], [0], [1], [0, 0, 1, 1], [], []>} : vector<8x32xbf16>, vector<32x128xbf16>, vector<8x128xf32> -> vector<8x128xf32>
    %245 = arith.addf %239, %244 : vector<8x128xf32>
    %246 = vector.extract_strided_slice %245 {offsets = [0, 0], sizes = [8, 96], strides = [1, 1]} : vector<8x128xf32> to vector<8x96xf32>
    %247 = arith.negf %246 : vector<8x96xf32>
    %248 = math.exp %247 : vector<8x96xf32>
    %cst_120 = arith.constant 1.000000e+00 : f32
    %249 = vector.broadcast %cst_120 : f32 to vector<8x96xf32>
    %250 = arith.addf %249, %248 : vector<8x96xf32>
    %251 = arith.divf %249, %250 : vector<8x96xf32>
    %252 = vector.extract_strided_slice %245 {offsets = [0, 96], sizes = [8, 32], strides = [1, 1]} : vector<8x128xf32> to vector<8x32xf32>
    %253 = math.tanh %252 : vector<8x32xf32>
    %254 = vector.extract_strided_slice %251 {offsets = [0, 32], sizes = [8, 32], strides = [1, 1]} : vector<8x96xf32> to vector<8x32xf32>
    %255 = arith.mulf %254, %241 : vector<8x32xf32>
    %256 = vector.extract_strided_slice %251 {offsets = [0, 0], sizes = [8, 32], strides = [1, 1]} : vector<8x96xf32> to vector<8x32xf32>
    %257 = arith.mulf %256, %253 : vector<8x32xf32>
    %258 = arith.addf %255, %257 : vector<8x32xf32>
    %259 = vector.extract_strided_slice %251 {offsets = [0, 64], sizes = [8, 32], strides = [1, 1]} : vector<8x96xf32> to vector<8x32xf32>
    %260 = math.tanh %258 : vector<8x32xf32>
    %261 = arith.mulf %259, %260 : vector<8x32xf32>
    %262 = vector.broadcast %230 : vector<8x1xf32> to vector<8x32xf32>
    %263 = arith.mulf %262, %261 : vector<8x32xf32>
    %cst_121 = arith.constant 1.000000e+00 : f32
    %264 = vector.broadcast %cst_121 : f32 to vector<8x1xf32>
    %265 = arith.subf %264, %230 : vector<8x1xf32>
    %266 = vector.broadcast %265 : vector<8x1xf32> to vector<8x32xf32>
    %267 = arith.mulf %266, %240 : vector<8x32xf32>
    %268 = arith.addf %263, %267 : vector<8x32xf32>
    %269 = vector.broadcast %230 : vector<8x1xf32> to vector<8x32xf32>
    %270 = arith.mulf %269, %258 : vector<8x32xf32>
    %cst_122 = arith.constant 1.000000e+00 : f32
    %271 = vector.broadcast %cst_122 : f32 to vector<8x1xf32>
    %272 = arith.subf %271, %230 : vector<8x1xf32>
    %273 = vector.broadcast %272 : vector<8x1xf32> to vector<8x32xf32>
    %274 = arith.mulf %273, %241 : vector<8x32xf32>
    %275 = arith.addf %270, %274 : vector<8x32xf32>
    %276 = arith.index_cast %237 : i32 to index
    %c0_123 = arith.constant 0 : index
    %277 = vector.load %arg14[%276, %c0_123] : memref<80x128xf32, #tpu.memory_space<vmem>>, vector<8x128xf32>
    %c0_124 = arith.constant 0 : index
    %c0_125 = arith.constant 0 : index
    %278 = vector.load %arg17[%c0_124, %c0_125] : memref<8x32xf32, #tpu.memory_space<vmem>>, vector<8x32xf32>
    %c0_126 = arith.constant 0 : index
    %c0_127 = arith.constant 0 : index
    %279 = vector.load %arg18[%c0_126, %c0_127] : memref<8x32xf32, #tpu.memory_space<vmem>>, vector<8x32xf32>
    %280 = arith.truncf %278 : vector<8x32xf32> to vector<8x32xbf16>
    %c0_128 = arith.constant 0 : index
    %c0_129 = arith.constant 0 : index
    %281 = vector.load %arg6[%c0_128, %c0_129] : memref<32x128xbf16, #tpu.memory_space<vmem>>, vector<32x128xbf16>
    %cst_130 = arith.constant dense<0.000000e+00> : vector<8x128xf32>
    %282 = tpu.matmul %280, %281, %cst_130 {dimension_numbers = #tpu.dot_dimension_numbers<[1], [0], [0], [1], [0, 0, 1, 1], [], []>} : vector<8x32xbf16>, vector<32x128xbf16>, vector<8x128xf32> -> vector<8x128xf32>
    %283 = arith.addf %277, %282 : vector<8x128xf32>
    %284 = vector.extract_strided_slice %283 {offsets = [0, 0], sizes = [8, 96], strides = [1, 1]} : vector<8x128xf32> to vector<8x96xf32>
    %285 = arith.negf %284 : vector<8x96xf32>
    %286 = math.exp %285 : vector<8x96xf32>
    %cst_131 = arith.constant 1.000000e+00 : f32
    %287 = vector.broadcast %cst_131 : f32 to vector<8x96xf32>
    %288 = arith.addf %287, %286 : vector<8x96xf32>
    %289 = arith.divf %287, %288 : vector<8x96xf32>
    %290 = vector.extract_strided_slice %283 {offsets = [0, 96], sizes = [8, 32], strides = [1, 1]} : vector<8x128xf32> to vector<8x32xf32>
    %291 = math.tanh %290 : vector<8x32xf32>
    %292 = vector.extract_strided_slice %289 {offsets = [0, 32], sizes = [8, 32], strides = [1, 1]} : vector<8x96xf32> to vector<8x32xf32>
    %293 = arith.mulf %292, %279 : vector<8x32xf32>
    %294 = vector.extract_strided_slice %289 {offsets = [0, 0], sizes = [8, 32], strides = [1, 1]} : vector<8x96xf32> to vector<8x32xf32>
    %295 = arith.mulf %294, %291 : vector<8x32xf32>
    %296 = arith.addf %293, %295 : vector<8x32xf32>
    %297 = vector.extract_strided_slice %289 {offsets = [0, 64], sizes = [8, 32], strides = [1, 1]} : vector<8x96xf32> to vector<8x32xf32>
    %298 = math.tanh %296 : vector<8x32xf32>
    %299 = arith.mulf %297, %298 : vector<8x32xf32>
    %300 = vector.broadcast %233 : vector<8x1xf32> to vector<8x32xf32>
    %301 = arith.mulf %300, %299 : vector<8x32xf32>
    %cst_132 = arith.constant 1.000000e+00 : f32
    %302 = vector.broadcast %cst_132 : f32 to vector<8x1xf32>
    %303 = arith.subf %302, %233 : vector<8x1xf32>
    %304 = vector.broadcast %303 : vector<8x1xf32> to vector<8x32xf32>
    %305 = arith.mulf %304, %278 : vector<8x32xf32>
    %306 = arith.addf %301, %305 : vector<8x32xf32>
    %307 = vector.broadcast %233 : vector<8x1xf32> to vector<8x32xf32>
    %308 = arith.mulf %307, %296 : vector<8x32xf32>
    %cst_133 = arith.constant 1.000000e+00 : f32
    %309 = vector.broadcast %cst_133 : f32 to vector<8x1xf32>
    %310 = arith.subf %309, %233 : vector<8x1xf32>
    %311 = vector.broadcast %310 : vector<8x1xf32> to vector<8x32xf32>
    %312 = arith.mulf %311, %279 : vector<8x32xf32>
    %313 = arith.addf %308, %312 : vector<8x32xf32>
    %c0_134 = arith.constant 0 : index
    %c0_135 = arith.constant 0 : index
    %314 = vector.load %arg15[%c0_134, %c0_135] : memref<8x32xf32, #tpu.memory_space<vmem>>, vector<8x32xf32>
    tpu.vector_store %arg15[%c0_134, %c0_135], %268 {strides = array<i32>} : memref<8x32xf32, #tpu.memory_space<vmem>>, vector<8x32xf32>,
    %c0_136 = arith.constant 0 : index
    %c0_137 = arith.constant 0 : index
    %315 = vector.load %arg16[%c0_136, %c0_137] : memref<8x32xf32, #tpu.memory_space<vmem>>, vector<8x32xf32>
    tpu.vector_store %arg16[%c0_136, %c0_137], %275 {strides = array<i32>} : memref<8x32xf32, #tpu.memory_space<vmem>>, vector<8x32xf32>,
    %c0_138 = arith.constant 0 : index
    %c0_139 = arith.constant 0 : index
    %316 = vector.load %arg17[%c0_138, %c0_139] : memref<8x32xf32, #tpu.memory_space<vmem>>, vector<8x32xf32>
    tpu.vector_store %arg17[%c0_138, %c0_139], %306 {strides = array<i32>} : memref<8x32xf32, #tpu.memory_space<vmem>>, vector<8x32xf32>,
    %c0_140 = arith.constant 0 : index
    %c0_141 = arith.constant 0 : index
    %317 = vector.load %arg18[%c0_140, %c0_141] : memref<8x32xf32, #tpu.memory_space<vmem>>, vector<8x32xf32>
    tpu.vector_store %arg18[%c0_140, %c0_141], %313 {strides = array<i32>} : memref<8x32xf32, #tpu.memory_space<vmem>>, vector<8x32xf32>,
    %318 = vector.broadcast %230 : vector<8x1xf32> to vector<8x32xf32>
    %319 = arith.mulf %268, %318 : vector<8x32xf32>
    %320 = arith.index_cast %c2_i32 : i32 to index
    %c0_142 = arith.constant 0 : index
    %c0_143 = arith.constant 0 : index
    %321 = vector.load %arg10[%320, %c0_142, %c0_143] : memref<10x8x64xf32, #tpu.memory_space<vmem>>, vector<1x8x32xf32>
    %322 = vector.shape_cast %321 : vector<1x8x32xf32> to vector<8x32xf32>
    %323 = vector.shape_cast %319 : vector<8x32xf32> to vector<1x8x32xf32>
    tpu.vector_store %arg10[%320, %c0_142, %c0_143], %323 {strides = array<i32>} : memref<10x8x64xf32, #tpu.memory_space<vmem>>, vector<1x8x32xf32>,
    %324 = vector.broadcast %233 : vector<8x1xf32> to vector<8x32xf32>
    %325 = arith.mulf %306, %324 : vector<8x32xf32>
    %326 = arith.index_cast %227 : i32 to index
    %c0_144 = arith.constant 0 : index
    %c32_145 = arith.constant 32 : index
    %327 = vector.load %arg10[%326, %c0_144, %c32_145] : memref<10x8x64xf32, #tpu.memory_space<vmem>>, vector<1x8x32xf32>
    %328 = vector.shape_cast %327 : vector<1x8x32xf32> to vector<8x32xf32>
    %329 = vector.shape_cast %325 : vector<8x32xf32> to vector<1x8x32xf32>
    tpu.vector_store %arg10[%326, %c0_144, %c32_145], %329 {strides = array<i32>} : memref<10x8x64xf32, #tpu.memory_space<vmem>>, vector<1x8x32xf32>,
    %c3_i32 = arith.constant 3 : i32
    %c9_i32_146 = arith.constant 9 : i32
    %330 = arith.subi %c9_i32_146, %c3_i32 : i32
    %331 = arith.index_cast %c3_i32 : i32 to index
    %c0_147 = arith.constant 0 : index
    %c0_148 = arith.constant 0 : index
    %332 = vector.load %arg1[%331, %c0_147, %c0_148] : memref<10x8x1xf32, #tpu.memory_space<vmem>>, vector<1x8x1xf32>
    %333 = vector.shape_cast %332 : vector<1x8x1xf32> to vector<8x1xf32>
    %334 = arith.index_cast %330 : i32 to index
    %c0_149 = arith.constant 0 : index
    %c0_150 = arith.constant 0 : index
    %335 = vector.load %arg1[%334, %c0_149, %c0_150] : memref<10x8x1xf32, #tpu.memory_space<vmem>>, vector<1x8x1xf32>
    %336 = vector.shape_cast %335 : vector<1x8x1xf32> to vector<8x1xf32>
    %c8_i32_151 = arith.constant 8 : i32
    %337 = arith.muli %c3_i32, %c8_i32_151 : i32
    %338 = tpu.assume_multiple %337, 8 : i32
    %c8_i32_152 = arith.constant 8 : i32
    %339 = arith.muli %330, %c8_i32_152 : i32
    %340 = tpu.assume_multiple %339, 8 : i32
    %341 = arith.index_cast %338 : i32 to index
    %c0_153 = arith.constant 0 : index
    %342 = vector.load %arg13[%341, %c0_153] : memref<80x128xf32, #tpu.memory_space<vmem>>, vector<8x128xf32>
    %c0_154 = arith.constant 0 : index
    %c0_155 = arith.constant 0 : index
    %343 = vector.load %arg15[%c0_154, %c0_155] : memref<8x32xf32, #tpu.memory_space<vmem>>, vector<8x32xf32>
    %c0_156 = arith.constant 0 : index
    %c0_157 = arith.constant 0 : index
    %344 = vector.load %arg16[%c0_156, %c0_157] : memref<8x32xf32, #tpu.memory_space<vmem>>, vector<8x32xf32>
    %345 = arith.truncf %343 : vector<8x32xf32> to vector<8x32xbf16>
    %c0_158 = arith.constant 0 : index
    %c0_159 = arith.constant 0 : index
    %346 = vector.load %arg3[%c0_158, %c0_159] : memref<32x128xbf16, #tpu.memory_space<vmem>>, vector<32x128xbf16>
    %cst_160 = arith.constant dense<0.000000e+00> : vector<8x128xf32>
    %347 = tpu.matmul %345, %346, %cst_160 {dimension_numbers = #tpu.dot_dimension_numbers<[1], [0], [0], [1], [0, 0, 1, 1], [], []>} : vector<8x32xbf16>, vector<32x128xbf16>, vector<8x128xf32> -> vector<8x128xf32>
    %348 = arith.addf %342, %347 : vector<8x128xf32>
    %349 = vector.extract_strided_slice %348 {offsets = [0, 0], sizes = [8, 96], strides = [1, 1]} : vector<8x128xf32> to vector<8x96xf32>
    %350 = arith.negf %349 : vector<8x96xf32>
    %351 = math.exp %350 : vector<8x96xf32>
    %cst_161 = arith.constant 1.000000e+00 : f32
    %352 = vector.broadcast %cst_161 : f32 to vector<8x96xf32>
    %353 = arith.addf %352, %351 : vector<8x96xf32>
    %354 = arith.divf %352, %353 : vector<8x96xf32>
    %355 = vector.extract_strided_slice %348 {offsets = [0, 96], sizes = [8, 32], strides = [1, 1]} : vector<8x128xf32> to vector<8x32xf32>
    %356 = math.tanh %355 : vector<8x32xf32>
    %357 = vector.extract_strided_slice %354 {offsets = [0, 32], sizes = [8, 32], strides = [1, 1]} : vector<8x96xf32> to vector<8x32xf32>
    %358 = arith.mulf %357, %344 : vector<8x32xf32>
    %359 = vector.extract_strided_slice %354 {offsets = [0, 0], sizes = [8, 32], strides = [1, 1]} : vector<8x96xf32> to vector<8x32xf32>
    %360 = arith.mulf %359, %356 : vector<8x32xf32>
    %361 = arith.addf %358, %360 : vector<8x32xf32>
    %362 = vector.extract_strided_slice %354 {offsets = [0, 64], sizes = [8, 32], strides = [1, 1]} : vector<8x96xf32> to vector<8x32xf32>
    %363 = math.tanh %361 : vector<8x32xf32>
    %364 = arith.mulf %362, %363 : vector<8x32xf32>
    %365 = vector.broadcast %333 : vector<8x1xf32> to vector<8x32xf32>
    %366 = arith.mulf %365, %364 : vector<8x32xf32>
    %cst_162 = arith.constant 1.000000e+00 : f32
    %367 = vector.broadcast %cst_162 : f32 to vector<8x1xf32>
    %368 = arith.subf %367, %333 : vector<8x1xf32>
    %369 = vector.broadcast %368 : vector<8x1xf32> to vector<8x32xf32>
    %370 = arith.mulf %369, %343 : vector<8x32xf32>
    %371 = arith.addf %366, %370 : vector<8x32xf32>
    %372 = vector.broadcast %333 : vector<8x1xf32> to vector<8x32xf32>
    %373 = arith.mulf %372, %361 : vector<8x32xf32>
    %cst_163 = arith.constant 1.000000e+00 : f32
    %374 = vector.broadcast %cst_163 : f32 to vector<8x1xf32>
    %375 = arith.subf %374, %333 : vector<8x1xf32>
    %376 = vector.broadcast %375 : vector<8x1xf32> to vector<8x32xf32>
    %377 = arith.mulf %376, %344 : vector<8x32xf32>
    %378 = arith.addf %373, %377 : vector<8x32xf32>
    %379 = arith.index_cast %340 : i32 to index
    %c0_164 = arith.constant 0 : index
    %380 = vector.load %arg14[%379, %c0_164] : memref<80x128xf32, #tpu.memory_space<vmem>>, vector<8x128xf32>
    %c0_165 = arith.constant 0 : index
    %c0_166 = arith.constant 0 : index
    %381 = vector.load %arg17[%c0_165, %c0_166] : memref<8x32xf32, #tpu.memory_space<vmem>>, vector<8x32xf32>
    %c0_167 = arith.constant 0 : index
    %c0_168 = arith.constant 0 : index
    %382 = vector.load %arg18[%c0_167, %c0_168] : memref<8x32xf32, #tpu.memory_space<vmem>>, vector<8x32xf32>
    %383 = arith.truncf %381 : vector<8x32xf32> to vector<8x32xbf16>
    %c0_169 = arith.constant 0 : index
    %c0_170 = arith.constant 0 : index
    %384 = vector.load %arg6[%c0_169, %c0_170] : memref<32x128xbf16, #tpu.memory_space<vmem>>, vector<32x128xbf16>
    %cst_171 = arith.constant dense<0.000000e+00> : vector<8x128xf32>
    %385 = tpu.matmul %383, %384, %cst_171 {dimension_numbers = #tpu.dot_dimension_numbers<[1], [0], [0], [1], [0, 0, 1, 1], [], []>} : vector<8x32xbf16>, vector<32x128xbf16>, vector<8x128xf32> -> vector<8x128xf32>
    %386 = arith.addf %380, %385 : vector<8x128xf32>
    %387 = vector.extract_strided_slice %386 {offsets = [0, 0], sizes = [8, 96], strides = [1, 1]} : vector<8x128xf32> to vector<8x96xf32>
    %388 = arith.negf %387 : vector<8x96xf32>
    %389 = math.exp %388 : vector<8x96xf32>
    %cst_172 = arith.constant 1.000000e+00 : f32
    %390 = vector.broadcast %cst_172 : f32 to vector<8x96xf32>
    %391 = arith.addf %390, %389 : vector<8x96xf32>
    %392 = arith.divf %390, %391 : vector<8x96xf32>
    %393 = vector.extract_strided_slice %386 {offsets = [0, 96], sizes = [8, 32], strides = [1, 1]} : vector<8x128xf32> to vector<8x32xf32>
    %394 = math.tanh %393 : vector<8x32xf32>
    %395 = vector.extract_strided_slice %392 {offsets = [0, 32], sizes = [8, 32], strides = [1, 1]} : vector<8x96xf32> to vector<8x32xf32>
    %396 = arith.mulf %395, %382 : vector<8x32xf32>
    %397 = vector.extract_strided_slice %392 {offsets = [0, 0], sizes = [8, 32], strides = [1, 1]} : vector<8x96xf32> to vector<8x32xf32>
    %398 = arith.mulf %397, %394 : vector<8x32xf32>
    %399 = arith.addf %396, %398 : vector<8x32xf32>
    %400 = vector.extract_strided_slice %392 {offsets = [0, 64], sizes = [8, 32], strides = [1, 1]} : vector<8x96xf32> to vector<8x32xf32>
    %401 = math.tanh %399 : vector<8x32xf32>
    %402 = arith.mulf %400, %401 : vector<8x32xf32>
    %403 = vector.broadcast %336 : vector<8x1xf32> to vector<8x32xf32>
    %404 = arith.mulf %403, %402 : vector<8x32xf32>
    %cst_173 = arith.constant 1.000000e+00 : f32
    %405 = vector.broadcast %cst_173 : f32 to vector<8x1xf32>
    %406 = arith.subf %405, %336 : vector<8x1xf32>
    %407 = vector.broadcast %406 : vector<8x1xf32> to vector<8x32xf32>
    %408 = arith.mulf %407, %381 : vector<8x32xf32>
    %409 = arith.addf %404, %408 : vector<8x32xf32>
    %410 = vector.broadcast %336 : vector<8x1xf32> to vector<8x32xf32>
    %411 = arith.mulf %410, %399 : vector<8x32xf32>
    %cst_174 = arith.constant 1.000000e+00 : f32
    %412 = vector.broadcast %cst_174 : f32 to vector<8x1xf32>
    %413 = arith.subf %412, %336 : vector<8x1xf32>
    %414 = vector.broadcast %413 : vector<8x1xf32> to vector<8x32xf32>
    %415 = arith.mulf %414, %382 : vector<8x32xf32>
    %416 = arith.addf %411, %415 : vector<8x32xf32>
    %c0_175 = arith.constant 0 : index
    %c0_176 = arith.constant 0 : index
    %417 = vector.load %arg15[%c0_175, %c0_176] : memref<8x32xf32, #tpu.memory_space<vmem>>, vector<8x32xf32>
    tpu.vector_store %arg15[%c0_175, %c0_176], %371 {strides = array<i32>} : memref<8x32xf32, #tpu.memory_space<vmem>>, vector<8x32xf32>,
    %c0_177 = arith.constant 0 : index
    %c0_178 = arith.constant 0 : index
    %418 = vector.load %arg16[%c0_177, %c0_178] : memref<8x32xf32, #tpu.memory_space<vmem>>, vector<8x32xf32>
    tpu.vector_store %arg16[%c0_177, %c0_178], %378 {strides = array<i32>} : memref<8x32xf32, #tpu.memory_space<vmem>>, vector<8x32xf32>,
    %c0_179 = arith.constant 0 : index
    %c0_180 = arith.constant 0 : index
    %419 = vector.load %arg17[%c0_179, %c0_180] : memref<8x32xf32, #tpu.memory_space<vmem>>, vector<8x32xf32>
    tpu.vector_store %arg17[%c0_179, %c0_180], %409 {strides = array<i32>} : memref<8x32xf32, #tpu.memory_space<vmem>>, vector<8x32xf32>,
    %c0_181 = arith.constant 0 : index
    %c0_182 = arith.constant 0 : index
    %420 = vector.load %arg18[%c0_181, %c0_182] : memref<8x32xf32, #tpu.memory_space<vmem>>, vector<8x32xf32>
    tpu.vector_store %arg18[%c0_181, %c0_182], %416 {strides = array<i32>} : memref<8x32xf32, #tpu.memory_space<vmem>>, vector<8x32xf32>,
    %421 = vector.broadcast %333 : vector<8x1xf32> to vector<8x32xf32>
    %422 = arith.mulf %371, %421 : vector<8x32xf32>
    %423 = arith.index_cast %c3_i32 : i32 to index
    %c0_183 = arith.constant 0 : index
    %c0_184 = arith.constant 0 : index
    %424 = vector.load %arg10[%423, %c0_183, %c0_184] : memref<10x8x64xf32, #tpu.memory_space<vmem>>, vector<1x8x32xf32>
    %425 = vector.shape_cast %424 : vector<1x8x32xf32> to vector<8x32xf32>
    %426 = vector.shape_cast %422 : vector<8x32xf32> to vector<1x8x32xf32>
    tpu.vector_store %arg10[%423, %c0_183, %c0_184], %426 {strides = array<i32>} : memref<10x8x64xf32, #tpu.memory_space<vmem>>, vector<1x8x32xf32>,
    %427 = vector.broadcast %336 : vector<8x1xf32> to vector<8x32xf32>
    %428 = arith.mulf %409, %427 : vector<8x32xf32>
    %429 = arith.index_cast %330 : i32 to index
    %c0_185 = arith.constant 0 : index
    %c32_186 = arith.constant 32 : index
    %430 = vector.load %arg10[%429, %c0_185, %c32_186] : memref<10x8x64xf32, #tpu.memory_space<vmem>>, vector<1x8x32xf32>
    %431 = vector.shape_cast %430 : vector<1x8x32xf32> to vector<8x32xf32>
    %432 = vector.shape_cast %428 : vector<8x32xf32> to vector<1x8x32xf32>
    tpu.vector_store %arg10[%429, %c0_185, %c32_186], %432 {strides = array<i32>} : memref<10x8x64xf32, #tpu.memory_space<vmem>>, vector<1x8x32xf32>,
    %c4_i32 = arith.constant 4 : i32
    %c9_i32_187 = arith.constant 9 : i32
    %433 = arith.subi %c9_i32_187, %c4_i32 : i32
    %434 = arith.index_cast %c4_i32 : i32 to index
    %c0_188 = arith.constant 0 : index
    %c0_189 = arith.constant 0 : index
    %435 = vector.load %arg1[%434, %c0_188, %c0_189] : memref<10x8x1xf32, #tpu.memory_space<vmem>>, vector<1x8x1xf32>
    %436 = vector.shape_cast %435 : vector<1x8x1xf32> to vector<8x1xf32>
    %437 = arith.index_cast %433 : i32 to index
    %c0_190 = arith.constant 0 : index
    %c0_191 = arith.constant 0 : index
    %438 = vector.load %arg1[%437, %c0_190, %c0_191] : memref<10x8x1xf32, #tpu.memory_space<vmem>>, vector<1x8x1xf32>
    %439 = vector.shape_cast %438 : vector<1x8x1xf32> to vector<8x1xf32>
    %c8_i32_192 = arith.constant 8 : i32
    %440 = arith.muli %c4_i32, %c8_i32_192 : i32
    %441 = tpu.assume_multiple %440, 8 : i32
    %c8_i32_193 = arith.constant 8 : i32
    %442 = arith.muli %433, %c8_i32_193 : i32
    %443 = tpu.assume_multiple %442, 8 : i32
    %444 = arith.index_cast %441 : i32 to index
    %c0_194 = arith.constant 0 : index
    %445 = vector.load %arg13[%444, %c0_194] : memref<80x128xf32, #tpu.memory_space<vmem>>, vector<8x128xf32>
    %c0_195 = arith.constant 0 : index
    %c0_196 = arith.constant 0 : index
    %446 = vector.load %arg15[%c0_195, %c0_196] : memref<8x32xf32, #tpu.memory_space<vmem>>, vector<8x32xf32>
    %c0_197 = arith.constant 0 : index
    %c0_198 = arith.constant 0 : index
    %447 = vector.load %arg16[%c0_197, %c0_198] : memref<8x32xf32, #tpu.memory_space<vmem>>, vector<8x32xf32>
    %448 = arith.truncf %446 : vector<8x32xf32> to vector<8x32xbf16>
    %c0_199 = arith.constant 0 : index
    %c0_200 = arith.constant 0 : index
    %449 = vector.load %arg3[%c0_199, %c0_200] : memref<32x128xbf16, #tpu.memory_space<vmem>>, vector<32x128xbf16>
    %cst_201 = arith.constant dense<0.000000e+00> : vector<8x128xf32>
    %450 = tpu.matmul %448, %449, %cst_201 {dimension_numbers = #tpu.dot_dimension_numbers<[1], [0], [0], [1], [0, 0, 1, 1], [], []>} : vector<8x32xbf16>, vector<32x128xbf16>, vector<8x128xf32> -> vector<8x128xf32>
    %451 = arith.addf %445, %450 : vector<8x128xf32>
    %452 = vector.extract_strided_slice %451 {offsets = [0, 0], sizes = [8, 96], strides = [1, 1]} : vector<8x128xf32> to vector<8x96xf32>
    %453 = arith.negf %452 : vector<8x96xf32>
    %454 = math.exp %453 : vector<8x96xf32>
    %cst_202 = arith.constant 1.000000e+00 : f32
    %455 = vector.broadcast %cst_202 : f32 to vector<8x96xf32>
    %456 = arith.addf %455, %454 : vector<8x96xf32>
    %457 = arith.divf %455, %456 : vector<8x96xf32>
    %458 = vector.extract_strided_slice %451 {offsets = [0, 96], sizes = [8, 32], strides = [1, 1]} : vector<8x128xf32> to vector<8x32xf32>
    %459 = math.tanh %458 : vector<8x32xf32>
    %460 = vector.extract_strided_slice %457 {offsets = [0, 32], sizes = [8, 32], strides = [1, 1]} : vector<8x96xf32> to vector<8x32xf32>
    %461 = arith.mulf %460, %447 : vector<8x32xf32>
    %462 = vector.extract_strided_slice %457 {offsets = [0, 0], sizes = [8, 32], strides = [1, 1]} : vector<8x96xf32> to vector<8x32xf32>
    %463 = arith.mulf %462, %459 : vector<8x32xf32>
    %464 = arith.addf %461, %463 : vector<8x32xf32>
    %465 = vector.extract_strided_slice %457 {offsets = [0, 64], sizes = [8, 32], strides = [1, 1]} : vector<8x96xf32> to vector<8x32xf32>
    %466 = math.tanh %464 : vector<8x32xf32>
    %467 = arith.mulf %465, %466 : vector<8x32xf32>
    %468 = vector.broadcast %436 : vector<8x1xf32> to vector<8x32xf32>
    %469 = arith.mulf %468, %467 : vector<8x32xf32>
    %cst_203 = arith.constant 1.000000e+00 : f32
    %470 = vector.broadcast %cst_203 : f32 to vector<8x1xf32>
    %471 = arith.subf %470, %436 : vector<8x1xf32>
    %472 = vector.broadcast %471 : vector<8x1xf32> to vector<8x32xf32>
    %473 = arith.mulf %472, %446 : vector<8x32xf32>
    %474 = arith.addf %469, %473 : vector<8x32xf32>
    %475 = vector.broadcast %436 : vector<8x1xf32> to vector<8x32xf32>
    %476 = arith.mulf %475, %464 : vector<8x32xf32>
    %cst_204 = arith.constant 1.000000e+00 : f32
    %477 = vector.broadcast %cst_204 : f32 to vector<8x1xf32>
    %478 = arith.subf %477, %436 : vector<8x1xf32>
    %479 = vector.broadcast %478 : vector<8x1xf32> to vector<8x32xf32>
    %480 = arith.mulf %479, %447 : vector<8x32xf32>
    %481 = arith.addf %476, %480 : vector<8x32xf32>
    %482 = arith.index_cast %443 : i32 to index
    %c0_205 = arith.constant 0 : index
    %483 = vector.load %arg14[%482, %c0_205] : memref<80x128xf32, #tpu.memory_space<vmem>>, vector<8x128xf32>
    %c0_206 = arith.constant 0 : index
    %c0_207 = arith.constant 0 : index
    %484 = vector.load %arg17[%c0_206, %c0_207] : memref<8x32xf32, #tpu.memory_space<vmem>>, vector<8x32xf32>
    %c0_208 = arith.constant 0 : index
    %c0_209 = arith.constant 0 : index
    %485 = vector.load %arg18[%c0_208, %c0_209] : memref<8x32xf32, #tpu.memory_space<vmem>>, vector<8x32xf32>
    %486 = arith.truncf %484 : vector<8x32xf32> to vector<8x32xbf16>
    %c0_210 = arith.constant 0 : index
    %c0_211 = arith.constant 0 : index
    %487 = vector.load %arg6[%c0_210, %c0_211] : memref<32x128xbf16, #tpu.memory_space<vmem>>, vector<32x128xbf16>
    %cst_212 = arith.constant dense<0.000000e+00> : vector<8x128xf32>
    %488 = tpu.matmul %486, %487, %cst_212 {dimension_numbers = #tpu.dot_dimension_numbers<[1], [0], [0], [1], [0, 0, 1, 1], [], []>} : vector<8x32xbf16>, vector<32x128xbf16>, vector<8x128xf32> -> vector<8x128xf32>
    %489 = arith.addf %483, %488 : vector<8x128xf32>
    %490 = vector.extract_strided_slice %489 {offsets = [0, 0], sizes = [8, 96], strides = [1, 1]} : vector<8x128xf32> to vector<8x96xf32>
    %491 = arith.negf %490 : vector<8x96xf32>
    %492 = math.exp %491 : vector<8x96xf32>
    %cst_213 = arith.constant 1.000000e+00 : f32
    %493 = vector.broadcast %cst_213 : f32 to vector<8x96xf32>
    %494 = arith.addf %493, %492 : vector<8x96xf32>
    %495 = arith.divf %493, %494 : vector<8x96xf32>
    %496 = vector.extract_strided_slice %489 {offsets = [0, 96], sizes = [8, 32], strides = [1, 1]} : vector<8x128xf32> to vector<8x32xf32>
    %497 = math.tanh %496 : vector<8x32xf32>
    %498 = vector.extract_strided_slice %495 {offsets = [0, 32], sizes = [8, 32], strides = [1, 1]} : vector<8x96xf32> to vector<8x32xf32>
    %499 = arith.mulf %498, %485 : vector<8x32xf32>
    %500 = vector.extract_strided_slice %495 {offsets = [0, 0], sizes = [8, 32], strides = [1, 1]} : vector<8x96xf32> to vector<8x32xf32>
    %501 = arith.mulf %500, %497 : vector<8x32xf32>
    %502 = arith.addf %499, %501 : vector<8x32xf32>
    %503 = vector.extract_strided_slice %495 {offsets = [0, 64], sizes = [8, 32], strides = [1, 1]} : vector<8x96xf32> to vector<8x32xf32>
    %504 = math.tanh %502 : vector<8x32xf32>
    %505 = arith.mulf %503, %504 : vector<8x32xf32>
    %506 = vector.broadcast %439 : vector<8x1xf32> to vector<8x32xf32>
    %507 = arith.mulf %506, %505 : vector<8x32xf32>
    %cst_214 = arith.constant 1.000000e+00 : f32
    %508 = vector.broadcast %cst_214 : f32 to vector<8x1xf32>
    %509 = arith.subf %508, %439 : vector<8x1xf32>
    %510 = vector.broadcast %509 : vector<8x1xf32> to vector<8x32xf32>
    %511 = arith.mulf %510, %484 : vector<8x32xf32>
    %512 = arith.addf %507, %511 : vector<8x32xf32>
    %513 = vector.broadcast %439 : vector<8x1xf32> to vector<8x32xf32>
    %514 = arith.mulf %513, %502 : vector<8x32xf32>
    %cst_215 = arith.constant 1.000000e+00 : f32
    %515 = vector.broadcast %cst_215 : f32 to vector<8x1xf32>
    %516 = arith.subf %515, %439 : vector<8x1xf32>
    %517 = vector.broadcast %516 : vector<8x1xf32> to vector<8x32xf32>
    %518 = arith.mulf %517, %485 : vector<8x32xf32>
    %519 = arith.addf %514, %518 : vector<8x32xf32>
    %c0_216 = arith.constant 0 : index
    %c0_217 = arith.constant 0 : index
    %520 = vector.load %arg15[%c0_216, %c0_217] : memref<8x32xf32, #tpu.memory_space<vmem>>, vector<8x32xf32>
    tpu.vector_store %arg15[%c0_216, %c0_217], %474 {strides = array<i32>} : memref<8x32xf32, #tpu.memory_space<vmem>>, vector<8x32xf32>,
    %c0_218 = arith.constant 0 : index
    %c0_219 = arith.constant 0 : index
    %521 = vector.load %arg16[%c0_218, %c0_219] : memref<8x32xf32, #tpu.memory_space<vmem>>, vector<8x32xf32>
    tpu.vector_store %arg16[%c0_218, %c0_219], %481 {strides = array<i32>} : memref<8x32xf32, #tpu.memory_space<vmem>>, vector<8x32xf32>,
    %c0_220 = arith.constant 0 : index
    %c0_221 = arith.constant 0 : index
    %522 = vector.load %arg17[%c0_220, %c0_221] : memref<8x32xf32, #tpu.memory_space<vmem>>, vector<8x32xf32>
    tpu.vector_store %arg17[%c0_220, %c0_221], %512 {strides = array<i32>} : memref<8x32xf32, #tpu.memory_space<vmem>>, vector<8x32xf32>,
    %c0_222 = arith.constant 0 : index
    %c0_223 = arith.constant 0 : index
    %523 = vector.load %arg18[%c0_222, %c0_223] : memref<8x32xf32, #tpu.memory_space<vmem>>, vector<8x32xf32>
    tpu.vector_store %arg18[%c0_222, %c0_223], %519 {strides = array<i32>} : memref<8x32xf32, #tpu.memory_space<vmem>>, vector<8x32xf32>,
    %524 = vector.broadcast %436 : vector<8x1xf32> to vector<8x32xf32>
    %525 = arith.mulf %474, %524 : vector<8x32xf32>
    %526 = arith.index_cast %c4_i32 : i32 to index
    %c0_224 = arith.constant 0 : index
    %c0_225 = arith.constant 0 : index
    %527 = vector.load %arg10[%526, %c0_224, %c0_225] : memref<10x8x64xf32, #tpu.memory_space<vmem>>, vector<1x8x32xf32>
    %528 = vector.shape_cast %527 : vector<1x8x32xf32> to vector<8x32xf32>
    %529 = vector.shape_cast %525 : vector<8x32xf32> to vector<1x8x32xf32>
    tpu.vector_store %arg10[%526, %c0_224, %c0_225], %529 {strides = array<i32>} : memref<10x8x64xf32, #tpu.memory_space<vmem>>, vector<1x8x32xf32>,
    %530 = vector.broadcast %439 : vector<8x1xf32> to vector<8x32xf32>
    %531 = arith.mulf %512, %530 : vector<8x32xf32>
    %532 = arith.index_cast %433 : i32 to index
    %c0_226 = arith.constant 0 : index
    %c32_227 = arith.constant 32 : index
    %533 = vector.load %arg10[%532, %c0_226, %c32_227] : memref<10x8x64xf32, #tpu.memory_space<vmem>>, vector<1x8x32xf32>
    %534 = vector.shape_cast %533 : vector<1x8x32xf32> to vector<8x32xf32>
    %535 = vector.shape_cast %531 : vector<8x32xf32> to vector<1x8x32xf32>
    tpu.vector_store %arg10[%532, %c0_226, %c32_227], %535 {strides = array<i32>} : memref<10x8x64xf32, #tpu.memory_space<vmem>>, vector<1x8x32xf32>,
    %c5_i32 = arith.constant 5 : i32
    %c9_i32_228 = arith.constant 9 : i32
    %536 = arith.subi %c9_i32_228, %c5_i32 : i32
    %537 = arith.index_cast %c5_i32 : i32 to index
    %c0_229 = arith.constant 0 : index
    %c0_230 = arith.constant 0 : index
    %538 = vector.load %arg1[%537, %c0_229, %c0_230] : memref<10x8x1xf32, #tpu.memory_space<vmem>>, vector<1x8x1xf32>
    %539 = vector.shape_cast %538 : vector<1x8x1xf32> to vector<8x1xf32>
    %540 = arith.index_cast %536 : i32 to index
    %c0_231 = arith.constant 0 : index
    %c0_232 = arith.constant 0 : index
    %541 = vector.load %arg1[%540, %c0_231, %c0_232] : memref<10x8x1xf32, #tpu.memory_space<vmem>>, vector<1x8x1xf32>
    %542 = vector.shape_cast %541 : vector<1x8x1xf32> to vector<8x1xf32>
    %c8_i32_233 = arith.constant 8 : i32
    %543 = arith.muli %c5_i32, %c8_i32_233 : i32
    %544 = tpu.assume_multiple %543, 8 : i32
    %c8_i32_234 = arith.constant 8 : i32
    %545 = arith.muli %536, %c8_i32_234 : i32
    %546 = tpu.assume_multiple %545, 8 : i32
    %547 = arith.index_cast %544 : i32 to index
    %c0_235 = arith.constant 0 : index
    %548 = vector.load %arg13[%547, %c0_235] : memref<80x128xf32, #tpu.memory_space<vmem>>, vector<8x128xf32>
    %c0_236 = arith.constant 0 : index
    %c0_237 = arith.constant 0 : index
    %549 = vector.load %arg15[%c0_236, %c0_237] : memref<8x32xf32, #tpu.memory_space<vmem>>, vector<8x32xf32>
    %c0_238 = arith.constant 0 : index
    %c0_239 = arith.constant 0 : index
    %550 = vector.load %arg16[%c0_238, %c0_239] : memref<8x32xf32, #tpu.memory_space<vmem>>, vector<8x32xf32>
    %551 = arith.truncf %549 : vector<8x32xf32> to vector<8x32xbf16>
    %c0_240 = arith.constant 0 : index
    %c0_241 = arith.constant 0 : index
    %552 = vector.load %arg3[%c0_240, %c0_241] : memref<32x128xbf16, #tpu.memory_space<vmem>>, vector<32x128xbf16>
    %cst_242 = arith.constant dense<0.000000e+00> : vector<8x128xf32>
    %553 = tpu.matmul %551, %552, %cst_242 {dimension_numbers = #tpu.dot_dimension_numbers<[1], [0], [0], [1], [0, 0, 1, 1], [], []>} : vector<8x32xbf16>, vector<32x128xbf16>, vector<8x128xf32> -> vector<8x128xf32>
    %554 = arith.addf %548, %553 : vector<8x128xf32>
    %555 = vector.extract_strided_slice %554 {offsets = [0, 0], sizes = [8, 96], strides = [1, 1]} : vector<8x128xf32> to vector<8x96xf32>
    %556 = arith.negf %555 : vector<8x96xf32>
    %557 = math.exp %556 : vector<8x96xf32>
    %cst_243 = arith.constant 1.000000e+00 : f32
    %558 = vector.broadcast %cst_243 : f32 to vector<8x96xf32>
    %559 = arith.addf %558, %557 : vector<8x96xf32>
    %560 = arith.divf %558, %559 : vector<8x96xf32>
    %561 = vector.extract_strided_slice %554 {offsets = [0, 96], sizes = [8, 32], strides = [1, 1]} : vector<8x128xf32> to vector<8x32xf32>
    %562 = math.tanh %561 : vector<8x32xf32>
    %563 = vector.extract_strided_slice %560 {offsets = [0, 32], sizes = [8, 32], strides = [1, 1]} : vector<8x96xf32> to vector<8x32xf32>
    %564 = arith.mulf %563, %550 : vector<8x32xf32>
    %565 = vector.extract_strided_slice %560 {offsets = [0, 0], sizes = [8, 32], strides = [1, 1]} : vector<8x96xf32> to vector<8x32xf32>
    %566 = arith.mulf %565, %562 : vector<8x32xf32>
    %567 = arith.addf %564, %566 : vector<8x32xf32>
    %568 = vector.extract_strided_slice %560 {offsets = [0, 64], sizes = [8, 32], strides = [1, 1]} : vector<8x96xf32> to vector<8x32xf32>
    %569 = math.tanh %567 : vector<8x32xf32>
    %570 = arith.mulf %568, %569 : vector<8x32xf32>
    %571 = vector.broadcast %539 : vector<8x1xf32> to vector<8x32xf32>
    %572 = arith.mulf %571, %570 : vector<8x32xf32>
    %cst_244 = arith.constant 1.000000e+00 : f32
    %573 = vector.broadcast %cst_244 : f32 to vector<8x1xf32>
    %574 = arith.subf %573, %539 : vector<8x1xf32>
    %575 = vector.broadcast %574 : vector<8x1xf32> to vector<8x32xf32>
    %576 = arith.mulf %575, %549 : vector<8x32xf32>
    %577 = arith.addf %572, %576 : vector<8x32xf32>
    %578 = vector.broadcast %539 : vector<8x1xf32> to vector<8x32xf32>
    %579 = arith.mulf %578, %567 : vector<8x32xf32>
    %cst_245 = arith.constant 1.000000e+00 : f32
    %580 = vector.broadcast %cst_245 : f32 to vector<8x1xf32>
    %581 = arith.subf %580, %539 : vector<8x1xf32>
    %582 = vector.broadcast %581 : vector<8x1xf32> to vector<8x32xf32>
    %583 = arith.mulf %582, %550 : vector<8x32xf32>
    %584 = arith.addf %579, %583 : vector<8x32xf32>
    %585 = arith.index_cast %546 : i32 to index
    %c0_246 = arith.constant 0 : index
    %586 = vector.load %arg14[%585, %c0_246] : memref<80x128xf32, #tpu.memory_space<vmem>>, vector<8x128xf32>
    %c0_247 = arith.constant 0 : index
    %c0_248 = arith.constant 0 : index
    %587 = vector.load %arg17[%c0_247, %c0_248] : memref<8x32xf32, #tpu.memory_space<vmem>>, vector<8x32xf32>
    %c0_249 = arith.constant 0 : index
    %c0_250 = arith.constant 0 : index
    %588 = vector.load %arg18[%c0_249, %c0_250] : memref<8x32xf32, #tpu.memory_space<vmem>>, vector<8x32xf32>
    %589 = arith.truncf %587 : vector<8x32xf32> to vector<8x32xbf16>
    %c0_251 = arith.constant 0 : index
    %c0_252 = arith.constant 0 : index
    %590 = vector.load %arg6[%c0_251, %c0_252] : memref<32x128xbf16, #tpu.memory_space<vmem>>, vector<32x128xbf16>
    %cst_253 = arith.constant dense<0.000000e+00> : vector<8x128xf32>
    %591 = tpu.matmul %589, %590, %cst_253 {dimension_numbers = #tpu.dot_dimension_numbers<[1], [0], [0], [1], [0, 0, 1, 1], [], []>} : vector<8x32xbf16>, vector<32x128xbf16>, vector<8x128xf32> -> vector<8x128xf32>
    %592 = arith.addf %586, %591 : vector<8x128xf32>
    %593 = vector.extract_strided_slice %592 {offsets = [0, 0], sizes = [8, 96], strides = [1, 1]} : vector<8x128xf32> to vector<8x96xf32>
    %594 = arith.negf %593 : vector<8x96xf32>
    %595 = math.exp %594 : vector<8x96xf32>
    %cst_254 = arith.constant 1.000000e+00 : f32
    %596 = vector.broadcast %cst_254 : f32 to vector<8x96xf32>
    %597 = arith.addf %596, %595 : vector<8x96xf32>
    %598 = arith.divf %596, %597 : vector<8x96xf32>
    %599 = vector.extract_strided_slice %592 {offsets = [0, 96], sizes = [8, 32], strides = [1, 1]} : vector<8x128xf32> to vector<8x32xf32>
    %600 = math.tanh %599 : vector<8x32xf32>
    %601 = vector.extract_strided_slice %598 {offsets = [0, 32], sizes = [8, 32], strides = [1, 1]} : vector<8x96xf32> to vector<8x32xf32>
    %602 = arith.mulf %601, %588 : vector<8x32xf32>
    %603 = vector.extract_strided_slice %598 {offsets = [0, 0], sizes = [8, 32], strides = [1, 1]} : vector<8x96xf32> to vector<8x32xf32>
    %604 = arith.mulf %603, %600 : vector<8x32xf32>
    %605 = arith.addf %602, %604 : vector<8x32xf32>
    %606 = vector.extract_strided_slice %598 {offsets = [0, 64], sizes = [8, 32], strides = [1, 1]} : vector<8x96xf32> to vector<8x32xf32>
    %607 = math.tanh %605 : vector<8x32xf32>
    %608 = arith.mulf %606, %607 : vector<8x32xf32>
    %609 = vector.broadcast %542 : vector<8x1xf32> to vector<8x32xf32>
    %610 = arith.mulf %609, %608 : vector<8x32xf32>
    %cst_255 = arith.constant 1.000000e+00 : f32
    %611 = vector.broadcast %cst_255 : f32 to vector<8x1xf32>
    %612 = arith.subf %611, %542 : vector<8x1xf32>
    %613 = vector.broadcast %612 : vector<8x1xf32> to vector<8x32xf32>
    %614 = arith.mulf %613, %587 : vector<8x32xf32>
    %615 = arith.addf %610, %614 : vector<8x32xf32>
    %616 = vector.broadcast %542 : vector<8x1xf32> to vector<8x32xf32>
    %617 = arith.mulf %616, %605 : vector<8x32xf32>
    %cst_256 = arith.constant 1.000000e+00 : f32
    %618 = vector.broadcast %cst_256 : f32 to vector<8x1xf32>
    %619 = arith.subf %618, %542 : vector<8x1xf32>
    %620 = vector.broadcast %619 : vector<8x1xf32> to vector<8x32xf32>
    %621 = arith.mulf %620, %588 : vector<8x32xf32>
    %622 = arith.addf %617, %621 : vector<8x32xf32>
    %c0_257 = arith.constant 0 : index
    %c0_258 = arith.constant 0 : index
    %623 = vector.load %arg15[%c0_257, %c0_258] : memref<8x32xf32, #tpu.memory_space<vmem>>, vector<8x32xf32>
    tpu.vector_store %arg15[%c0_257, %c0_258], %577 {strides = array<i32>} : memref<8x32xf32, #tpu.memory_space<vmem>>, vector<8x32xf32>,
    %c0_259 = arith.constant 0 : index
    %c0_260 = arith.constant 0 : index
    %624 = vector.load %arg16[%c0_259, %c0_260] : memref<8x32xf32, #tpu.memory_space<vmem>>, vector<8x32xf32>
    tpu.vector_store %arg16[%c0_259, %c0_260], %584 {strides = array<i32>} : memref<8x32xf32, #tpu.memory_space<vmem>>, vector<8x32xf32>,
    %c0_261 = arith.constant 0 : index
    %c0_262 = arith.constant 0 : index
    %625 = vector.load %arg17[%c0_261, %c0_262] : memref<8x32xf32, #tpu.memory_space<vmem>>, vector<8x32xf32>
    tpu.vector_store %arg17[%c0_261, %c0_262], %615 {strides = array<i32>} : memref<8x32xf32, #tpu.memory_space<vmem>>, vector<8x32xf32>,
    %c0_263 = arith.constant 0 : index
    %c0_264 = arith.constant 0 : index
    %626 = vector.load %arg18[%c0_263, %c0_264] : memref<8x32xf32, #tpu.memory_space<vmem>>, vector<8x32xf32>
    tpu.vector_store %arg18[%c0_263, %c0_264], %622 {strides = array<i32>} : memref<8x32xf32, #tpu.memory_space<vmem>>, vector<8x32xf32>,
    %627 = vector.broadcast %539 : vector<8x1xf32> to vector<8x32xf32>
    %628 = arith.mulf %577, %627 : vector<8x32xf32>
    %629 = arith.index_cast %c5_i32 : i32 to index
    %c0_265 = arith.constant 0 : index
    %c0_266 = arith.constant 0 : index
    %630 = vector.load %arg10[%629, %c0_265, %c0_266] : memref<10x8x64xf32, #tpu.memory_space<vmem>>, vector<1x8x32xf32>
    %631 = vector.shape_cast %630 : vector<1x8x32xf32> to vector<8x32xf32>
    %632 = vector.shape_cast %628 : vector<8x32xf32> to vector<1x8x32xf32>
    tpu.vector_store %arg10[%629, %c0_265, %c0_266], %632 {strides = array<i32>} : memref<10x8x64xf32, #tpu.memory_space<vmem>>, vector<1x8x32xf32>,
    %633 = vector.broadcast %542 : vector<8x1xf32> to vector<8x32xf32>
    %634 = arith.mulf %615, %633 : vector<8x32xf32>
    %635 = arith.index_cast %536 : i32 to index
    %c0_267 = arith.constant 0 : index
    %c32_268 = arith.constant 32 : index
    %636 = vector.load %arg10[%635, %c0_267, %c32_268] : memref<10x8x64xf32, #tpu.memory_space<vmem>>, vector<1x8x32xf32>
    %637 = vector.shape_cast %636 : vector<1x8x32xf32> to vector<8x32xf32>
    %638 = vector.shape_cast %634 : vector<8x32xf32> to vector<1x8x32xf32>
    tpu.vector_store %arg10[%635, %c0_267, %c32_268], %638 {strides = array<i32>} : memref<10x8x64xf32, #tpu.memory_space<vmem>>, vector<1x8x32xf32>,
    %c6_i32 = arith.constant 6 : i32
    %c9_i32_269 = arith.constant 9 : i32
    %639 = arith.subi %c9_i32_269, %c6_i32 : i32
    %640 = arith.index_cast %c6_i32 : i32 to index
    %c0_270 = arith.constant 0 : index
    %c0_271 = arith.constant 0 : index
    %641 = vector.load %arg1[%640, %c0_270, %c0_271] : memref<10x8x1xf32, #tpu.memory_space<vmem>>, vector<1x8x1xf32>
    %642 = vector.shape_cast %641 : vector<1x8x1xf32> to vector<8x1xf32>
    %643 = arith.index_cast %639 : i32 to index
    %c0_272 = arith.constant 0 : index
    %c0_273 = arith.constant 0 : index
    %644 = vector.load %arg1[%643, %c0_272, %c0_273] : memref<10x8x1xf32, #tpu.memory_space<vmem>>, vector<1x8x1xf32>
    %645 = vector.shape_cast %644 : vector<1x8x1xf32> to vector<8x1xf32>
    %c8_i32_274 = arith.constant 8 : i32
    %646 = arith.muli %c6_i32, %c8_i32_274 : i32
    %647 = tpu.assume_multiple %646, 8 : i32
    %c8_i32_275 = arith.constant 8 : i32
    %648 = arith.muli %639, %c8_i32_275 : i32
    %649 = tpu.assume_multiple %648, 8 : i32
    %650 = arith.index_cast %647 : i32 to index
    %c0_276 = arith.constant 0 : index
    %651 = vector.load %arg13[%650, %c0_276] : memref<80x128xf32, #tpu.memory_space<vmem>>, vector<8x128xf32>
    %c0_277 = arith.constant 0 : index
    %c0_278 = arith.constant 0 : index
    %652 = vector.load %arg15[%c0_277, %c0_278] : memref<8x32xf32, #tpu.memory_space<vmem>>, vector<8x32xf32>
    %c0_279 = arith.constant 0 : index
    %c0_280 = arith.constant 0 : index
    %653 = vector.load %arg16[%c0_279, %c0_280] : memref<8x32xf32, #tpu.memory_space<vmem>>, vector<8x32xf32>
    %654 = arith.truncf %652 : vector<8x32xf32> to vector<8x32xbf16>
    %c0_281 = arith.constant 0 : index
    %c0_282 = arith.constant 0 : index
    %655 = vector.load %arg3[%c0_281, %c0_282] : memref<32x128xbf16, #tpu.memory_space<vmem>>, vector<32x128xbf16>
    %cst_283 = arith.constant dense<0.000000e+00> : vector<8x128xf32>
    %656 = tpu.matmul %654, %655, %cst_283 {dimension_numbers = #tpu.dot_dimension_numbers<[1], [0], [0], [1], [0, 0, 1, 1], [], []>} : vector<8x32xbf16>, vector<32x128xbf16>, vector<8x128xf32> -> vector<8x128xf32>
    %657 = arith.addf %651, %656 : vector<8x128xf32>
    %658 = vector.extract_strided_slice %657 {offsets = [0, 0], sizes = [8, 96], strides = [1, 1]} : vector<8x128xf32> to vector<8x96xf32>
    %659 = arith.negf %658 : vector<8x96xf32>
    %660 = math.exp %659 : vector<8x96xf32>
    %cst_284 = arith.constant 1.000000e+00 : f32
    %661 = vector.broadcast %cst_284 : f32 to vector<8x96xf32>
    %662 = arith.addf %661, %660 : vector<8x96xf32>
    %663 = arith.divf %661, %662 : vector<8x96xf32>
    %664 = vector.extract_strided_slice %657 {offsets = [0, 96], sizes = [8, 32], strides = [1, 1]} : vector<8x128xf32> to vector<8x32xf32>
    %665 = math.tanh %664 : vector<8x32xf32>
    %666 = vector.extract_strided_slice %663 {offsets = [0, 32], sizes = [8, 32], strides = [1, 1]} : vector<8x96xf32> to vector<8x32xf32>
    %667 = arith.mulf %666, %653 : vector<8x32xf32>
    %668 = vector.extract_strided_slice %663 {offsets = [0, 0], sizes = [8, 32], strides = [1, 1]} : vector<8x96xf32> to vector<8x32xf32>
    %669 = arith.mulf %668, %665 : vector<8x32xf32>
    %670 = arith.addf %667, %669 : vector<8x32xf32>
    %671 = vector.extract_strided_slice %663 {offsets = [0, 64], sizes = [8, 32], strides = [1, 1]} : vector<8x96xf32> to vector<8x32xf32>
    %672 = math.tanh %670 : vector<8x32xf32>
    %673 = arith.mulf %671, %672 : vector<8x32xf32>
    %674 = vector.broadcast %642 : vector<8x1xf32> to vector<8x32xf32>
    %675 = arith.mulf %674, %673 : vector<8x32xf32>
    %cst_285 = arith.constant 1.000000e+00 : f32
    %676 = vector.broadcast %cst_285 : f32 to vector<8x1xf32>
    %677 = arith.subf %676, %642 : vector<8x1xf32>
    %678 = vector.broadcast %677 : vector<8x1xf32> to vector<8x32xf32>
    %679 = arith.mulf %678, %652 : vector<8x32xf32>
    %680 = arith.addf %675, %679 : vector<8x32xf32>
    %681 = vector.broadcast %642 : vector<8x1xf32> to vector<8x32xf32>
    %682 = arith.mulf %681, %670 : vector<8x32xf32>
    %cst_286 = arith.constant 1.000000e+00 : f32
    %683 = vector.broadcast %cst_286 : f32 to vector<8x1xf32>
    %684 = arith.subf %683, %642 : vector<8x1xf32>
    %685 = vector.broadcast %684 : vector<8x1xf32> to vector<8x32xf32>
    %686 = arith.mulf %685, %653 : vector<8x32xf32>
    %687 = arith.addf %682, %686 : vector<8x32xf32>
    %688 = arith.index_cast %649 : i32 to index
    %c0_287 = arith.constant 0 : index
    %689 = vector.load %arg14[%688, %c0_287] : memref<80x128xf32, #tpu.memory_space<vmem>>, vector<8x128xf32>
    %c0_288 = arith.constant 0 : index
    %c0_289 = arith.constant 0 : index
    %690 = vector.load %arg17[%c0_288, %c0_289] : memref<8x32xf32, #tpu.memory_space<vmem>>, vector<8x32xf32>
    %c0_290 = arith.constant 0 : index
    %c0_291 = arith.constant 0 : index
    %691 = vector.load %arg18[%c0_290, %c0_291] : memref<8x32xf32, #tpu.memory_space<vmem>>, vector<8x32xf32>
    %692 = arith.truncf %690 : vector<8x32xf32> to vector<8x32xbf16>
    %c0_292 = arith.constant 0 : index
    %c0_293 = arith.constant 0 : index
    %693 = vector.load %arg6[%c0_292, %c0_293] : memref<32x128xbf16, #tpu.memory_space<vmem>>, vector<32x128xbf16>
    %cst_294 = arith.constant dense<0.000000e+00> : vector<8x128xf32>
    %694 = tpu.matmul %692, %693, %cst_294 {dimension_numbers = #tpu.dot_dimension_numbers<[1], [0], [0], [1], [0, 0, 1, 1], [], []>} : vector<8x32xbf16>, vector<32x128xbf16>, vector<8x128xf32> -> vector<8x128xf32>
    %695 = arith.addf %689, %694 : vector<8x128xf32>
    %696 = vector.extract_strided_slice %695 {offsets = [0, 0], sizes = [8, 96], strides = [1, 1]} : vector<8x128xf32> to vector<8x96xf32>
    %697 = arith.negf %696 : vector<8x96xf32>
    %698 = math.exp %697 : vector<8x96xf32>
    %cst_295 = arith.constant 1.000000e+00 : f32
    %699 = vector.broadcast %cst_295 : f32 to vector<8x96xf32>
    %700 = arith.addf %699, %698 : vector<8x96xf32>
    %701 = arith.divf %699, %700 : vector<8x96xf32>
    %702 = vector.extract_strided_slice %695 {offsets = [0, 96], sizes = [8, 32], strides = [1, 1]} : vector<8x128xf32> to vector<8x32xf32>
    %703 = math.tanh %702 : vector<8x32xf32>
    %704 = vector.extract_strided_slice %701 {offsets = [0, 32], sizes = [8, 32], strides = [1, 1]} : vector<8x96xf32> to vector<8x32xf32>
    %705 = arith.mulf %704, %691 : vector<8x32xf32>
    %706 = vector.extract_strided_slice %701 {offsets = [0, 0], sizes = [8, 32], strides = [1, 1]} : vector<8x96xf32> to vector<8x32xf32>
    %707 = arith.mulf %706, %703 : vector<8x32xf32>
    %708 = arith.addf %705, %707 : vector<8x32xf32>
    %709 = vector.extract_strided_slice %701 {offsets = [0, 64], sizes = [8, 32], strides = [1, 1]} : vector<8x96xf32> to vector<8x32xf32>
    %710 = math.tanh %708 : vector<8x32xf32>
    %711 = arith.mulf %709, %710 : vector<8x32xf32>
    %712 = vector.broadcast %645 : vector<8x1xf32> to vector<8x32xf32>
    %713 = arith.mulf %712, %711 : vector<8x32xf32>
    %cst_296 = arith.constant 1.000000e+00 : f32
    %714 = vector.broadcast %cst_296 : f32 to vector<8x1xf32>
    %715 = arith.subf %714, %645 : vector<8x1xf32>
    %716 = vector.broadcast %715 : vector<8x1xf32> to vector<8x32xf32>
    %717 = arith.mulf %716, %690 : vector<8x32xf32>
    %718 = arith.addf %713, %717 : vector<8x32xf32>
    %719 = vector.broadcast %645 : vector<8x1xf32> to vector<8x32xf32>
    %720 = arith.mulf %719, %708 : vector<8x32xf32>
    %cst_297 = arith.constant 1.000000e+00 : f32
    %721 = vector.broadcast %cst_297 : f32 to vector<8x1xf32>
    %722 = arith.subf %721, %645 : vector<8x1xf32>
    %723 = vector.broadcast %722 : vector<8x1xf32> to vector<8x32xf32>
    %724 = arith.mulf %723, %691 : vector<8x32xf32>
    %725 = arith.addf %720, %724 : vector<8x32xf32>
    %c0_298 = arith.constant 0 : index
    %c0_299 = arith.constant 0 : index
    %726 = vector.load %arg15[%c0_298, %c0_299] : memref<8x32xf32, #tpu.memory_space<vmem>>, vector<8x32xf32>
    tpu.vector_store %arg15[%c0_298, %c0_299], %680 {strides = array<i32>} : memref<8x32xf32, #tpu.memory_space<vmem>>, vector<8x32xf32>,
    %c0_300 = arith.constant 0 : index
    %c0_301 = arith.constant 0 : index
    %727 = vector.load %arg16[%c0_300, %c0_301] : memref<8x32xf32, #tpu.memory_space<vmem>>, vector<8x32xf32>
    tpu.vector_store %arg16[%c0_300, %c0_301], %687 {strides = array<i32>} : memref<8x32xf32, #tpu.memory_space<vmem>>, vector<8x32xf32>,
    %c0_302 = arith.constant 0 : index
    %c0_303 = arith.constant 0 : index
    %728 = vector.load %arg17[%c0_302, %c0_303] : memref<8x32xf32, #tpu.memory_space<vmem>>, vector<8x32xf32>
    tpu.vector_store %arg17[%c0_302, %c0_303], %718 {strides = array<i32>} : memref<8x32xf32, #tpu.memory_space<vmem>>, vector<8x32xf32>,
    %c0_304 = arith.constant 0 : index
    %c0_305 = arith.constant 0 : index
    %729 = vector.load %arg18[%c0_304, %c0_305] : memref<8x32xf32, #tpu.memory_space<vmem>>, vector<8x32xf32>
    tpu.vector_store %arg18[%c0_304, %c0_305], %725 {strides = array<i32>} : memref<8x32xf32, #tpu.memory_space<vmem>>, vector<8x32xf32>,
    %730 = vector.broadcast %642 : vector<8x1xf32> to vector<8x32xf32>
    %731 = arith.mulf %680, %730 : vector<8x32xf32>
    %732 = arith.index_cast %c6_i32 : i32 to index
    %c0_306 = arith.constant 0 : index
    %c0_307 = arith.constant 0 : index
    %733 = vector.load %arg10[%732, %c0_306, %c0_307] : memref<10x8x64xf32, #tpu.memory_space<vmem>>, vector<1x8x32xf32>
    %734 = vector.shape_cast %733 : vector<1x8x32xf32> to vector<8x32xf32>
    %735 = vector.shape_cast %731 : vector<8x32xf32> to vector<1x8x32xf32>
    tpu.vector_store %arg10[%732, %c0_306, %c0_307], %735 {strides = array<i32>} : memref<10x8x64xf32, #tpu.memory_space<vmem>>, vector<1x8x32xf32>,
    %736 = vector.broadcast %645 : vector<8x1xf32> to vector<8x32xf32>
    %737 = arith.mulf %718, %736 : vector<8x32xf32>
    %738 = arith.index_cast %639 : i32 to index
    %c0_308 = arith.constant 0 : index
    %c32_309 = arith.constant 32 : index
    %739 = vector.load %arg10[%738, %c0_308, %c32_309] : memref<10x8x64xf32, #tpu.memory_space<vmem>>, vector<1x8x32xf32>
    %740 = vector.shape_cast %739 : vector<1x8x32xf32> to vector<8x32xf32>
    %741 = vector.shape_cast %737 : vector<8x32xf32> to vector<1x8x32xf32>
    tpu.vector_store %arg10[%738, %c0_308, %c32_309], %741 {strides = array<i32>} : memref<10x8x64xf32, #tpu.memory_space<vmem>>, vector<1x8x32xf32>,
    %c7_i32 = arith.constant 7 : i32
    %c9_i32_310 = arith.constant 9 : i32
    %742 = arith.subi %c9_i32_310, %c7_i32 : i32
    %743 = arith.index_cast %c7_i32 : i32 to index
    %c0_311 = arith.constant 0 : index
    %c0_312 = arith.constant 0 : index
    %744 = vector.load %arg1[%743, %c0_311, %c0_312] : memref<10x8x1xf32, #tpu.memory_space<vmem>>, vector<1x8x1xf32>
    %745 = vector.shape_cast %744 : vector<1x8x1xf32> to vector<8x1xf32>
    %746 = arith.index_cast %742 : i32 to index
    %c0_313 = arith.constant 0 : index
    %c0_314 = arith.constant 0 : index
    %747 = vector.load %arg1[%746, %c0_313, %c0_314] : memref<10x8x1xf32, #tpu.memory_space<vmem>>, vector<1x8x1xf32>
    %748 = vector.shape_cast %747 : vector<1x8x1xf32> to vector<8x1xf32>
    %c8_i32_315 = arith.constant 8 : i32
    %749 = arith.muli %c7_i32, %c8_i32_315 : i32
    %750 = tpu.assume_multiple %749, 8 : i32
    %c8_i32_316 = arith.constant 8 : i32
    %751 = arith.muli %742, %c8_i32_316 : i32
    %752 = tpu.assume_multiple %751, 8 : i32
    %753 = arith.index_cast %750 : i32 to index
    %c0_317 = arith.constant 0 : index
    %754 = vector.load %arg13[%753, %c0_317] : memref<80x128xf32, #tpu.memory_space<vmem>>, vector<8x128xf32>
    %c0_318 = arith.constant 0 : index
    %c0_319 = arith.constant 0 : index
    %755 = vector.load %arg15[%c0_318, %c0_319] : memref<8x32xf32, #tpu.memory_space<vmem>>, vector<8x32xf32>
    %c0_320 = arith.constant 0 : index
    %c0_321 = arith.constant 0 : index
    %756 = vector.load %arg16[%c0_320, %c0_321] : memref<8x32xf32, #tpu.memory_space<vmem>>, vector<8x32xf32>
    %757 = arith.truncf %755 : vector<8x32xf32> to vector<8x32xbf16>
    %c0_322 = arith.constant 0 : index
    %c0_323 = arith.constant 0 : index
    %758 = vector.load %arg3[%c0_322, %c0_323] : memref<32x128xbf16, #tpu.memory_space<vmem>>, vector<32x128xbf16>
    %cst_324 = arith.constant dense<0.000000e+00> : vector<8x128xf32>
    %759 = tpu.matmul %757, %758, %cst_324 {dimension_numbers = #tpu.dot_dimension_numbers<[1], [0], [0], [1], [0, 0, 1, 1], [], []>} : vector<8x32xbf16>, vector<32x128xbf16>, vector<8x128xf32> -> vector<8x128xf32>
    %760 = arith.addf %754, %759 : vector<8x128xf32>
    %761 = vector.extract_strided_slice %760 {offsets = [0, 0], sizes = [8, 96], strides = [1, 1]} : vector<8x128xf32> to vector<8x96xf32>
    %762 = arith.negf %761 : vector<8x96xf32>
    %763 = math.exp %762 : vector<8x96xf32>
    %cst_325 = arith.constant 1.000000e+00 : f32
    %764 = vector.broadcast %cst_325 : f32 to vector<8x96xf32>
    %765 = arith.addf %764, %763 : vector<8x96xf32>
    %766 = arith.divf %764, %765 : vector<8x96xf32>
    %767 = vector.extract_strided_slice %760 {offsets = [0, 96], sizes = [8, 32], strides = [1, 1]} : vector<8x128xf32> to vector<8x32xf32>
    %768 = math.tanh %767 : vector<8x32xf32>
    %769 = vector.extract_strided_slice %766 {offsets = [0, 32], sizes = [8, 32], strides = [1, 1]} : vector<8x96xf32> to vector<8x32xf32>
    %770 = arith.mulf %769, %756 : vector<8x32xf32>
    %771 = vector.extract_strided_slice %766 {offsets = [0, 0], sizes = [8, 32], strides = [1, 1]} : vector<8x96xf32> to vector<8x32xf32>
    %772 = arith.mulf %771, %768 : vector<8x32xf32>
    %773 = arith.addf %770, %772 : vector<8x32xf32>
    %774 = vector.extract_strided_slice %766 {offsets = [0, 64], sizes = [8, 32], strides = [1, 1]} : vector<8x96xf32> to vector<8x32xf32>
    %775 = math.tanh %773 : vector<8x32xf32>
    %776 = arith.mulf %774, %775 : vector<8x32xf32>
    %777 = vector.broadcast %745 : vector<8x1xf32> to vector<8x32xf32>
    %778 = arith.mulf %777, %776 : vector<8x32xf32>
    %cst_326 = arith.constant 1.000000e+00 : f32
    %779 = vector.broadcast %cst_326 : f32 to vector<8x1xf32>
    %780 = arith.subf %779, %745 : vector<8x1xf32>
    %781 = vector.broadcast %780 : vector<8x1xf32> to vector<8x32xf32>
    %782 = arith.mulf %781, %755 : vector<8x32xf32>
    %783 = arith.addf %778, %782 : vector<8x32xf32>
    %784 = vector.broadcast %745 : vector<8x1xf32> to vector<8x32xf32>
    %785 = arith.mulf %784, %773 : vector<8x32xf32>
    %cst_327 = arith.constant 1.000000e+00 : f32
    %786 = vector.broadcast %cst_327 : f32 to vector<8x1xf32>
    %787 = arith.subf %786, %745 : vector<8x1xf32>
    %788 = vector.broadcast %787 : vector<8x1xf32> to vector<8x32xf32>
    %789 = arith.mulf %788, %756 : vector<8x32xf32>
    %790 = arith.addf %785, %789 : vector<8x32xf32>
    %791 = arith.index_cast %752 : i32 to index
    %c0_328 = arith.constant 0 : index
    %792 = vector.load %arg14[%791, %c0_328] : memref<80x128xf32, #tpu.memory_space<vmem>>, vector<8x128xf32>
    %c0_329 = arith.constant 0 : index
    %c0_330 = arith.constant 0 : index
    %793 = vector.load %arg17[%c0_329, %c0_330] : memref<8x32xf32, #tpu.memory_space<vmem>>, vector<8x32xf32>
    %c0_331 = arith.constant 0 : index
    %c0_332 = arith.constant 0 : index
    %794 = vector.load %arg18[%c0_331, %c0_332] : memref<8x32xf32, #tpu.memory_space<vmem>>, vector<8x32xf32>
    %795 = arith.truncf %793 : vector<8x32xf32> to vector<8x32xbf16>
    %c0_333 = arith.constant 0 : index
    %c0_334 = arith.constant 0 : index
    %796 = vector.load %arg6[%c0_333, %c0_334] : memref<32x128xbf16, #tpu.memory_space<vmem>>, vector<32x128xbf16>
    %cst_335 = arith.constant dense<0.000000e+00> : vector<8x128xf32>
    %797 = tpu.matmul %795, %796, %cst_335 {dimension_numbers = #tpu.dot_dimension_numbers<[1], [0], [0], [1], [0, 0, 1, 1], [], []>} : vector<8x32xbf16>, vector<32x128xbf16>, vector<8x128xf32> -> vector<8x128xf32>
    %798 = arith.addf %792, %797 : vector<8x128xf32>
    %799 = vector.extract_strided_slice %798 {offsets = [0, 0], sizes = [8, 96], strides = [1, 1]} : vector<8x128xf32> to vector<8x96xf32>
    %800 = arith.negf %799 : vector<8x96xf32>
    %801 = math.exp %800 : vector<8x96xf32>
    %cst_336 = arith.constant 1.000000e+00 : f32
    %802 = vector.broadcast %cst_336 : f32 to vector<8x96xf32>
    %803 = arith.addf %802, %801 : vector<8x96xf32>
    %804 = arith.divf %802, %803 : vector<8x96xf32>
    %805 = vector.extract_strided_slice %798 {offsets = [0, 96], sizes = [8, 32], strides = [1, 1]} : vector<8x128xf32> to vector<8x32xf32>
    %806 = math.tanh %805 : vector<8x32xf32>
    %807 = vector.extract_strided_slice %804 {offsets = [0, 32], sizes = [8, 32], strides = [1, 1]} : vector<8x96xf32> to vector<8x32xf32>
    %808 = arith.mulf %807, %794 : vector<8x32xf32>
    %809 = vector.extract_strided_slice %804 {offsets = [0, 0], sizes = [8, 32], strides = [1, 1]} : vector<8x96xf32> to vector<8x32xf32>
    %810 = arith.mulf %809, %806 : vector<8x32xf32>
    %811 = arith.addf %808, %810 : vector<8x32xf32>
    %812 = vector.extract_strided_slice %804 {offsets = [0, 64], sizes = [8, 32], strides = [1, 1]} : vector<8x96xf32> to vector<8x32xf32>
    %813 = math.tanh %811 : vector<8x32xf32>
    %814 = arith.mulf %812, %813 : vector<8x32xf32>
    %815 = vector.broadcast %748 : vector<8x1xf32> to vector<8x32xf32>
    %816 = arith.mulf %815, %814 : vector<8x32xf32>
    %cst_337 = arith.constant 1.000000e+00 : f32
    %817 = vector.broadcast %cst_337 : f32 to vector<8x1xf32>
    %818 = arith.subf %817, %748 : vector<8x1xf32>
    %819 = vector.broadcast %818 : vector<8x1xf32> to vector<8x32xf32>
    %820 = arith.mulf %819, %793 : vector<8x32xf32>
    %821 = arith.addf %816, %820 : vector<8x32xf32>
    %822 = vector.broadcast %748 : vector<8x1xf32> to vector<8x32xf32>
    %823 = arith.mulf %822, %811 : vector<8x32xf32>
    %cst_338 = arith.constant 1.000000e+00 : f32
    %824 = vector.broadcast %cst_338 : f32 to vector<8x1xf32>
    %825 = arith.subf %824, %748 : vector<8x1xf32>
    %826 = vector.broadcast %825 : vector<8x1xf32> to vector<8x32xf32>
    %827 = arith.mulf %826, %794 : vector<8x32xf32>
    %828 = arith.addf %823, %827 : vector<8x32xf32>
    %c0_339 = arith.constant 0 : index
    %c0_340 = arith.constant 0 : index
    %829 = vector.load %arg15[%c0_339, %c0_340] : memref<8x32xf32, #tpu.memory_space<vmem>>, vector<8x32xf32>
    tpu.vector_store %arg15[%c0_339, %c0_340], %783 {strides = array<i32>} : memref<8x32xf32, #tpu.memory_space<vmem>>, vector<8x32xf32>,
    %c0_341 = arith.constant 0 : index
    %c0_342 = arith.constant 0 : index
    %830 = vector.load %arg16[%c0_341, %c0_342] : memref<8x32xf32, #tpu.memory_space<vmem>>, vector<8x32xf32>
    tpu.vector_store %arg16[%c0_341, %c0_342], %790 {strides = array<i32>} : memref<8x32xf32, #tpu.memory_space<vmem>>, vector<8x32xf32>,
    %c0_343 = arith.constant 0 : index
    %c0_344 = arith.constant 0 : index
    %831 = vector.load %arg17[%c0_343, %c0_344] : memref<8x32xf32, #tpu.memory_space<vmem>>, vector<8x32xf32>
    tpu.vector_store %arg17[%c0_343, %c0_344], %821 {strides = array<i32>} : memref<8x32xf32, #tpu.memory_space<vmem>>, vector<8x32xf32>,
    %c0_345 = arith.constant 0 : index
    %c0_346 = arith.constant 0 : index
    %832 = vector.load %arg18[%c0_345, %c0_346] : memref<8x32xf32, #tpu.memory_space<vmem>>, vector<8x32xf32>
    tpu.vector_store %arg18[%c0_345, %c0_346], %828 {strides = array<i32>} : memref<8x32xf32, #tpu.memory_space<vmem>>, vector<8x32xf32>,
    %833 = vector.broadcast %745 : vector<8x1xf32> to vector<8x32xf32>
    %834 = arith.mulf %783, %833 : vector<8x32xf32>
    %835 = arith.index_cast %c7_i32 : i32 to index
    %c0_347 = arith.constant 0 : index
    %c0_348 = arith.constant 0 : index
    %836 = vector.load %arg10[%835, %c0_347, %c0_348] : memref<10x8x64xf32, #tpu.memory_space<vmem>>, vector<1x8x32xf32>
    %837 = vector.shape_cast %836 : vector<1x8x32xf32> to vector<8x32xf32>
    %838 = vector.shape_cast %834 : vector<8x32xf32> to vector<1x8x32xf32>
    tpu.vector_store %arg10[%835, %c0_347, %c0_348], %838 {strides = array<i32>} : memref<10x8x64xf32, #tpu.memory_space<vmem>>, vector<1x8x32xf32>,
    %839 = vector.broadcast %748 : vector<8x1xf32> to vector<8x32xf32>
    %840 = arith.mulf %821, %839 : vector<8x32xf32>
    %841 = arith.index_cast %742 : i32 to index
    %c0_349 = arith.constant 0 : index
    %c32_350 = arith.constant 32 : index
    %842 = vector.load %arg10[%841, %c0_349, %c32_350] : memref<10x8x64xf32, #tpu.memory_space<vmem>>, vector<1x8x32xf32>
    %843 = vector.shape_cast %842 : vector<1x8x32xf32> to vector<8x32xf32>
    %844 = vector.shape_cast %840 : vector<8x32xf32> to vector<1x8x32xf32>
    tpu.vector_store %arg10[%841, %c0_349, %c32_350], %844 {strides = array<i32>} : memref<10x8x64xf32, #tpu.memory_space<vmem>>, vector<1x8x32xf32>,
    %c8_i32_351 = arith.constant 8 : i32
    %c9_i32_352 = arith.constant 9 : i32
    %845 = arith.subi %c9_i32_352, %c8_i32_351 : i32
    %846 = arith.index_cast %c8_i32_351 : i32 to index
    %c0_353 = arith.constant 0 : index
    %c0_354 = arith.constant 0 : index
    %847 = vector.load %arg1[%846, %c0_353, %c0_354] : memref<10x8x1xf32, #tpu.memory_space<vmem>>, vector<1x8x1xf32>
    %848 = vector.shape_cast %847 : vector<1x8x1xf32> to vector<8x1xf32>
    %849 = arith.index_cast %845 : i32 to index
    %c0_355 = arith.constant 0 : index
    %c0_356 = arith.constant 0 : index
    %850 = vector.load %arg1[%849, %c0_355, %c0_356] : memref<10x8x1xf32, #tpu.memory_space<vmem>>, vector<1x8x1xf32>
    %851 = vector.shape_cast %850 : vector<1x8x1xf32> to vector<8x1xf32>
    %c8_i32_357 = arith.constant 8 : i32
    %852 = arith.muli %c8_i32_351, %c8_i32_357 : i32
    %853 = tpu.assume_multiple %852, 8 : i32
    %c8_i32_358 = arith.constant 8 : i32
    %854 = arith.muli %845, %c8_i32_358 : i32
    %855 = tpu.assume_multiple %854, 8 : i32
    %856 = arith.index_cast %853 : i32 to index
    %c0_359 = arith.constant 0 : index
    %857 = vector.load %arg13[%856, %c0_359] : memref<80x128xf32, #tpu.memory_space<vmem>>, vector<8x128xf32>
    %c0_360 = arith.constant 0 : index
    %c0_361 = arith.constant 0 : index
    %858 = vector.load %arg15[%c0_360, %c0_361] : memref<8x32xf32, #tpu.memory_space<vmem>>, vector<8x32xf32>
    %c0_362 = arith.constant 0 : index
    %c0_363 = arith.constant 0 : index
    %859 = vector.load %arg16[%c0_362, %c0_363] : memref<8x32xf32, #tpu.memory_space<vmem>>, vector<8x32xf32>
    %860 = arith.truncf %858 : vector<8x32xf32> to vector<8x32xbf16>
    %c0_364 = arith.constant 0 : index
    %c0_365 = arith.constant 0 : index
    %861 = vector.load %arg3[%c0_364, %c0_365] : memref<32x128xbf16, #tpu.memory_space<vmem>>, vector<32x128xbf16>
    %cst_366 = arith.constant dense<0.000000e+00> : vector<8x128xf32>
    %862 = tpu.matmul %860, %861, %cst_366 {dimension_numbers = #tpu.dot_dimension_numbers<[1], [0], [0], [1], [0, 0, 1, 1], [], []>} : vector<8x32xbf16>, vector<32x128xbf16>, vector<8x128xf32> -> vector<8x128xf32>
    %863 = arith.addf %857, %862 : vector<8x128xf32>
    %864 = vector.extract_strided_slice %863 {offsets = [0, 0], sizes = [8, 96], strides = [1, 1]} : vector<8x128xf32> to vector<8x96xf32>
    %865 = arith.negf %864 : vector<8x96xf32>
    %866 = math.exp %865 : vector<8x96xf32>
    %cst_367 = arith.constant 1.000000e+00 : f32
    %867 = vector.broadcast %cst_367 : f32 to vector<8x96xf32>
    %868 = arith.addf %867, %866 : vector<8x96xf32>
    %869 = arith.divf %867, %868 : vector<8x96xf32>
    %870 = vector.extract_strided_slice %863 {offsets = [0, 96], sizes = [8, 32], strides = [1, 1]} : vector<8x128xf32> to vector<8x32xf32>
    %871 = math.tanh %870 : vector<8x32xf32>
    %872 = vector.extract_strided_slice %869 {offsets = [0, 32], sizes = [8, 32], strides = [1, 1]} : vector<8x96xf32> to vector<8x32xf32>
    %873 = arith.mulf %872, %859 : vector<8x32xf32>
    %874 = vector.extract_strided_slice %869 {offsets = [0, 0], sizes = [8, 32], strides = [1, 1]} : vector<8x96xf32> to vector<8x32xf32>
    %875 = arith.mulf %874, %871 : vector<8x32xf32>
    %876 = arith.addf %873, %875 : vector<8x32xf32>
    %877 = vector.extract_strided_slice %869 {offsets = [0, 64], sizes = [8, 32], strides = [1, 1]} : vector<8x96xf32> to vector<8x32xf32>
    %878 = math.tanh %876 : vector<8x32xf32>
    %879 = arith.mulf %877, %878 : vector<8x32xf32>
    %880 = vector.broadcast %848 : vector<8x1xf32> to vector<8x32xf32>
    %881 = arith.mulf %880, %879 : vector<8x32xf32>
    %cst_368 = arith.constant 1.000000e+00 : f32
    %882 = vector.broadcast %cst_368 : f32 to vector<8x1xf32>
    %883 = arith.subf %882, %848 : vector<8x1xf32>
    %884 = vector.broadcast %883 : vector<8x1xf32> to vector<8x32xf32>
    %885 = arith.mulf %884, %858 : vector<8x32xf32>
    %886 = arith.addf %881, %885 : vector<8x32xf32>
    %887 = vector.broadcast %848 : vector<8x1xf32> to vector<8x32xf32>
    %888 = arith.mulf %887, %876 : vector<8x32xf32>
    %cst_369 = arith.constant 1.000000e+00 : f32
    %889 = vector.broadcast %cst_369 : f32 to vector<8x1xf32>
    %890 = arith.subf %889, %848 : vector<8x1xf32>
    %891 = vector.broadcast %890 : vector<8x1xf32> to vector<8x32xf32>
    %892 = arith.mulf %891, %859 : vector<8x32xf32>
    %893 = arith.addf %888, %892 : vector<8x32xf32>
    %894 = arith.index_cast %855 : i32 to index
    %c0_370 = arith.constant 0 : index
    %895 = vector.load %arg14[%894, %c0_370] : memref<80x128xf32, #tpu.memory_space<vmem>>, vector<8x128xf32>
    %c0_371 = arith.constant 0 : index
    %c0_372 = arith.constant 0 : index
    %896 = vector.load %arg17[%c0_371, %c0_372] : memref<8x32xf32, #tpu.memory_space<vmem>>, vector<8x32xf32>
    %c0_373 = arith.constant 0 : index
    %c0_374 = arith.constant 0 : index
    %897 = vector.load %arg18[%c0_373, %c0_374] : memref<8x32xf32, #tpu.memory_space<vmem>>, vector<8x32xf32>
    %898 = arith.truncf %896 : vector<8x32xf32> to vector<8x32xbf16>
    %c0_375 = arith.constant 0 : index
    %c0_376 = arith.constant 0 : index
    %899 = vector.load %arg6[%c0_375, %c0_376] : memref<32x128xbf16, #tpu.memory_space<vmem>>, vector<32x128xbf16>
    %cst_377 = arith.constant dense<0.000000e+00> : vector<8x128xf32>
    %900 = tpu.matmul %898, %899, %cst_377 {dimension_numbers = #tpu.dot_dimension_numbers<[1], [0], [0], [1], [0, 0, 1, 1], [], []>} : vector<8x32xbf16>, vector<32x128xbf16>, vector<8x128xf32> -> vector<8x128xf32>
    %901 = arith.addf %895, %900 : vector<8x128xf32>
    %902 = vector.extract_strided_slice %901 {offsets = [0, 0], sizes = [8, 96], strides = [1, 1]} : vector<8x128xf32> to vector<8x96xf32>
    %903 = arith.negf %902 : vector<8x96xf32>
    %904 = math.exp %903 : vector<8x96xf32>
    %cst_378 = arith.constant 1.000000e+00 : f32
    %905 = vector.broadcast %cst_378 : f32 to vector<8x96xf32>
    %906 = arith.addf %905, %904 : vector<8x96xf32>
    %907 = arith.divf %905, %906 : vector<8x96xf32>
    %908 = vector.extract_strided_slice %901 {offsets = [0, 96], sizes = [8, 32], strides = [1, 1]} : vector<8x128xf32> to vector<8x32xf32>
    %909 = math.tanh %908 : vector<8x32xf32>
    %910 = vector.extract_strided_slice %907 {offsets = [0, 32], sizes = [8, 32], strides = [1, 1]} : vector<8x96xf32> to vector<8x32xf32>
    %911 = arith.mulf %910, %897 : vector<8x32xf32>
    %912 = vector.extract_strided_slice %907 {offsets = [0, 0], sizes = [8, 32], strides = [1, 1]} : vector<8x96xf32> to vector<8x32xf32>
    %913 = arith.mulf %912, %909 : vector<8x32xf32>
    %914 = arith.addf %911, %913 : vector<8x32xf32>
    %915 = vector.extract_strided_slice %907 {offsets = [0, 64], sizes = [8, 32], strides = [1, 1]} : vector<8x96xf32> to vector<8x32xf32>
    %916 = math.tanh %914 : vector<8x32xf32>
    %917 = arith.mulf %915, %916 : vector<8x32xf32>
    %918 = vector.broadcast %851 : vector<8x1xf32> to vector<8x32xf32>
    %919 = arith.mulf %918, %917 : vector<8x32xf32>
    %cst_379 = arith.constant 1.000000e+00 : f32
    %920 = vector.broadcast %cst_379 : f32 to vector<8x1xf32>
    %921 = arith.subf %920, %851 : vector<8x1xf32>
    %922 = vector.broadcast %921 : vector<8x1xf32> to vector<8x32xf32>
    %923 = arith.mulf %922, %896 : vector<8x32xf32>
    %924 = arith.addf %919, %923 : vector<8x32xf32>
    %925 = vector.broadcast %851 : vector<8x1xf32> to vector<8x32xf32>
    %926 = arith.mulf %925, %914 : vector<8x32xf32>
    %cst_380 = arith.constant 1.000000e+00 : f32
    %927 = vector.broadcast %cst_380 : f32 to vector<8x1xf32>
    %928 = arith.subf %927, %851 : vector<8x1xf32>
    %929 = vector.broadcast %928 : vector<8x1xf32> to vector<8x32xf32>
    %930 = arith.mulf %929, %897 : vector<8x32xf32>
    %931 = arith.addf %926, %930 : vector<8x32xf32>
    %c0_381 = arith.constant 0 : index
    %c0_382 = arith.constant 0 : index
    %932 = vector.load %arg15[%c0_381, %c0_382] : memref<8x32xf32, #tpu.memory_space<vmem>>, vector<8x32xf32>
    tpu.vector_store %arg15[%c0_381, %c0_382], %886 {strides = array<i32>} : memref<8x32xf32, #tpu.memory_space<vmem>>, vector<8x32xf32>,
    %c0_383 = arith.constant 0 : index
    %c0_384 = arith.constant 0 : index
    %933 = vector.load %arg16[%c0_383, %c0_384] : memref<8x32xf32, #tpu.memory_space<vmem>>, vector<8x32xf32>
    tpu.vector_store %arg16[%c0_383, %c0_384], %893 {strides = array<i32>} : memref<8x32xf32, #tpu.memory_space<vmem>>, vector<8x32xf32>,
    %c0_385 = arith.constant 0 : index
    %c0_386 = arith.constant 0 : index
    %934 = vector.load %arg17[%c0_385, %c0_386] : memref<8x32xf32, #tpu.memory_space<vmem>>, vector<8x32xf32>
    tpu.vector_store %arg17[%c0_385, %c0_386], %924 {strides = array<i32>} : memref<8x32xf32, #tpu.memory_space<vmem>>, vector<8x32xf32>,
    %c0_387 = arith.constant 0 : index
    %c0_388 = arith.constant 0 : index
    %935 = vector.load %arg18[%c0_387, %c0_388] : memref<8x32xf32, #tpu.memory_space<vmem>>, vector<8x32xf32>
    tpu.vector_store %arg18[%c0_387, %c0_388], %931 {strides = array<i32>} : memref<8x32xf32, #tpu.memory_space<vmem>>, vector<8x32xf32>,
    %936 = vector.broadcast %848 : vector<8x1xf32> to vector<8x32xf32>
    %937 = arith.mulf %886, %936 : vector<8x32xf32>
    %938 = arith.index_cast %c8_i32_351 : i32 to index
    %c0_389 = arith.constant 0 : index
    %c0_390 = arith.constant 0 : index
    %939 = vector.load %arg10[%938, %c0_389, %c0_390] : memref<10x8x64xf32, #tpu.memory_space<vmem>>, vector<1x8x32xf32>
    %940 = vector.shape_cast %939 : vector<1x8x32xf32> to vector<8x32xf32>
    %941 = vector.shape_cast %937 : vector<8x32xf32> to vector<1x8x32xf32>
    tpu.vector_store %arg10[%938, %c0_389, %c0_390], %941 {strides = array<i32>} : memref<10x8x64xf32, #tpu.memory_space<vmem>>, vector<1x8x32xf32>,
    %942 = vector.broadcast %851 : vector<8x1xf32> to vector<8x32xf32>
    %943 = arith.mulf %924, %942 : vector<8x32xf32>
    %944 = arith.index_cast %845 : i32 to index
    %c0_391 = arith.constant 0 : index
    %c32_392 = arith.constant 32 : index
    %945 = vector.load %arg10[%944, %c0_391, %c32_392] : memref<10x8x64xf32, #tpu.memory_space<vmem>>, vector<1x8x32xf32>
    %946 = vector.shape_cast %945 : vector<1x8x32xf32> to vector<8x32xf32>
    %947 = vector.shape_cast %943 : vector<8x32xf32> to vector<1x8x32xf32>
    tpu.vector_store %arg10[%944, %c0_391, %c32_392], %947 {strides = array<i32>} : memref<10x8x64xf32, #tpu.memory_space<vmem>>, vector<1x8x32xf32>,
    %c9_i32_393 = arith.constant 9 : i32
    %c9_i32_394 = arith.constant 9 : i32
    %948 = arith.subi %c9_i32_394, %c9_i32_393 : i32
    %949 = arith.index_cast %c9_i32_393 : i32 to index
    %c0_395 = arith.constant 0 : index
    %c0_396 = arith.constant 0 : index
    %950 = vector.load %arg1[%949, %c0_395, %c0_396] : memref<10x8x1xf32, #tpu.memory_space<vmem>>, vector<1x8x1xf32>
    %951 = vector.shape_cast %950 : vector<1x8x1xf32> to vector<8x1xf32>
    %952 = arith.index_cast %948 : i32 to index
    %c0_397 = arith.constant 0 : index
    %c0_398 = arith.constant 0 : index
    %953 = vector.load %arg1[%952, %c0_397, %c0_398] : memref<10x8x1xf32, #tpu.memory_space<vmem>>, vector<1x8x1xf32>
    %954 = vector.shape_cast %953 : vector<1x8x1xf32> to vector<8x1xf32>
    %c8_i32_399 = arith.constant 8 : i32
    %955 = arith.muli %c9_i32_393, %c8_i32_399 : i32
    %956 = tpu.assume_multiple %955, 8 : i32
    %c8_i32_400 = arith.constant 8 : i32
    %957 = arith.muli %948, %c8_i32_400 : i32
    %958 = tpu.assume_multiple %957, 8 : i32
    %959 = arith.index_cast %956 : i32 to index
    %c0_401 = arith.constant 0 : index
    %960 = vector.load %arg13[%959, %c0_401] : memref<80x128xf32, #tpu.memory_space<vmem>>, vector<8x128xf32>
    %c0_402 = arith.constant 0 : index
    %c0_403 = arith.constant 0 : index
    %961 = vector.load %arg15[%c0_402, %c0_403] : memref<8x32xf32, #tpu.memory_space<vmem>>, vector<8x32xf32>
    %c0_404 = arith.constant 0 : index
    %c0_405 = arith.constant 0 : index
    %962 = vector.load %arg16[%c0_404, %c0_405] : memref<8x32xf32, #tpu.memory_space<vmem>>, vector<8x32xf32>
    %963 = arith.truncf %961 : vector<8x32xf32> to vector<8x32xbf16>
    %c0_406 = arith.constant 0 : index
    %c0_407 = arith.constant 0 : index
    %964 = vector.load %arg3[%c0_406, %c0_407] : memref<32x128xbf16, #tpu.memory_space<vmem>>, vector<32x128xbf16>
    %cst_408 = arith.constant dense<0.000000e+00> : vector<8x128xf32>
    %965 = tpu.matmul %963, %964, %cst_408 {dimension_numbers = #tpu.dot_dimension_numbers<[1], [0], [0], [1], [0, 0, 1, 1], [], []>} : vector<8x32xbf16>, vector<32x128xbf16>, vector<8x128xf32> -> vector<8x128xf32>
    %966 = arith.addf %960, %965 : vector<8x128xf32>
    %967 = vector.extract_strided_slice %966 {offsets = [0, 0], sizes = [8, 96], strides = [1, 1]} : vector<8x128xf32> to vector<8x96xf32>
    %968 = arith.negf %967 : vector<8x96xf32>
    %969 = math.exp %968 : vector<8x96xf32>
    %cst_409 = arith.constant 1.000000e+00 : f32
    %970 = vector.broadcast %cst_409 : f32 to vector<8x96xf32>
    %971 = arith.addf %970, %969 : vector<8x96xf32>
    %972 = arith.divf %970, %971 : vector<8x96xf32>
    %973 = vector.extract_strided_slice %966 {offsets = [0, 96], sizes = [8, 32], strides = [1, 1]} : vector<8x128xf32> to vector<8x32xf32>
    %974 = math.tanh %973 : vector<8x32xf32>
    %975 = vector.extract_strided_slice %972 {offsets = [0, 32], sizes = [8, 32], strides = [1, 1]} : vector<8x96xf32> to vector<8x32xf32>
    %976 = arith.mulf %975, %962 : vector<8x32xf32>
    %977 = vector.extract_strided_slice %972 {offsets = [0, 0], sizes = [8, 32], strides = [1, 1]} : vector<8x96xf32> to vector<8x32xf32>
    %978 = arith.mulf %977, %974 : vector<8x32xf32>
    %979 = arith.addf %976, %978 : vector<8x32xf32>
    %980 = vector.extract_strided_slice %972 {offsets = [0, 64], sizes = [8, 32], strides = [1, 1]} : vector<8x96xf32> to vector<8x32xf32>
    %981 = math.tanh %979 : vector<8x32xf32>
    %982 = arith.mulf %980, %981 : vector<8x32xf32>
    %983 = vector.broadcast %951 : vector<8x1xf32> to vector<8x32xf32>
    %984 = arith.mulf %983, %982 : vector<8x32xf32>
    %cst_410 = arith.constant 1.000000e+00 : f32
    %985 = vector.broadcast %cst_410 : f32 to vector<8x1xf32>
    %986 = arith.subf %985, %951 : vector<8x1xf32>
    %987 = vector.broadcast %986 : vector<8x1xf32> to vector<8x32xf32>
    %988 = arith.mulf %987, %961 : vector<8x32xf32>
    %989 = arith.addf %984, %988 : vector<8x32xf32>
    %990 = vector.broadcast %951 : vector<8x1xf32> to vector<8x32xf32>
    %991 = arith.mulf %990, %979 : vector<8x32xf32>
    %cst_411 = arith.constant 1.000000e+00 : f32
    %992 = vector.broadcast %cst_411 : f32 to vector<8x1xf32>
    %993 = arith.subf %992, %951 : vector<8x1xf32>
    %994 = vector.broadcast %993 : vector<8x1xf32> to vector<8x32xf32>
    %995 = arith.mulf %994, %962 : vector<8x32xf32>
    %996 = arith.addf %991, %995 : vector<8x32xf32>
    %997 = arith.index_cast %958 : i32 to index
    %c0_412 = arith.constant 0 : index
    %998 = vector.load %arg14[%997, %c0_412] : memref<80x128xf32, #tpu.memory_space<vmem>>, vector<8x128xf32>
    %c0_413 = arith.constant 0 : index
    %c0_414 = arith.constant 0 : index
    %999 = vector.load %arg17[%c0_413, %c0_414] : memref<8x32xf32, #tpu.memory_space<vmem>>, vector<8x32xf32>
    %c0_415 = arith.constant 0 : index
    %c0_416 = arith.constant 0 : index
    %1000 = vector.load %arg18[%c0_415, %c0_416] : memref<8x32xf32, #tpu.memory_space<vmem>>, vector<8x32xf32>
    %1001 = arith.truncf %999 : vector<8x32xf32> to vector<8x32xbf16>
    %c0_417 = arith.constant 0 : index
    %c0_418 = arith.constant 0 : index
    %1002 = vector.load %arg6[%c0_417, %c0_418] : memref<32x128xbf16, #tpu.memory_space<vmem>>, vector<32x128xbf16>
    %cst_419 = arith.constant dense<0.000000e+00> : vector<8x128xf32>
    %1003 = tpu.matmul %1001, %1002, %cst_419 {dimension_numbers = #tpu.dot_dimension_numbers<[1], [0], [0], [1], [0, 0, 1, 1], [], []>} : vector<8x32xbf16>, vector<32x128xbf16>, vector<8x128xf32> -> vector<8x128xf32>
    %1004 = arith.addf %998, %1003 : vector<8x128xf32>
    %1005 = vector.extract_strided_slice %1004 {offsets = [0, 0], sizes = [8, 96], strides = [1, 1]} : vector<8x128xf32> to vector<8x96xf32>
    %1006 = arith.negf %1005 : vector<8x96xf32>
    %1007 = math.exp %1006 : vector<8x96xf32>
    %cst_420 = arith.constant 1.000000e+00 : f32
    %1008 = vector.broadcast %cst_420 : f32 to vector<8x96xf32>
    %1009 = arith.addf %1008, %1007 : vector<8x96xf32>
    %1010 = arith.divf %1008, %1009 : vector<8x96xf32>
    %1011 = vector.extract_strided_slice %1004 {offsets = [0, 96], sizes = [8, 32], strides = [1, 1]} : vector<8x128xf32> to vector<8x32xf32>
    %1012 = math.tanh %1011 : vector<8x32xf32>
    %1013 = vector.extract_strided_slice %1010 {offsets = [0, 32], sizes = [8, 32], strides = [1, 1]} : vector<8x96xf32> to vector<8x32xf32>
    %1014 = arith.mulf %1013, %1000 : vector<8x32xf32>
    %1015 = vector.extract_strided_slice %1010 {offsets = [0, 0], sizes = [8, 32], strides = [1, 1]} : vector<8x96xf32> to vector<8x32xf32>
    %1016 = arith.mulf %1015, %1012 : vector<8x32xf32>
    %1017 = arith.addf %1014, %1016 : vector<8x32xf32>
    %1018 = vector.extract_strided_slice %1010 {offsets = [0, 64], sizes = [8, 32], strides = [1, 1]} : vector<8x96xf32> to vector<8x32xf32>
    %1019 = math.tanh %1017 : vector<8x32xf32>
    %1020 = arith.mulf %1018, %1019 : vector<8x32xf32>
    %1021 = vector.broadcast %954 : vector<8x1xf32> to vector<8x32xf32>
    %1022 = arith.mulf %1021, %1020 : vector<8x32xf32>
    %cst_421 = arith.constant 1.000000e+00 : f32
    %1023 = vector.broadcast %cst_421 : f32 to vector<8x1xf32>
    %1024 = arith.subf %1023, %954 : vector<8x1xf32>
    %1025 = vector.broadcast %1024 : vector<8x1xf32> to vector<8x32xf32>
    %1026 = arith.mulf %1025, %999 : vector<8x32xf32>
    %1027 = arith.addf %1022, %1026 : vector<8x32xf32>
    %1028 = vector.broadcast %954 : vector<8x1xf32> to vector<8x32xf32>
    %1029 = arith.mulf %1028, %1017 : vector<8x32xf32>
    %cst_422 = arith.constant 1.000000e+00 : f32
    %1030 = vector.broadcast %cst_422 : f32 to vector<8x1xf32>
    %1031 = arith.subf %1030, %954 : vector<8x1xf32>
    %1032 = vector.broadcast %1031 : vector<8x1xf32> to vector<8x32xf32>
    %1033 = arith.mulf %1032, %1000 : vector<8x32xf32>
    %1034 = arith.addf %1029, %1033 : vector<8x32xf32>
    %c0_423 = arith.constant 0 : index
    %c0_424 = arith.constant 0 : index
    %1035 = vector.load %arg15[%c0_423, %c0_424] : memref<8x32xf32, #tpu.memory_space<vmem>>, vector<8x32xf32>
    tpu.vector_store %arg15[%c0_423, %c0_424], %989 {strides = array<i32>} : memref<8x32xf32, #tpu.memory_space<vmem>>, vector<8x32xf32>,
    %c0_425 = arith.constant 0 : index
    %c0_426 = arith.constant 0 : index
    %1036 = vector.load %arg16[%c0_425, %c0_426] : memref<8x32xf32, #tpu.memory_space<vmem>>, vector<8x32xf32>
    tpu.vector_store %arg16[%c0_425, %c0_426], %996 {strides = array<i32>} : memref<8x32xf32, #tpu.memory_space<vmem>>, vector<8x32xf32>,
    %c0_427 = arith.constant 0 : index
    %c0_428 = arith.constant 0 : index
    %1037 = vector.load %arg17[%c0_427, %c0_428] : memref<8x32xf32, #tpu.memory_space<vmem>>, vector<8x32xf32>
    tpu.vector_store %arg17[%c0_427, %c0_428], %1027 {strides = array<i32>} : memref<8x32xf32, #tpu.memory_space<vmem>>, vector<8x32xf32>,
    %c0_429 = arith.constant 0 : index
    %c0_430 = arith.constant 0 : index
    %1038 = vector.load %arg18[%c0_429, %c0_430] : memref<8x32xf32, #tpu.memory_space<vmem>>, vector<8x32xf32>
    tpu.vector_store %arg18[%c0_429, %c0_430], %1034 {strides = array<i32>} : memref<8x32xf32, #tpu.memory_space<vmem>>, vector<8x32xf32>,
    %1039 = vector.broadcast %951 : vector<8x1xf32> to vector<8x32xf32>
    %1040 = arith.mulf %989, %1039 : vector<8x32xf32>
    %1041 = arith.index_cast %c9_i32_393 : i32 to index
    %c0_431 = arith.constant 0 : index
    %c0_432 = arith.constant 0 : index
    %1042 = vector.load %arg10[%1041, %c0_431, %c0_432] : memref<10x8x64xf32, #tpu.memory_space<vmem>>, vector<1x8x32xf32>
    %1043 = vector.shape_cast %1042 : vector<1x8x32xf32> to vector<8x32xf32>
    %1044 = vector.shape_cast %1040 : vector<8x32xf32> to vector<1x8x32xf32>
    tpu.vector_store %arg10[%1041, %c0_431, %c0_432], %1044 {strides = array<i32>} : memref<10x8x64xf32, #tpu.memory_space<vmem>>, vector<1x8x32xf32>,
    %1045 = vector.broadcast %954 : vector<8x1xf32> to vector<8x32xf32>
    %1046 = arith.mulf %1027, %1045 : vector<8x32xf32>
    %1047 = arith.index_cast %948 : i32 to index
    %c0_433 = arith.constant 0 : index
    %c32_434 = arith.constant 32 : index
    %1048 = vector.load %arg10[%1047, %c0_433, %c32_434] : memref<10x8x64xf32, #tpu.memory_space<vmem>>, vector<1x8x32xf32>
    %1049 = vector.shape_cast %1048 : vector<1x8x32xf32> to vector<8x32xf32>
    %1050 = vector.shape_cast %1046 : vector<8x32xf32> to vector<1x8x32xf32>
    tpu.vector_store %arg10[%1047, %c0_433, %c32_434], %1050 {strides = array<i32>} : memref<10x8x64xf32, #tpu.memory_space<vmem>>, vector<1x8x32xf32>,
    %c10_i32 = arith.constant 10 : i32
    %c0_435 = arith.constant 0 : index
    %c0_436 = arith.constant 0 : index
    %1051 = vector.load %arg15[%c0_435, %c0_436] : memref<8x32xf32, #tpu.memory_space<vmem>>, vector<8x32xf32>
    %1052 = arith.truncf %1051 : vector<8x32xf32> to vector<8x32xbf16>
    %c0_437 = arith.constant 0 : index
    %c0_438 = arith.constant 0 : index
    %1053 = vector.load %arg17[%c0_437, %c0_438] : memref<8x32xf32, #tpu.memory_space<vmem>>, vector<8x32xf32>
    %1054 = arith.truncf %1053 : vector<8x32xf32> to vector<8x32xbf16>
    %c0_439 = arith.constant 0 : index
    %c0_440 = arith.constant 0 : index
    %1055 = vector.load %arg16[%c0_439, %c0_440] : memref<8x32xf32, #tpu.memory_space<vmem>>, vector<8x32xf32>
    %1056 = arith.truncf %1055 : vector<8x32xf32> to vector<8x32xbf16>
    %c0_441 = arith.constant 0 : index
    %c0_442 = arith.constant 0 : index
    %1057 = vector.load %arg18[%c0_441, %c0_442] : memref<8x32xf32, #tpu.memory_space<vmem>>, vector<8x32xf32>
    %1058 = arith.truncf %1057 : vector<8x32xf32> to vector<8x32xbf16>
    %c0_443 = arith.constant 0 : index
    %c0_444 = arith.constant 0 : index
    %1059 = vector.load %arg8[%c0_443, %c0_444] : memref<64x32xbf16, #tpu.memory_space<vmem>>, vector<32x32xbf16>
    %cst_445 = arith.constant dense<0.000000e+00> : vector<8x32xf32>
    %1060 = tpu.matmul %1052, %1059, %cst_445 {dimension_numbers = #tpu.dot_dimension_numbers<[1], [0], [0], [1], [0, 0, 1, 1], [], []>} : vector<8x32xbf16>, vector<32x32xbf16>, vector<8x32xf32> -> vector<8x32xf32>
    %c32_446 = arith.constant 32 : index
    %c0_447 = arith.constant 0 : index
    %1061 = vector.load %arg8[%c32_446, %c0_447] : memref<64x32xbf16, #tpu.memory_space<vmem>>, vector<32x32xbf16>
    %cst_448 = arith.constant dense<0.000000e+00> : vector<8x32xf32>
    %1062 = tpu.matmul %1054, %1061, %cst_448 {dimension_numbers = #tpu.dot_dimension_numbers<[1], [0], [0], [1], [0, 0, 1, 1], [], []>} : vector<8x32xbf16>, vector<32x32xbf16>, vector<8x32xf32> -> vector<8x32xf32>
    %1063 = arith.addf %1060, %1062 : vector<8x32xf32>
    %c0_449 = arith.constant 0 : index
    %c0_450 = arith.constant 0 : index
    %1064 = vector.load %arg11[%c0_449, %c0_450] : memref<8x32xf32, #tpu.memory_space<vmem>>, vector<8x32xf32>
    tpu.vector_store %arg11[%c0_449, %c0_450], %1063 {strides = array<i32>} : memref<8x32xf32, #tpu.memory_space<vmem>>, vector<8x32xf32>,
    %c0_451 = arith.constant 0 : index
    %c0_452 = arith.constant 0 : index
    %1065 = vector.load %arg9[%c0_451, %c0_452] : memref<64x32xbf16, #tpu.memory_space<vmem>>, vector<32x32xbf16>
    %cst_453 = arith.constant dense<0.000000e+00> : vector<8x32xf32>
    %1066 = tpu.matmul %1056, %1065, %cst_453 {dimension_numbers = #tpu.dot_dimension_numbers<[1], [0], [0], [1], [0, 0, 1, 1], [], []>} : vector<8x32xbf16>, vector<32x32xbf16>, vector<8x32xf32> -> vector<8x32xf32>
    %c32_454 = arith.constant 32 : index
    %c0_455 = arith.constant 0 : index
    %1067 = vector.load %arg9[%c32_454, %c0_455] : memref<64x32xbf16, #tpu.memory_space<vmem>>, vector<32x32xbf16>
    %cst_456 = arith.constant dense<0.000000e+00> : vector<8x32xf32>
    %1068 = tpu.matmul %1058, %1067, %cst_456 {dimension_numbers = #tpu.dot_dimension_numbers<[1], [0], [0], [1], [0, 0, 1, 1], [], []>} : vector<8x32xbf16>, vector<32x32xbf16>, vector<8x32xf32> -> vector<8x32xf32>
    %1069 = arith.addf %1066, %1068 : vector<8x32xf32>
    %c0_457 = arith.constant 0 : index
    %c0_458 = arith.constant 0 : index
    %1070 = vector.load %arg12[%c0_457, %c0_458] : memref<8x32xf32, #tpu.memory_space<vmem>>, vector<8x32xf32>
    tpu.vector_store %arg12[%c0_457, %c0_458], %1069 {strides = array<i32>} : memref<8x32xf32, #tpu.memory_space<vmem>>, vector<8x32xf32>,
    return
  }
}

</mosaic_0001>

<bundles_post_ra>
// kernel: tpu_custom_call.1
= control target key start
LH: loop header
LB: loop body
LE: loop exit
PB: predicated region body
PF: predicated region fallthrough
CT: control target
= control target key end

     0   :  { %18 = vsyncpa [#allocation9], 0  ;;  %v4040_v1 = vmov 0.0   ;;  %vm4041_vm0 = vmmov 0   ;;  %vm91_vm1 = vcmask 130048   ;;  %vm288_vm2 = vcmask 261120   ;;  %s5180_s0 = inlined_call_operand.vmem [shape: bf16[80,16], index: 0, kind: input, shape index: {}]   ;;  %s5181_s1 = inlined_call_operand.vmem [shape: f32[10,8,1], index: 1, kind: input, shape index: {}]   ;;  %s5182_s2 = inlined_call_operand.vmem [shape: bf16[16,128], index: 2, kind: input, shape index: {}]   ;;  %s5183_s3 = inlined_call_operand.vmem [shape: bf16[32,128], index: 3, kind: input, shape index: {}]   ;;  %s5184_s4 = inlined_call_operand.vmem [shape: f32[1,128], index: 4, kind: input, shape index: {}]   ;;  %s5185_s5 = inlined_call_operand.vmem [shape: bf16[16,128], index: 5, kind: input, shape index: {}]   ;;  %s5186_s6 = inlined_call_operand.vmem [shape: bf16[32,128], index: 6, kind: input, shape index: {}]   ;;  %s5187_s7 = inlined_call_operand.vmem [shape: f32[1,128], index: 7, kind: input, shape index: {}]   ;;  %s5188_s8 = inlined_call_operand.vmem [shape: bf16[64,32], index: 8, kind: input, shape index: {}]   ;;  %s5189_s9 = inlined_call_operand.vmem [shape: bf16[64,32], index: 9, kind: input, shape index: {}]   ;;  %s5190_s10 = inlined_call_operand.hbm [shape: f32[10,8,64], index: 10, kind: output, shape index: {0}]   ;;  %s5191_s11 = inlined_call_operand.hbm [shape: f32[8,32], index: 11, kind: output, shape index: {1}]   ;;  %s5192_s12 = inlined_call_operand.hbm [shape: f32[8,32], index: 12, kind: output, shape index: {2}]  }
   0x1   :  { %v3761_v0 = vld [vmem:[%s5182_s2] sm:$0xff]   ;;  %3512 = vmatprep.subr.bf16.mxu0 %v4040_v1  ;;  %3534 = vmatprep.subr.bf16.mxu1 %v4040_v1  ;;  %v3764_v4 = vld [vmem:[%s5183_s3 + $0x8] sm:$0xff]   ;;  %289 = vst.msk [vmem:[#allocation4] sm:$0xff] %vm288_vm2, %v4040_v1  ;;  %290 = vst.msk [vmem:[#allocation5] sm:$0xff] %vm288_vm2, %v4040_v1  ;;  %s4042_s17 = smov 32  }
   0x2   :  { %v3762_v2 = vld [vmem:[%s5185_s5] sm:$0xff]   ;;  %3513 = vmatpush3.bf16.msra.mxu0 %v3761_v0  ;;  %3514 = vmatprep.mubr.msk.bf16.mxu0 %vm4041_vm0, %v4040_v1  ;;  %v3765_v5 = vld [vmem:[%s5186_s6 + $0x8] sm:$0xff]   ;;  %291 = vst.msk [vmem:[#allocation6] sm:$0xff] %vm288_vm2, %v4040_v1  ;;  %292 = vst.msk [vmem:[#allocation7] sm:$0xff] %vm288_vm2, %v4040_v1 }
   0x3   :  { %v3763_v3 = vld [vmem:[%s5180_s0] sm:$0xff]   ;;  %3535 = vmatpush3.bf16.msra.mxu1 %v3762_v2  ;;  %3536 = vmatprep.mubr.msk.bf16.mxu1 %vm4041_vm0, %v4040_v1  ;;  %v3766_v7 = vld [vmem:[%s5180_s0 + $0x8] sm:$0xff]   ;;  %v3767_v11 = vld [vmem:[%s5180_s0 + $0x10] sm:$0xff]  }
   0x4   :  { %3556 = vmatprep.subr.bf16.mxu0 %v4040_v1  ;;  %3564 = vmatprep.subr.bf16.mxu1 %v4040_v1  ;;  %v3768_v6 = vld [vmem:[%s5183_s3] sm:$0xff]   ;;  %v3769_v12 = vld [vmem:[%s5180_s0 + $0x18] sm:$0xff]  }
   0x5   :  { %3515 = vmatmul.mubr.msk.bf16.vlgmr.msra.gmra.mxu0 %vm91_vm1, %v3763_v3  ;;  %v3770_v8 = vld [vmem:[%s5186_s6] sm:$0xff]  }
   0x6   :  { %3537 = vmatmul.mubr.msk.bf16.vlgmr.msra.gmra.mxu1 %vm91_vm1, %v3763_v3  ;;  %3557 = vmatpush3.bf16.msra.mxu0 %v3764_v4  ;;  %v3771_v13 = vld [vmem:[%s5180_s0 + $0x20] sm:$0xff]  }
   0x7   :  { %3565 = vmatpush3.bf16.msra.mxu1 %v3765_v5  ;;  %3518 = vmatprep.mubr.msk.bf16.mxu0 %vm4041_vm0, %v4040_v1 }
   0x8   :  { %3540 = vmatprep.mubr.msk.bf16.mxu1 %vm4041_vm0, %v4040_v1  ;;  %3558 = vmatprep.subr.bf16.mxu0 %v4040_v1  ;;  %v4164_v9 = vld [vmem:[#allocation5] sm:$0xff]  ;;  %v4201_v14 = vld [vmem:[#allocation4] sm:$0xff] }
   0x9   :  { %3566 = vmatprep.subr.bf16.mxu1 %v4040_v1  ;;  %368 = vrot.lane.b32.xlu1 %v4164_v9, %s4042_s17  ;;  %v4169_v10 = vld [vmem:[#allocation7] sm:$0xff]  ;;  %v4204_v15 = vld [vmem:[#allocation6] sm:$0xff]  ;;  %v299_v16 = vpack.c.bf16 %v4201_v14, %v4201_v14 }
   0xa   :  { %3559 = vmatpush3.bf16.msra.mxu0 %v3768_v6  ;;  %v417_v17 = vpack.c.bf16 %v4204_v15, %v4204_v15 }
   0xb   :  { %3567 = vmatpush3.bf16.msra.mxu1 %v3770_v8  ;;  %3572 = vmatprep.subr.bf16.mxu0 %v4040_v1 }
   0xc   :  { %3580 = vmatprep.subr.bf16.mxu1 %v4040_v1 }
   0xd   :  { %3519 = vmatmul.mubr.msk.bf16.gmra.mxu0 %vm91_vm1, %v3766_v7  ;;  %486 = vrot.lane.b32.xlu1 %v4169_v10, %s4042_s17 }
   0xe   :  { %3541 = vmatmul.mubr.msk.bf16.gmra.mxu1 %vm91_vm1, %v3766_v7  ;;  %3522 = vmatprep.mubr.msk.bf16.mxu0 %vm4041_vm0, %v4040_v1 }
   0xf   :  { %3544 = vmatprep.mubr.msk.bf16.mxu1 %vm4041_vm0, %v4040_v1 }
  0x15   :  { %3523 = vmatmul.mubr.msk.bf16.gmra.mxu0 %vm91_vm1, %v3767_v11 }
  0x16   :  { %3545 = vmatmul.mubr.msk.bf16.gmra.mxu1 %vm91_vm1, %v3767_v11  ;;  %3526 = vmatprep.mubr.msk.bf16.mxu0 %vm4041_vm0, %v4040_v1 }
  0x17   :  { %3548 = vmatprep.mubr.msk.bf16.mxu1 %vm4041_vm0, %v4040_v1 }
  0x1d   :  { %3527 = vmatmul.mubr.msk.bf16.gmra.mxu0 %vm91_vm1, %v3769_v12 }
  0x1e   :  { %3549 = vmatmul.mubr.msk.bf16.gmra.mxu1 %vm91_vm1, %v3769_v12  ;;  %3530 = vmatprep.mubr.msk.bf16.mxu0 %vm4041_vm0, %v4040_v1 }
  0x1f   :  { %3552 = vmatprep.mubr.msk.bf16.mxu1 %vm4041_vm0, %v4040_v1 }
  0x25   :  { %3531 = vmatmul.mubr.msk.bf16.gmra.mxu0 %vm91_vm1, %v3771_v13 }
  0x26   :  { %3553 = vmatmul.mubr.msk.bf16.gmra.mxu1 %vm91_vm1, %v3771_v13  ;;  %3560 = vmatprep.mubr.msk.bf16.mxu0 %vm4041_vm0, %v4040_v1 }
  0x27   :  { %3568 = vmatprep.mubr.msk.bf16.mxu1 %vm4041_vm0, %v4040_v1 }
  0x28   :  { %19 = vsyncpa [#allocation11], 0  ;;  %v3311_v18 = vld [vmem:[%s5187_s7] ss:$0 sm:$0xff]  ;;  %s4044_s5 = smov 64   ;;  %s4045_s19 = smov 96  }
  0x29   :  { %v3299_v24 = vld [vmem:[%s5184_s4] ss:$0 sm:$0xff]  ;;  %vm563_vm3 = vcmask 523520  }
  0x2d   :  { %3561 = vmatmul.mubr.msk.bf16.vlgmr.msra.gmra.mxu0 %vm288_vm2, %v299_v16 }
  0x2e   :  { %3569 = vmatmul.mubr.msk.bf16.vlgmr.msra.gmra.mxu1 %vm288_vm2, %v417_v17  ;;  %3576 = vmatprep.mubr.msk.bf16.mxu0 %vm4041_vm0, %v4040_v1 }
  0x2f   :  { %3584 = vmatprep.mubr.msk.bf16.mxu1 %vm4041_vm0, %v4040_v1 }
  0xc5   :  { %v141_v19 = vpop.f32.mrf.mxu0 }
  0xc6   :  { %v239_v20 = vpop.f32.mrf.mxu1 }
  0xc7   :  { %v4224_v21 = vadd.f32 %v3311_v18, %v239_v20  ;;  %v3516_v22 = vpop.f32.mrf.mxu0  ;;  %v142_v20 = vadd.f32 %v3299_v24, %v141_v19 }
  0xc8   :  { %v3538_v23 = vpop.f32.mrf.mxu1 }
  0xc9   :  { %v144_v25 = vpop.f32.mrf.mxu0 }
  0xca   :  { %v4229_v26 = vadd.f32 %v3299_v24, %v144_v25  ;;  %v242_v27 = vpop.f32.mrf.mxu1 }
  0xcb   :  { %v4231_v28 = vadd.f32 %v3311_v18, %v242_v27  ;;  %v3517_v29 = vpop.f32.mrf.mxu0 }
  0xcc   :  { %v3539_v30 = vpop.f32.mrf.mxu1 }
  0xcd   :  { %v149_v31 = vpop.f32.mrf.mxu0 }
  0xce   :  { %v4233_v32 = vadd.f32 %v3299_v24, %v149_v31  ;;  %v247_v33 = vpop.f32.mrf.mxu1 }
  0xcf   :  { %v4235_v34 = vadd.f32 %v3311_v18, %v247_v33  ;;  %v3520_v35 = vpop.f32.mrf.mxu0 }
  0xd0   :  { %v3542_v36 = vpop.f32.mrf.mxu1 }
  0xd1   :  { %v152_v37 = vpop.f32.mrf.mxu0 }
  0xd2   :  { %v4237_v38 = vadd.f32 %v3299_v24, %v152_v37  ;;  %v250_v39 = vpop.f32.mrf.mxu1 }
  0xd3   :  { %v4239_v40 = vadd.f32 %v3311_v18, %v250_v39  ;;  %v3521_v41 = vpop.f32.mrf.mxu0 }
  0xd4   :  { %v3543_v42 = vpop.f32.mrf.mxu1  ;;  %v4043_v41 = vmov 0  }
  0xd5   :  { %v157_v43 = vpop.f32.mrf.mxu0  ;;  %3759 = vset.pattern.permute.xlu0 %v4043_v41  ;;  %3760 = vset.pattern.permute.xlu1 %v4043_v41  ;;  %v3775_v41 = vld [vmem:[%s5186_s6] sm:$0xff]  }
  0xd6   :  { %v4241_v44 = vadd.f32 %v3299_v24, %v157_v43  ;;  %v255_v45 = vpop.f32.mrf.mxu1 }
  0xd7   :  { %v4243_v46 = vadd.f32 %v3311_v18, %v255_v45  ;;  %v3524_v47 = vpop.f32.mrf.mxu0 }
  0xd8   :  { %v3546_v48 = vpop.f32.mrf.mxu1 }
  0xd9   :  { %v160_v49 = vpop.f32.mrf.mxu0 }
  0xda   :  { %v4245_v50 = vadd.f32 %v3299_v24, %v160_v49  ;;  %v258_v51 = vpop.f32.mrf.mxu1 }
  0xdb   :  { %v4247_v52 = vadd.f32 %v3311_v18, %v258_v51  ;;  %v3525_v53 = vpop.f32.mrf.mxu0 }
  0xdc   :  { %v3547_v54 = vpop.f32.mrf.mxu1  ;;  %v293_v53 = vld [vmem:[%s5181_s1] sm:$0xff] }
  0xdd   :  { %v165_v55 = vpop.f32.mrf.mxu0 }
  0xde   :  { %v4249_v56 = vadd.f32 %v3299_v24, %v165_v55  ;;  %v263_v57 = vpop.f32.mrf.mxu1  ;;  %v394_v55 = vsub.f32 1.0, %v293_v53 }
  0xdf   :  { %v4251_v58 = vadd.f32 %v3311_v18, %v263_v57  ;;  %v3528_v59 = vpop.f32.mrf.mxu0 }
  0xe0   :  { %v3550_v60 = vpop.f32.mrf.mxu1 }
  0xe1   :  { %v168_v61 = vpop.f32.mrf.mxu0  ;;  %v3318_v60 = vld [vmem:[%s5181_s1 + $0x48] sm:$0xff] }
  0xe2   :  { %v4253_v62 = vadd.f32 %v3299_v24, %v168_v61  ;;  %v266_v63 = vpop.f32.mrf.mxu1 }
  0xe3   :  { %v4255_v0 = vadd.f32 %v3311_v18, %v266_v63  ;;  %v3529_v2 = vpop.f32.mrf.mxu0  ;;  %v512_v63 = vsub.f32 1.0, %v3318_v60 }
  0xe4   :  { %v3551_v3 = vpop.f32.mrf.mxu1  ;;  %v369_v2 = vpop.permute.xlu1 %368 }
  0xe5   :  { %v173_v4 = vpop.f32.mrf.mxu0 }
  0xe6   :  { %v4257_v5 = vadd.f32 %v3299_v24, %v173_v4  ;;  %v271_v6 = vpop.f32.mrf.mxu1 }
  0xe7   :  { %v4259_v7 = vadd.f32 %v3311_v18, %v271_v6  ;;  %v3532_v8 = vpop.f32.mrf.mxu0 }
  0xe8   :  { %v3554_v11 = vpop.f32.mrf.mxu1  ;;  %v487_v4 = vpop.permute.xlu1 %486 }
  0xe9   :  { %v176_v12 = vpop.f32.mrf.mxu0 }
  0xea   :  { %v4261_v13 = vadd.f32 %v3299_v24, %v176_v12  ;;  %v274_v16 = vpop.f32.mrf.mxu1 }
  0xeb   :  { %v3533_v17 = vpop.f32.mrf.mxu0  ;;  %v275_v25 = vadd.f32 %v3311_v18, %v274_v16 }
  0xec   :  { %v3555_v22 = vpop.f32.mrf.mxu1 }
  0xed   :  { %v353_v23 = vpop.f32.mrf.mxu0 }
  0xee   :  { %v359_v27 = vadd.f32 %v353_v23, %v142_v20  ;;  %v471_v29 = vpop.f32.mrf.mxu1 }
  0xef   :  { %v3562_v30 = vpop.f32.mrf.mxu0  ;;  %v477_v31 = vadd.f32 %v471_v29, %v275_v25  ;;  %v3772_v29 = vld [vmem:[%s5183_s3 + $0x8] sm:$0xff]  }
  0xf0   :  { %3816 = vtanh.f32 %v359_v27  ;;  %v3570_v33 = vpop.f32.mrf.mxu1  ;;  %v3322_v18 = vmul.f32 -1.442695, %v359_v27  ;;  %3573 = vmatpush3.bf16.msra.mxu0 %v3772_v29 }
  0xf1   :  { %v356_v35 = vpop.f32.mrf.mxu0  ;;  %3818 = vtanh.f32 %v477_v31  ;;  %v3326_v24 = vmul.f32 -1.442695, %v477_v31  ;;  %3574 = vmatprep.subr.bf16.mxu0 %v4040_v1  ;;  %v3774_v33 = vld [vmem:[%s5186_s6 + $0x8] sm:$0xff]  }
  0xf2   :  { %v474_v36 = vpop.f32.mrf.mxu1  ;;  %3820 = vpow2.f32 %v3322_v18  ;;  %3581 = vmatpush3.bf16.msra.mxu1 %v3774_v33 }
  0xf3   :  { %v3563_v37 = vpop.f32.mrf.mxu0  ;;  %3822 = vpow2.f32 %v3326_v24  ;;  %3582 = vmatprep.subr.bf16.mxu1 %v4040_v1 }
  0xf4   :  { %v3571_v39 = vpop.f32.mrf.mxu1 }
  0xf6   :  { %3583 = vmatpush3.bf16.msra.mxu1 %v3775_v41 }
  0xf7   :  { %3596 = vmatprep.subr.bf16.mxu1 %v4040_v1 }
  0xfd   :  { %v3817_v42 = vpop.eup %3816 }
  0xfe   :  { %373 = vrot.lane.b32.xlu0 %v3817_v42, %s4042_s17  ;;  %v3819_v19 = vpop.eup %3818 }
  0xff   :  { %v3821_v43 = vpop.eup %3820 }
 0x100   :  { %v363_v45 = vadd.f32 1.0, %v3821_v43  ;;  %v3823_v47 = vpop.eup %3822 }
 0x101   :  { %v481_v48 = vadd.f32 1.0, %v3823_v47 }
 0x102   :  { %491 = vrot.lane.b32.xlu0 %v3819_v19, %s4042_s17  ;;  %3824 = vrcp.f32 %v363_v45 }
 0x103   :  { %3826 = vrcp.f32 %v481_v48 }
 0x10f   :  { %v3825_v49 = vpop.eup %3824 }
 0x110   :  { %v3827_v57 = vpop.eup %3826  ;;  %v371_v3 = vmul.f32 %v3825_v49, %v369_v2 }
 0x111   :  { %v489_v11 = vmul.f32 %v3827_v57, %v487_v4 }
 0x170   :  { %v374_v51 = vpop.permute.xlu0 %373 }
 0x171   :  { %v376_v54 = vmul.f32 %v3825_v49, %v374_v51 }
 0x173   :  { %378 = vrot.lane.b32.xlu0 %v376_v54, %s4042_s17 }
 0x174   :  { %v492_v59 = vpop.permute.xlu0 %491 }
 0x175   :  { %v494_v61 = vmul.f32 %v3827_v57, %v492_v59 }
 0x177   :  { %496 = vrot.lane.b32.xlu1 %v494_v61, %s4042_s17  ;;  %397 = vperm.xlu0 %3759, %v394_v55  }
 0x17b   :  { %515 = vperm.xlu1 %3760, %v512_v63   ;;  %508 = vperm.xlu0 %3759, %v3318_v60  }
 0x17f   :  { %390 = vperm.xlu1 %3760, %v293_v53  }
 0x1e5   :  { %v379_v6 = vpop.permute.xlu0 %378 }
 0x1e6   :  { %v381_v8 = vadd.f32 %v379_v6, %v371_v3 }
 0x1e8   :  { %3828 = vtanh.f32 %v381_v8 }
 0x1e9   :  { %v497_v12 = vpop.permute.xlu1 %496 }
 0x1ea   :  { %v499_v16 = vadd.f32 %v497_v12, %v489_v11 }
 0x1ec   :  { %3830 = vtanh.f32 %v499_v16 }
 0x1f2   :  { %v398_v20 = vpop.permute.xlu0 %397 }
 0x1f3   :  { %v400_v22 = vmul.f32 %v398_v20, %v4201_v14  ;;  %v407_v43 = vmul.f32 %v398_v20, %v4164_v9 }
 0x1f5   :  { %v3829_v17 = vpop.eup %3828 }
 0x1f6   :  { %384 = vrot.lane.b32.xlu1 %v3829_v17, %s4042_s17  ;;  %v516_v25 = vpop.permute.xlu1 %515  ;;  %v4285_v14 = vpop.permute.xlu0 %508 }
 0x1f7   :  { %v518_v27 = vmul.f32 %v516_v25, %v4204_v15  ;;  %v3773_v15 = vld [vmem:[%s5183_s3] sm:$0xff]   ;;  %v525_v47 = vmul.f32 %v516_v25, %v4169_v10  ;;  %v524_v54 = vmul.f32 %v4285_v14, %v499_v16 }
 0x1f8   :  { %3575 = vmatpush3.bf16.msra.mxu0 %v3773_v15 }
 0x1f9   :  { %v3831_v23 = vpop.eup %3830  ;;  %3588 = vmatprep.subr.bf16.mxu0 %v4040_v1 }
 0x1fa   :  { %502 = vrot.lane.b32.xlu0 %v3831_v23, %s4042_s17  ;;  %402 = vrot.lane.b32.xlu1 %v400_v22, %s4044_s5  ;;  %v4282_v30 = vpop.permute.xlu1 %390 }
 0x1fe   :  { %520 = vrot.lane.b32.xlu0 %v518_v27, %s4044_s5 }
 0x268   :  { %v385_v31 = vpop.permute.xlu1 %384 }
 0x269   :  { %v387_v35 = vmul.f32 %v3825_v49, %v385_v31  ;;  %v406_v49 = vmul.f32 %v4282_v30, %v381_v8 }
 0x26b   :  { %v393_v36 = vmul.f32 %v4282_v30, %v387_v35 }
 0x26c   :  { %v503_v37 = vpop.permute.xlu0 %502  ;;  %v403_v39 = vpop.permute.xlu1 %402 }
 0x26d   :  { %v505_v42 = vmul.f32 %v3827_v57, %v503_v37  ;;  %v4299_v19 = vadd.f32 %v403_v39, %v393_v36  ;;  %v3327_v39 = vld [vmem:[%s5181_s1 + $0x8] sm:$0xff] }
 0x26f   :  { %532 = vrot.lane.b32.xlu1 %v4299_v19, %s4044_s5  ;;  %v511_v18 = vmul.f32 %v4285_v14, %v505_v42  ;;  %v668_v42 = vsub.f32 1.0, %v3327_v39 }
 0x270   :  { %v521_v24 = vpop.permute.xlu0 %520 }
 0x271   :  { %v4306_v45 = vadd.f32 %v521_v24, %v511_v18 }
 0x273   :  { %542 = vrot.lane.b32.xlu0 %v4306_v45, %s4044_s5  ;;  %409 = vrot.lane.b32.xlu1 %v407_v43, %s4042_s17  ;;  %v3328_v43 = vld [vmem:[%s5181_s1 + $0x40] sm:$0xff] }
 0x277   :  { %527 = vrot.lane.b32.xlu0 %v525_v47, %s4042_s17 }
 0x2e1   :  { %v533_v48 = vpop.permute.xlu1 %532 }
 0x2e2   :  { %535 = vst.msk [vmem:[#allocation4] sm:$0xff] %vm288_vm2, %v533_v48  ;;  %v786_v48 = vsub.f32 1.0, %v3328_v43 }
 0x2e5   :  { %v543_v51 = vpop.permute.xlu0 %542  ;;  %v410_v53 = vpop.permute.xlu1 %409 }
 0x2e6   :  { %545 = vst.msk [vmem:[#allocation6] sm:$0xff] %vm288_vm2, %v543_v51  ;;  %v412_v9 = vadd.f32 %v410_v53, %v406_v49 }
 0x2e8   :  { %537 = vrot.lane.b32.xlu1 %v412_v9, %s4045_s19 }
 0x2e9   :  { %v528_v55 = vpop.permute.xlu0 %527  ;;  %v4318_v57 = vld [vmem:[#allocation4] sm:$0xff] }
 0x2ea   :  { %v530_v10 = vadd.f32 %v528_v55, %v524_v54  ;;  %v573_v59 = vpack.c.bf16 %v4318_v57, %v4318_v57 }
 0x2ec   :  { %547 = vrot.lane.b32.xlu0 %v530_v10, %s4045_s19  ;;  %3577 = vmatmul.mubr.msk.bf16.vlgmr.msra.gmra.mxu0 %vm288_vm2, %v573_v59 }
 0x2ed   :  { %v4324_v60 = vld [vmem:[#allocation6] sm:$0xff]  ;;  %3592 = vmatprep.mubr.msk.bf16.mxu0 %vm4041_vm0, %v4040_v1 }
 0x2ee   :  { %v691_v61 = vpack.c.bf16 %v4324_v60, %v4324_v60 }
 0x2f0   :  { %3585 = vmatmul.mubr.msk.bf16.vlgmr.msra.gmra.mxu1 %vm288_vm2, %v691_v61 }
 0x2f1   :  { %3600 = vmatprep.mubr.msk.bf16.mxu1 %vm4041_vm0, %v4040_v1 }
 0x35a   :  { %v538_v63 = vpop.permute.xlu1 %537 }
 0x35b   :  { %540 = vst.msk [vmem:[#allocation5] sm:$0xff] %vm288_vm2, %v538_v63 }
 0x35e   :  { %v548_v2 = vpop.permute.xlu0 %547 }
 0x35f   :  { %550 = vst.msk [vmem:[#allocation7] sm:$0xff] %vm288_vm2, %v548_v2 }
 0x362   :  { %v4338_v27 = vld [vmem:[#allocation5] sm:$0xff] }
 0x3ac   :  { %v627_v3 = vpop.f32.mrf.mxu0 }
 0x3ad   :  { %v633_v4 = vadd.f32 %v627_v3, %v4229_v26  ;;  %v4343_v26 = vld [vmem:[#allocation7] sm:$0xff] }
 0x3ae   :  { %v3578_v6 = vpop.f32.mrf.mxu0 }
 0x3af   :  { %3832 = vtanh.f32 %v633_v4 }
 0x3b0   :  { %v630_v8 = vpop.f32.mrf.mxu0  ;;  %v745_v11 = vpop.f32.mrf.mxu1 }
 0x3b1   :  { %v751_v12 = vadd.f32 %v745_v11, %v4259_v7  ;;  %v3332_v7 = vmul.f32 -1.442695, %v633_v4  ;;  %v3776_v11 = vld [vmem:[%s5183_s3 + $0x8] sm:$0xff]  }
 0x3b2   :  { %v3579_v16 = vpop.f32.mrf.mxu0  ;;  %v3586_v17 = vpop.f32.mrf.mxu1  ;;  %3589 = vmatpush3.bf16.msra.mxu0 %v3776_v11 }
 0x3b3   :  { %3834 = vtanh.f32 %v751_v12  ;;  %v3336_v29 = vmul.f32 -1.442695, %v751_v12  ;;  %3590 = vmatprep.subr.bf16.mxu0 %v4040_v1  ;;  %v3777_v16 = vld [vmem:[%s5186_s6 + $0x8] sm:$0xff]  }
 0x3b4   :  { %v748_v20 = vpop.f32.mrf.mxu1  ;;  %3836 = vpow2.f32 %v3332_v7  ;;  %3597 = vmatpush3.bf16.msra.mxu1 %v3777_v16 }
 0x3b5   :  { %3838 = vpow2.f32 %v3336_v29  ;;  %3598 = vmatprep.subr.bf16.mxu1 %v4040_v1 }
 0x3b6   :  { %v3587_v22 = vpop.f32.mrf.mxu1 }
 0x3bc   :  { %v3833_v23 = vpop.eup %3832 }
 0x3bd   :  { %647 = vrot.lane.b32.xlu1 %v3833_v23, %s4042_s17 }
 0x3c0   :  { %v3835_v25 = vpop.eup %3834 }
 0x3c1   :  { %765 = vrot.lane.b32.xlu0 %v3835_v25, %s4042_s17  ;;  %642 = vrot.lane.b32.xlu1 %v4338_v27, %s4042_s17  ;;  %v3837_v31 = vpop.eup %3836  ;;  %v3779_v25 = vld [vmem:[%s5186_s6] sm:$0xff]  }
 0x3c2   :  { %v637_v15 = vadd.f32 1.0, %v3837_v31  ;;  %v3839_v33 = vpop.eup %3838  ;;  %3599 = vmatpush3.bf16.msra.mxu1 %v3779_v25 }
 0x3c3   :  { %v755_v35 = vadd.f32 1.0, %v3839_v33  ;;  %3612 = vmatprep.subr.bf16.mxu1 %v4040_v1 }
 0x3c4   :  { %3840 = vrcp.f32 %v637_v15 }
 0x3c5   :  { %760 = vrot.lane.b32.xlu0 %v4343_v26, %s4042_s17  ;;  %3842 = vrcp.f32 %v755_v35 }
 0x3d1   :  { %v3841_v36 = vpop.eup %3840 }
 0x3d2   :  { %v3843_v18 = vpop.eup %3842 }
 0x42f   :  { %v648_v37 = vpop.permute.xlu1 %647 }
 0x430   :  { %v650_v41 = vmul.f32 %v3841_v36, %v648_v37 }
 0x432   :  { %652 = vrot.lane.b32.xlu1 %v650_v41, %s4042_s17 }
 0x433   :  { %v766_v24 = vpop.permute.xlu0 %765  ;;  %v643_v49 = vpop.permute.xlu1 %642 }
 0x434   :  { %v768_v47 = vmul.f32 %v3843_v18, %v766_v24  ;;  %v645_v51 = vmul.f32 %v3841_v36, %v643_v49 }
 0x436   :  { %770 = vrot.lane.b32.xlu0 %v768_v47, %s4042_s17  ;;  %671 = vperm.xlu1 %3760, %v668_v42  }
 0x437   :  { %v761_v53 = vpop.permute.xlu0 %760 }
 0x438   :  { %v763_v55 = vmul.f32 %v3843_v18, %v761_v53 }
 0x43a   :  { %789 = vperm.xlu0 %3759, %v786_v48   ;;  %664 = vperm.xlu1 %3760, %v3327_v39  }
 0x43e   :  { %782 = vperm.xlu0 %3759, %v3328_v43  }
 0x4a4   :  { %v653_v9 = vpop.permute.xlu1 %652 }
 0x4a5   :  { %v655_v54 = vadd.f32 %v653_v9, %v645_v51 }
 0x4a7   :  { %3844 = vtanh.f32 %v655_v54 }
 0x4a8   :  { %v771_v10 = vpop.permute.xlu0 %770 }
 0x4a9   :  { %v773_v59 = vadd.f32 %v771_v10, %v763_v55 }
 0x4ab   :  { %3846 = vtanh.f32 %v773_v59 }
 0x4b1   :  { %v672_v63 = vpop.permute.xlu1 %671 }
 0x4b2   :  { %v674_v2 = vmul.f32 %v672_v63, %v4318_v57  ;;  %v681_v33 = vmul.f32 %v672_v63, %v4338_v27 }
 0x4b4   :  { %v3845_v61 = vpop.eup %3844 }
 0x4b5   :  { %658 = vrot.lane.b32.xlu1 %v3845_v61, %s4042_s17  ;;  %v790_v4 = vpop.permute.xlu0 %789  ;;  %v4361_v8 = vpop.permute.xlu1 %664 }
 0x4b6   :  { %v792_v6 = vmul.f32 %v790_v4, %v4324_v60  ;;  %v3778_v60 = vld [vmem:[%s5183_s3] sm:$0xff]   ;;  %v680_v39 = vmul.f32 %v4361_v8, %v655_v54 }
 0x4b7   :  { %3591 = vmatpush3.bf16.msra.mxu0 %v3778_v60 }
 0x4b8   :  { %v3847_v3 = vpop.eup %3846  ;;  %3604 = vmatprep.subr.bf16.mxu0 %v4040_v1 }
 0x4b9   :  { %776 = vrot.lane.b32.xlu0 %v3847_v3, %s4042_s17  ;;  %676 = vrot.lane.b32.xlu1 %v674_v2, %s4044_s5  ;;  %v4367_v57 = vpop.permute.xlu0 %782 }
 0x4bd   :  { %794 = vrot.lane.b32.xlu0 %v792_v6, %s4044_s5 }
 0x527   :  { %v659_v12 = vpop.permute.xlu1 %658 }
 0x528   :  { %v661_v17 = vmul.f32 %v3841_v36, %v659_v12  ;;  %v799_v36 = vmul.f32 %v790_v4, %v4343_v26 }
 0x52a   :  { %v667_v20 = vmul.f32 %v4361_v8, %v661_v17 }
 0x52b   :  { %v777_v22 = vpop.permute.xlu0 %776  ;;  %v677_v23 = vpop.permute.xlu1 %676 }
 0x52c   :  { %v779_v7 = vmul.f32 %v3843_v18, %v777_v22  ;;  %v4381_v29 = vadd.f32 %v677_v23, %v667_v20  ;;  %v798_v18 = vmul.f32 %v4367_v57, %v773_v59 }
 0x52e   :  { %806 = vrot.lane.b32.xlu1 %v4381_v29, %s4044_s5  ;;  %v785_v31 = vmul.f32 %v4367_v57, %v779_v7  ;;  %v3337_v7 = vld [vmem:[%s5181_s1 + $0x10] sm:$0xff] }
 0x52f   :  { %v795_v15 = vpop.permute.xlu0 %794 }
 0x530   :  { %v4388_v35 = vadd.f32 %v795_v15, %v785_v31  ;;  %v942_v15 = vsub.f32 1.0, %v3337_v7 }
 0x532   :  { %816 = vrot.lane.b32.xlu0 %v4388_v35, %s4044_s5  ;;  %683 = vrot.lane.b32.xlu1 %v681_v33, %s4042_s17 }
 0x536   :  { %801 = vrot.lane.b32.xlu0 %v799_v36, %s4042_s17 }
 0x5a0   :  { %v807_v37 = vpop.permute.xlu1 %806 }
 0x5a1   :  { %809 = vst.msk [vmem:[#allocation4] sm:$0xff] %vm288_vm2, %v807_v37  ;;  %v3338_v37 = vld [vmem:[%s5181_s1 + $0x38] sm:$0xff] }
 0x5a4   :  { %v817_v41 = vpop.permute.xlu0 %816  ;;  %v684_v42 = vpop.permute.xlu1 %683 }
 0x5a5   :  { %819 = vst.msk [vmem:[#allocation6] sm:$0xff] %vm288_vm2, %v817_v41  ;;  %v686_v27 = vadd.f32 %v684_v42, %v680_v39  ;;  %v1060_v41 = vsub.f32 1.0, %v3338_v37 }
 0x5a7   :  { %811 = vrot.lane.b32.xlu1 %v686_v27, %s4045_s19 }
 0x5a8   :  { %v802_v24 = vpop.permute.xlu0 %801  ;;  %v4400_v43 = vld [vmem:[#allocation4] sm:$0xff] }
 0x5a9   :  { %v804_v26 = vadd.f32 %v802_v24, %v798_v18  ;;  %v847_v47 = vpack.c.bf16 %v4400_v43, %v4400_v43 }
 0x5ab   :  { %821 = vrot.lane.b32.xlu0 %v804_v26, %s4045_s19  ;;  %3593 = vmatmul.mubr.msk.bf16.vlgmr.msra.gmra.mxu0 %vm288_vm2, %v847_v47 }
 0x5ac   :  { %v4406_v48 = vld [vmem:[#allocation6] sm:$0xff]  ;;  %3608 = vmatprep.mubr.msk.bf16.mxu0 %vm4041_vm0, %v4040_v1 }
 0x5ad   :  { %v965_v49 = vpack.c.bf16 %v4406_v48, %v4406_v48 }
 0x5af   :  { %3601 = vmatmul.mubr.msk.bf16.vlgmr.msra.gmra.mxu1 %vm288_vm2, %v965_v49 }
 0x5b0   :  { %3616 = vmatprep.mubr.msk.bf16.mxu1 %vm4041_vm0, %v4040_v1 }
 0x619   :  { %v812_v51 = vpop.permute.xlu1 %811 }
 0x61a   :  { %814 = vst.msk [vmem:[#allocation5] sm:$0xff] %vm288_vm2, %v812_v51 }
 0x61d   :  { %v822_v53 = vpop.permute.xlu0 %821 }
 0x61e   :  { %824 = vst.msk [vmem:[#allocation7] sm:$0xff] %vm288_vm2, %v822_v53 }
 0x621   :  { %v4420_v12 = vld [vmem:[#allocation5] sm:$0xff] }
 0x66b   :  { %v901_v9 = vpop.f32.mrf.mxu0 }
 0x66c   :  { %v907_v54 = vadd.f32 %v901_v9, %v4233_v32  ;;  %v4425_v32 = vld [vmem:[#allocation7] sm:$0xff] }
 0x66d   :  { %v3594_v55 = vpop.f32.mrf.mxu0 }
 0x66e   :  { %3848 = vtanh.f32 %v907_v54 }
 0x66f   :  { %v904_v10 = vpop.f32.mrf.mxu0  ;;  %v1019_v59 = vpop.f32.mrf.mxu1 }
 0x670   :  { %v1025_v61 = vadd.f32 %v1019_v59, %v4255_v0  ;;  %v3342_v0 = vmul.f32 -1.442695, %v907_v54 }
 0x671   :  { %v3595_v63 = vpop.f32.mrf.mxu0  ;;  %v3602_v2 = vpop.f32.mrf.mxu1 }
 0x672   :  { %3850 = vtanh.f32 %v1025_v61  ;;  %v3346_v16 = vmul.f32 -1.442695, %v1025_v61  ;;  %v3780_v63 = vld [vmem:[%s5183_s3 + $0x8] sm:$0xff]  }
 0x673   :  { %v1022_v3 = vpop.f32.mrf.mxu1  ;;  %3852 = vpow2.f32 %v3342_v0  ;;  %3605 = vmatpush3.bf16.msra.mxu0 %v3780_v63 }
 0x674   :  { %3854 = vpow2.f32 %v3346_v16  ;;  %3606 = vmatprep.subr.bf16.mxu0 %v4040_v1  ;;  %v3781_v3 = vld [vmem:[%s5186_s6 + $0x8] sm:$0xff]   ;;  %v3783_v16 = vld [vmem:[%s5186_s6] sm:$0xff]  }
 0x675   :  { %v3603_v4 = vpop.f32.mrf.mxu1  ;;  %3613 = vmatpush3.bf16.msra.mxu1 %v3781_v3 }
 0x676   :  { %3614 = vmatprep.subr.bf16.mxu1 %v4040_v1 }
 0x679   :  { %3615 = vmatpush3.bf16.msra.mxu1 %v3783_v16 }
 0x67a   :  { %3628 = vmatprep.subr.bf16.mxu1 %v4040_v1 }
 0x67b   :  { %v3849_v6 = vpop.eup %3848 }
 0x67c   :  { %921 = vrot.lane.b32.xlu1 %v3849_v6, %s4042_s17 }
 0x67f   :  { %v3851_v11 = vpop.eup %3850 }
 0x680   :  { %1039 = vrot.lane.b32.xlu0 %v3851_v11, %s4042_s17  ;;  %916 = vrot.lane.b32.xlu1 %v4420_v12, %s4042_s17  ;;  %v3853_v60 = vpop.eup %3852 }
 0x681   :  { %v911_v17 = vadd.f32 1.0, %v3853_v60  ;;  %v3855_v20 = vpop.eup %3854 }
 0x682   :  { %v1029_v22 = vadd.f32 1.0, %v3855_v20 }
 0x683   :  { %3856 = vrcp.f32 %v911_v17 }
 0x684   :  { %1034 = vrot.lane.b32.xlu0 %v4425_v32, %s4042_s17  ;;  %3858 = vrcp.f32 %v1029_v22 }
 0x690   :  { %v3857_v23 = vpop.eup %3856 }
 0x691   :  { %v3859_v33 = vpop.eup %3858 }
 0x6ee   :  { %v922_v25 = vpop.permute.xlu1 %921 }
 0x6ef   :  { %v924_v31 = vmul.f32 %v3857_v23, %v922_v25 }
 0x6f1   :  { %926 = vrot.lane.b32.xlu1 %v924_v31, %s4042_s17 }
 0x6f2   :  { %v1040_v36 = vpop.permute.xlu0 %1039  ;;  %v917_v42 = vpop.permute.xlu1 %916 }
 0x6f3   :  { %v1042_v39 = vmul.f32 %v3859_v33, %v1040_v36  ;;  %v919_v27 = vmul.f32 %v3857_v23, %v917_v42 }
 0x6f5   :  { %1044 = vrot.lane.b32.xlu0 %v1042_v39, %s4042_s17  ;;  %945 = vperm.xlu1 %3760, %v942_v15  }
 0x6f6   :  { %v1035_v18 = vpop.permute.xlu0 %1034 }
 0x6f7   :  { %v1037_v47 = vmul.f32 %v3859_v33, %v1035_v18 }
 0x6f9   :  { %1063 = vperm.xlu0 %3759, %v1060_v41   ;;  %938 = vperm.xlu1 %3760, %v3337_v7  }
 0x6fd   :  { %1056 = vperm.xlu0 %3759, %v3338_v37  }
 0x763   :  { %v927_v24 = vpop.permute.xlu1 %926 }
 0x764   :  { %v929_v26 = vadd.f32 %v927_v24, %v919_v27 }
 0x766   :  { %3860 = vtanh.f32 %v929_v26 }
 0x767   :  { %v1045_v49 = vpop.permute.xlu0 %1044 }
 0x768   :  { %v1047_v51 = vadd.f32 %v1045_v49, %v1037_v47 }
 0x76a   :  { %3862 = vtanh.f32 %v1047_v51 }
 0x770   :  { %v946_v9 = vpop.permute.xlu1 %945 }
 0x771   :  { %v948_v54 = vmul.f32 %v946_v9, %v4400_v43 }
 0x773   :  { %v3861_v53 = vpop.eup %3860 }
 0x774   :  { %932 = vrot.lane.b32.xlu1 %v3861_v53, %s4042_s17  ;;  %v1064_v10 = vpop.permute.xlu0 %1063  ;;  %v4443_v61 = vpop.permute.xlu1 %938 }
 0x775   :  { %v1066_v59 = vmul.f32 %v1064_v10, %v4406_v48  ;;  %v3782_v48 = vld [vmem:[%s5183_s3] sm:$0xff]   ;;  %v1073_v7 = vmul.f32 %v1064_v10, %v4425_v32  ;;  %v954_v15 = vmul.f32 %v4443_v61, %v929_v26 }
 0x776   :  { %3607 = vmatpush3.bf16.msra.mxu0 %v3782_v48 }
 0x777   :  { %v3863_v55 = vpop.eup %3862  ;;  %3620 = vmatprep.subr.bf16.mxu0 %v4040_v1 }
 0x778   :  { %1050 = vrot.lane.b32.xlu0 %v3863_v55, %s4042_s17  ;;  %950 = vrot.lane.b32.xlu1 %v948_v54, %s4044_s5  ;;  %v4449_v43 = vpop.permute.xlu0 %1056 }
 0x779   :  { %v1072_v37 = vmul.f32 %v4449_v43, %v1047_v51 }
 0x77c   :  { %1068 = vrot.lane.b32.xlu0 %v1066_v59, %s4044_s5 }
 0x7e6   :  { %v933_v2 = vpop.permute.xlu1 %932 }
 0x7e7   :  { %v935_v4 = vmul.f32 %v3857_v23, %v933_v2  ;;  %v955_v23 = vmul.f32 %v946_v9, %v4420_v12 }
 0x7e9   :  { %v941_v6 = vmul.f32 %v4443_v61, %v935_v4 }
 0x7ea   :  { %v1051_v11 = vpop.permute.xlu0 %1050  ;;  %v951_v0 = vpop.permute.xlu1 %950 }
 0x7eb   :  { %v1053_v60 = vmul.f32 %v3859_v33, %v1051_v11  ;;  %v4463_v17 = vadd.f32 %v951_v0, %v941_v6 }
 0x7ed   :  { %1080 = vrot.lane.b32.xlu1 %v4463_v17, %s4044_s5  ;;  %v1059_v20 = vmul.f32 %v4449_v43, %v1053_v60 }
 0x7ee   :  { %v1069_v22 = vpop.permute.xlu0 %1068 }
 0x7ef   :  { %v4470_v25 = vadd.f32 %v1069_v22, %v1059_v20  ;;  %v4514_v22 = vld [vmem:[%s5181_s1 + $0x18] sm:$0xff] }
 0x7f1   :  { %1090 = vrot.lane.b32.xlu0 %v4470_v25, %s4044_s5  ;;  %957 = vrot.lane.b32.xlu1 %v955_v23, %s4042_s17 }
 0x7f5   :  { %1075 = vrot.lane.b32.xlu0 %v1073_v7, %s4042_s17  ;;  %v1216_v7 = vsub.f32 1.0, %v4514_v22 }
 0x85f   :  { %v1081_v31 = vpop.permute.xlu1 %1080 }
 0x860   :  { %1083 = vst.msk [vmem:[#allocation4] sm:$0xff] %vm288_vm2, %v1081_v31 }
 0x863   :  { %v1091_v33 = vpop.permute.xlu0 %1090  ;;  %v958_v36 = vpop.permute.xlu1 %957 }
 0x864   :  { %1093 = vst.msk [vmem:[#allocation6] sm:$0xff] %vm288_vm2, %v1091_v33  ;;  %v960_v12 = vadd.f32 %v958_v36, %v954_v15  ;;  %v4521_v33 = vld [vmem:[%s5181_s1 + $0x30] sm:$0xff] }
 0x866   :  { %1085 = vrot.lane.b32.xlu1 %v960_v12, %s4045_s19  ;;  %v1334_v12 = vsub.f32 1.0, %v4521_v33 }
 0x867   :  { %v1076_v39 = vpop.permute.xlu0 %1075  ;;  %v4482_v41 = vld [vmem:[#allocation4] sm:$0xff] }
 0x868   :  { %v1078_v32 = vadd.f32 %v1076_v39, %v1072_v37  ;;  %v1121_v42 = vpack.c.bf16 %v4482_v41, %v4482_v41 }
 0x86a   :  { %1095 = vrot.lane.b32.xlu0 %v1078_v32, %s4045_s19  ;;  %3609 = vmatmul.mubr.msk.bf16.vlgmr.msra.gmra.mxu0 %vm288_vm2, %v1121_v42 }
 0x86b   :  { %v4488_v27 = vld [vmem:[#allocation6] sm:$0xff]  ;;  %3624 = vmatprep.mubr.msk.bf16.mxu0 %vm4041_vm0, %v4040_v1 }
 0x86c   :  { %v1239_v18 = vpack.c.bf16 %v4488_v27, %v4488_v27 }
 0x86e   :  { %3617 = vmatmul.mubr.msk.bf16.vlgmr.msra.gmra.mxu1 %vm288_vm2, %v1239_v18 }
 0x86f   :  { %3632 = vmatprep.mubr.msk.bf16.mxu1 %vm4041_vm0, %v4040_v1 }
 0x8d8   :  { %v1086_v24 = vpop.permute.xlu1 %1085 }
 0x8d9   :  { %1088 = vst.msk [vmem:[#allocation5] sm:$0xff] %vm288_vm2, %v1086_v24 }
 0x8dc   :  { %v1096_v26 = vpop.permute.xlu0 %1095 }
 0x8dd   :  { %1098 = vst.msk [vmem:[#allocation7] sm:$0xff] %vm288_vm2, %v1096_v26 }
 0x8e0   :  { %v4502_v48 = vld [vmem:[#allocation5] sm:$0xff] }
 0x92a   :  { %v1175_v47 = vpop.f32.mrf.mxu0 }
 0x92b   :  { %v1181_v49 = vadd.f32 %v1175_v47, %v4237_v38  ;;  %v4507_v38 = vld [vmem:[#allocation7] sm:$0xff] }
 0x92c   :  { %v3610_v51 = vpop.f32.mrf.mxu0 }
 0x92d   :  { %3864 = vtanh.f32 %v1181_v49 }
 0x92e   :  { %v1178_v53 = vpop.f32.mrf.mxu0  ;;  %v1293_v9 = vpop.f32.mrf.mxu1 }
 0x92f   :  { %v1299_v54 = vadd.f32 %v1293_v9, %v4251_v58  ;;  %v3352_v58 = vmul.f32 -1.442695, %v1181_v49 }
 0x930   :  { %v3611_v55 = vpop.f32.mrf.mxu0  ;;  %v3618_v10 = vpop.f32.mrf.mxu1 }
 0x931   :  { %3866 = vtanh.f32 %v1299_v54  ;;  %v3356_v4 = vmul.f32 -1.442695, %v1299_v54 }
 0x932   :  { %v1296_v59 = vpop.f32.mrf.mxu1  ;;  %3868 = vpow2.f32 %v3352_v58 }
 0x933   :  { %3870 = vpow2.f32 %v3356_v4  ;;  %v3784_v59 = vld [vmem:[%s5183_s3 + $0x8] sm:$0xff]  }
 0x934   :  { %v3619_v63 = vpop.f32.mrf.mxu1  ;;  %3621 = vmatpush3.bf16.msra.mxu0 %v3784_v59 }
 0x935   :  { %3622 = vmatprep.subr.bf16.mxu0 %v4040_v1 }
 0x93a   :  { %v3865_v2 = vpop.eup %3864 }
 0x93b   :  { %1195 = vrot.lane.b32.xlu1 %v3865_v2, %s4042_s17  ;;  %v3785_v2 = vld [vmem:[%s5186_s6 + $0x8] sm:$0xff]  }
 0x93c   :  { %3629 = vmatpush3.bf16.msra.mxu1 %v3785_v2 }
 0x93d   :  { %3630 = vmatprep.subr.bf16.mxu1 %v4040_v1 }
 0x93e   :  { %v3867_v3 = vpop.eup %3866 }
 0x93f   :  { %1313 = vrot.lane.b32.xlu0 %v3867_v3, %s4042_s17  ;;  %1190 = vrot.lane.b32.xlu1 %v4502_v48, %s4042_s17  ;;  %v3869_v6 = vpop.eup %3868 }
 0x940   :  { %v1185_v11 = vadd.f32 1.0, %v3869_v6  ;;  %v3871_v0 = vpop.eup %3870 }
 0x941   :  { %v1303_v16 = vadd.f32 1.0, %v3871_v0 }
 0x942   :  { %3872 = vrcp.f32 %v1185_v11  ;;  %v3787_v11 = vld [vmem:[%s5186_s6] sm:$0xff]  }
 0x943   :  { %1308 = vrot.lane.b32.xlu0 %v4507_v38, %s4042_s17  ;;  %3874 = vrcp.f32 %v1303_v16  ;;  %3631 = vmatpush3.bf16.msra.mxu1 %v3787_v11 }
 0x944   :  { %3644 = vmatprep.subr.bf16.mxu1 %v4040_v1 }
 0x94f   :  { %v3873_v60 = vpop.eup %3872 }
 0x950   :  { %v3875_v31 = vpop.eup %3874 }
 0x9ad   :  { %v1196_v20 = vpop.permute.xlu1 %1195 }
 0x9ae   :  { %v1198_v23 = vmul.f32 %v3873_v60, %v1196_v20 }
 0x9b0   :  { %1200 = vrot.lane.b32.xlu1 %v1198_v23, %s4042_s17 }
 0x9b1   :  { %v1314_v15 = vpop.permute.xlu0 %1313  ;;  %v1191_v37 = vpop.permute.xlu1 %1190 }
 0x9b2   :  { %v1316_v36 = vmul.f32 %v3875_v31, %v1314_v15  ;;  %v1193_v39 = vmul.f32 %v3873_v60, %v1191_v37 }
 0x9b4   :  { %1318 = vrot.lane.b32.xlu0 %v1316_v36, %s4042_s17  ;;  %1219 = vperm.xlu1 %3760, %v1216_v7  }
 0x9b5   :  { %v1309_v32 = vpop.permute.xlu0 %1308 }
 0x9b6   :  { %v1311_v24 = vmul.f32 %v3875_v31, %v1309_v32 }
 0x9b8   :  { %1337 = vperm.xlu0 %3759, %v1334_v12   ;;  %1212 = vperm.xlu1 %3760, %v4514_v22  }
 0x9bc   :  { %1330 = vperm.xlu0 %3759, %v4521_v33  }
 0xa22   :  { %v1201_v42 = vpop.permute.xlu1 %1200 }
 0xa23   :  { %v1203_v18 = vadd.f32 %v1201_v42, %v1193_v39 }
 0xa25   :  { %3876 = vtanh.f32 %v1203_v18 }
 0xa26   :  { %v1319_v26 = vpop.permute.xlu0 %1318 }
 0xa27   :  { %v1321_v47 = vadd.f32 %v1319_v26, %v1311_v24 }
 0xa29   :  { %3878 = vtanh.f32 %v1321_v47 }
 0xa2f   :  { %v1220_v51 = vpop.permute.xlu1 %1219 }
 0xa30   :  { %v1222_v53 = vmul.f32 %v1220_v51, %v4482_v41  ;;  %v1229_v23 = vmul.f32 %v1220_v51, %v4502_v48 }
 0xa32   :  { %v3877_v49 = vpop.eup %3876 }
 0xa33   :  { %1206 = vrot.lane.b32.xlu1 %v3877_v49, %s4042_s17  ;;  %v1338_v54 = vpop.permute.xlu0 %1337  ;;  %v4537_v10 = vpop.permute.xlu1 %1212 }
 0xa34   :  { %v1340_v55 = vmul.f32 %v1338_v54, %v4488_v27  ;;  %v3786_v27 = vld [vmem:[%s5183_s3] sm:$0xff]   ;;  %v1228_v37 = vmul.f32 %v4537_v10, %v1203_v18 }
 0xa35   :  { %3623 = vmatpush3.bf16.msra.mxu0 %v3786_v27 }
 0xa36   :  { %v3879_v9 = vpop.eup %3878  ;;  %3636 = vmatprep.subr.bf16.mxu0 %v4040_v1 }
 0xa37   :  { %1324 = vrot.lane.b32.xlu0 %v3879_v9, %s4042_s17  ;;  %1224 = vrot.lane.b32.xlu1 %v1222_v53, %s4044_s5  ;;  %v4543_v41 = vpop.permute.xlu0 %1330 }
 0xa38   :  { %v1346_v42 = vmul.f32 %v4543_v41, %v1321_v47 }
 0xa3b   :  { %1342 = vrot.lane.b32.xlu0 %v1340_v55, %s4044_s5 }
 0xaa5   :  { %v1207_v63 = vpop.permute.xlu1 %1206 }
 0xaa6   :  { %v1209_v3 = vmul.f32 %v3873_v60, %v1207_v63 }
 0xaa8   :  { %v1215_v58 = vmul.f32 %v4537_v10, %v1209_v3 }
 0xaa9   :  { %v1325_v4 = vpop.permute.xlu0 %1324  ;;  %v1225_v6 = vpop.permute.xlu1 %1224 }
 0xaaa   :  { %v1327_v0 = vmul.f32 %v3875_v31, %v1325_v4  ;;  %v4557_v16 = vadd.f32 %v1225_v6, %v1215_v58  ;;  %v1347_v31 = vmul.f32 %v1338_v54, %v4507_v38 }
 0xaac   :  { %1354 = vrot.lane.b32.xlu1 %v4557_v16, %s4044_s5  ;;  %v1333_v60 = vmul.f32 %v4543_v41, %v1327_v0 }
 0xaad   :  { %v1343_v20 = vpop.permute.xlu0 %1342 }
 0xaae   :  { %v4564_v15 = vadd.f32 %v1343_v20, %v1333_v60 }
 0xab0   :  { %1364 = vrot.lane.b32.xlu0 %v4564_v15, %s4044_s5  ;;  %1231 = vrot.lane.b32.xlu1 %v1229_v23, %s4042_s17 }
 0xab4   :  { %1349 = vrot.lane.b32.xlu0 %v1347_v31, %s4042_s17 }
 0xb1e   :  { %v1355_v36 = vpop.permute.xlu1 %1354 }
 0xb1f   :  { %1357 = vst.msk [vmem:[#allocation4] sm:$0xff] %vm288_vm2, %v1355_v36 }
 0xb22   :  { %v1365_v39 = vpop.permute.xlu0 %1364  ;;  %v1232_v32 = vpop.permute.xlu1 %1231 }
 0xb23   :  { %1367 = vst.msk [vmem:[#allocation6] sm:$0xff] %vm288_vm2, %v1365_v39  ;;  %v1234_v48 = vadd.f32 %v1232_v32, %v1228_v37  ;;  %v4608_v32 = vld [vmem:[%s5181_s1 + $0x20] sm:$0xff] }
 0xb25   :  { %1359 = vrot.lane.b32.xlu1 %v1234_v48, %s4045_s19 }
 0xb26   :  { %v1350_v24 = vpop.permute.xlu0 %1349  ;;  %v4576_v26 = vld [vmem:[#allocation4] sm:$0xff] }
 0xb27   :  { %v1352_v38 = vadd.f32 %v1350_v24, %v1346_v42  ;;  %v1395_v49 = vpack.c.bf16 %v4576_v26, %v4576_v26  ;;  %v1490_v42 = vsub.f32 1.0, %v4608_v32 }
 0xb29   :  { %1369 = vrot.lane.b32.xlu0 %v1352_v38, %s4045_s19  ;;  %3625 = vmatmul.mubr.msk.bf16.vlgmr.msra.gmra.mxu0 %vm288_vm2, %v1395_v49  ;;  %v4615_v49 = vld [vmem:[%s5181_s1 + $0x28] sm:$0xff] }
 0xb2a   :  { %v4582_v18 = vld [vmem:[#allocation6] sm:$0xff]  ;;  %3640 = vmatprep.mubr.msk.bf16.mxu0 %vm4041_vm0, %v4040_v1 }
 0xb2b   :  { %v1513_v51 = vpack.c.bf16 %v4582_v18, %v4582_v18 }
 0xb2d   :  { %3633 = vmatmul.mubr.msk.bf16.vlgmr.msra.gmra.mxu1 %vm288_vm2, %v1513_v51 }
 0xb2e   :  { %3648 = vmatprep.mubr.msk.bf16.mxu1 %vm4041_vm0, %v4040_v1 }
 0xb97   :  { %v1360_v47 = vpop.permute.xlu1 %1359 }
 0xb98   :  { %1362 = vst.msk [vmem:[#allocation5] sm:$0xff] %vm288_vm2, %v1360_v47  ;;  %v1608_v47 = vsub.f32 1.0, %v4615_v49 }
 0xb9b   :  { %v1370_v53 = vpop.permute.xlu0 %1369 }
 0xb9c   :  { %1372 = vst.msk [vmem:[#allocation7] sm:$0xff] %vm288_vm2, %v1370_v53 }
 0xb9f   :  { %v4596_v0 = vld [vmem:[#allocation5] sm:$0xff] }
 0xbe9   :  { %v1449_v9 = vpop.f32.mrf.mxu0 }
 0xbea   :  { %v1455_v54 = vadd.f32 %v1449_v9, %v4241_v44  ;;  %v4601_v44 = vld [vmem:[#allocation7] sm:$0xff] }
 0xbeb   :  { %v3626_v55 = vpop.f32.mrf.mxu0 }
 0xbec   :  { %3880 = vtanh.f32 %v1455_v54 }
 0xbed   :  { %v1452_v59 = vpop.f32.mrf.mxu0  ;;  %v1567_v63 = vpop.f32.mrf.mxu1 }
 0xbee   :  { %v1573_v2 = vadd.f32 %v1567_v63, %v4247_v52  ;;  %v3362_v52 = vmul.f32 -1.442695, %v1455_v54 }
 0xbef   :  { %v3627_v27 = vpop.f32.mrf.mxu0  ;;  %v3634_v3 = vpop.f32.mrf.mxu1 }
 0xbf0   :  { %3882 = vtanh.f32 %v1573_v2  ;;  %v3366_v60 = vmul.f32 -1.442695, %v1573_v2 }
 0xbf1   :  { %v1570_v58 = vpop.f32.mrf.mxu1  ;;  %3884 = vpow2.f32 %v3362_v52 }
 0xbf2   :  { %3886 = vpow2.f32 %v3366_v60 }
 0xbf3   :  { %v3635_v4 = vpop.f32.mrf.mxu1 }
 0xbf9   :  { %v3881_v6 = vpop.eup %3880 }
 0xbfa   :  { %1469 = vrot.lane.b32.xlu1 %v3881_v6, %s4042_s17 }
 0xbfd   :  { %v3883_v11 = vpop.eup %3882 }
 0xbfe   :  { %1587 = vrot.lane.b32.xlu0 %v3883_v11, %s4042_s17  ;;  %1464 = vrot.lane.b32.xlu1 %v4596_v0, %s4042_s17  ;;  %v3885_v20 = vpop.eup %3884 }
 0xbff   :  { %v1459_v23 = vadd.f32 1.0, %v3885_v20  ;;  %v3887_v31 = vpop.eup %3886  ;;  %v3788_v20 = vld [vmem:[%s5183_s3 + $0x8] sm:$0xff]  }
 0xc00   :  { %v1577_v36 = vadd.f32 1.0, %v3887_v31  ;;  %3637 = vmatpush3.bf16.msra.mxu0 %v3788_v20  ;;  %v3789_v31 = vld [vmem:[%s5186_s6 + $0x8] sm:$0xff]  }
 0xc01   :  { %3888 = vrcp.f32 %v1459_v23  ;;  %3638 = vmatprep.subr.bf16.mxu0 %v4040_v1  ;;  %3645 = vmatpush3.bf16.msra.mxu1 %v3789_v31 }
 0xc02   :  { %1582 = vrot.lane.b32.xlu0 %v4601_v44, %s4042_s17  ;;  %3890 = vrcp.f32 %v1577_v36  ;;  %3646 = vmatprep.subr.bf16.mxu1 %v4040_v1 }
 0xc0e   :  { %v3889_v37 = vpop.eup %3888 }
 0xc0f   :  { %v3891_v24 = vpop.eup %3890 }
 0xc6c   :  { %v1470_v39 = vpop.permute.xlu1 %1469 }
 0xc6d   :  { %v1472_v48 = vmul.f32 %v3889_v37, %v1470_v39 }
 0xc6f   :  { %1474 = vrot.lane.b32.xlu1 %v1472_v48, %s4042_s17 }
 0xc70   :  { %v1588_v38 = vpop.permute.xlu0 %1587  ;;  %v1465_v53 = vpop.permute.xlu1 %1464 }
 0xc71   :  { %v1590_v51 = vmul.f32 %v3891_v24, %v1588_v38  ;;  %v1467_v9 = vmul.f32 %v3889_v37, %v1465_v53 }
 0xc73   :  { %1592 = vrot.lane.b32.xlu0 %v1590_v51, %s4042_s17  ;;  %1493 = vperm.xlu1 %3760, %v1490_v42   ;;  %v3791_v51 = vld [vmem:[%s5186_s6] sm:$0xff]  }
 0xc74   :  { %v1583_v54 = vpop.permute.xlu0 %1582  ;;  %3647 = vmatpush3.bf16.msra.mxu1 %v3791_v51 }
 0xc75   :  { %v1585_v63 = vmul.f32 %v3891_v24, %v1583_v54  ;;  %3660 = vmatprep.subr.bf16.mxu1 %v4040_v1 }
 0xc77   :  { %1611 = vperm.xlu0 %3759, %v1608_v47   ;;  %1486 = vperm.xlu1 %3760, %v4608_v32  }
 0xc7b   :  { %1604 = vperm.xlu0 %3759, %v4615_v49  }
 0xce1   :  { %v1475_v55 = vpop.permute.xlu1 %1474 }
 0xce2   :  { %v1477_v59 = vadd.f32 %v1475_v55, %v1467_v9 }
 0xce4   :  { %3892 = vtanh.f32 %v1477_v59 }
 0xce5   :  { %v1593_v2 = vpop.permute.xlu0 %1592 }
 0xce6   :  { %v1595_v27 = vadd.f32 %v1593_v2, %v1585_v63 }
 0xce8   :  { %3894 = vtanh.f32 %v1595_v27 }
 0xcee   :  { %v1494_v58 = vpop.permute.xlu1 %1493 }
 0xcef   :  { %v1496_v4 = vmul.f32 %v1494_v58, %v4576_v26  ;;  %v1503_v55 = vmul.f32 %v1494_v58, %v4596_v0 }
 0xcf1   :  { %v3893_v3 = vpop.eup %3892 }
 0xcf2   :  { %1480 = vrot.lane.b32.xlu1 %v3893_v3, %s4042_s17  ;;  %v1612_v11 = vpop.permute.xlu0 %1611  ;;  %v4631_v60 = vpop.permute.xlu1 %1486 }
 0xcf3   :  { %v1614_v52 = vmul.f32 %v1612_v11, %v4582_v18  ;;  %v3790_v18 = vld [vmem:[%s5183_s3] sm:$0xff]   ;;  %v1502_v3 = vmul.f32 %v4631_v60, %v1477_v59 }
 0xcf4   :  { %3639 = vmatpush3.bf16.msra.mxu0 %v3790_v18 }
 0xcf5   :  { %v3895_v6 = vpop.eup %3894  ;;  %3652 = vmatprep.subr.bf16.mxu0 %v4040_v1 }
 0xcf6   :  { %1598 = vrot.lane.b32.xlu0 %v3895_v6, %s4042_s17  ;;  %1498 = vrot.lane.b32.xlu1 %v1496_v4, %s4044_s5  ;;  %v4637_v26 = vpop.permute.xlu0 %1604 }
 0xcf7   :  { %v1620_v58 = vmul.f32 %v4637_v26, %v1595_v27 }
 0xcfa   :  { %1616 = vrot.lane.b32.xlu0 %v1614_v52, %s4044_s5 }
 0xd64   :  { %v1481_v23 = vpop.permute.xlu1 %1480 }
 0xd65   :  { %v1483_v36 = vmul.f32 %v3889_v37, %v1481_v23 }
 0xd67   :  { %v1489_v39 = vmul.f32 %v4631_v60, %v1483_v36 }
 0xd68   :  { %v1599_v48 = vpop.permute.xlu0 %1598  ;;  %v1499_v38 = vpop.permute.xlu1 %1498 }
 0xd69   :  { %v1601_v53 = vmul.f32 %v3891_v24, %v1599_v48  ;;  %v4651_v9 = vadd.f32 %v1499_v38, %v1489_v39  ;;  %v1621_v24 = vmul.f32 %v1612_v11, %v4601_v44 }
 0xd6b   :  { %1628 = vrot.lane.b32.xlu1 %v4651_v9, %s4044_s5  ;;  %v1607_v37 = vmul.f32 %v4637_v26, %v1601_v53 }
 0xd6c   :  { %v1617_v54 = vpop.permute.xlu0 %1616 }
 0xd6d   :  { %v4658_v63 = vadd.f32 %v1617_v54, %v1607_v37 }
 0xd6f   :  { %1638 = vrot.lane.b32.xlu0 %v4658_v63, %s4044_s5  ;;  %1505 = vrot.lane.b32.xlu1 %v1503_v55, %s4042_s17 }
 0xd73   :  { %1623 = vrot.lane.b32.xlu0 %v1621_v24, %s4042_s17 }
 0xddd   :  { %v1629_v2 = vpop.permute.xlu1 %1628 }
 0xdde   :  { %1631 = vst.msk [vmem:[#allocation4] sm:$0xff] %vm288_vm2, %v1629_v2 }
 0xde1   :  { %v1639_v4 = vpop.permute.xlu0 %1638  ;;  %v1506_v6 = vpop.permute.xlu1 %1505 }
 0xde2   :  { %1641 = vst.msk [vmem:[#allocation6] sm:$0xff] %vm288_vm2, %v1639_v4  ;;  %v1508_v0 = vadd.f32 %v1506_v6, %v1502_v3 }
 0xde4   :  { %1633 = vrot.lane.b32.xlu1 %v1508_v0, %s4045_s19 }
 0xde5   :  { %v1624_v52 = vpop.permute.xlu0 %1623  ;;  %v4670_v20 = vld [vmem:[#allocation4] sm:$0xff] }
 0xde6   :  { %v1626_v44 = vadd.f32 %v1624_v52, %v1620_v58  ;;  %v1667_v11 = vpack.c.bf16 %v4670_v20, %v4670_v20 }
 0xde8   :  { %1643 = vrot.lane.b32.xlu0 %v1626_v44, %s4045_s19  ;;  %3641 = vmatmul.mubr.msk.bf16.vlgmr.msra.gmra.mxu0 %vm288_vm2, %v1667_v11 }
 0xde9   :  { %v4676_v59 = vld [vmem:[#allocation6] sm:$0xff]  ;;  %3656 = vmatprep.mubr.msk.bf16.mxu0 %vm4041_vm0, %v4040_v1 }
 0xdea   :  { %v1785_v23 = vpack.c.bf16 %v4676_v59, %v4676_v59 }
 0xdec   :  { %3649 = vmatmul.mubr.msk.bf16.vlgmr.msra.gmra.mxu1 %vm288_vm2, %v1785_v23 }
 0xded   :  { %3664 = vmatprep.mubr.msk.bf16.mxu1 %vm4041_vm0, %v4040_v1 }
 0xe56   :  { %v1634_v27 = vpop.permute.xlu1 %1633 }
 0xe57   :  { %1636 = vst.msk [vmem:[#allocation5] sm:$0xff] %vm288_vm2, %v1634_v27 }
 0xe5a   :  { %v1644_v31 = vpop.permute.xlu0 %1643 }
 0xe5b   :  { %1646 = vst.msk [vmem:[#allocation7] sm:$0xff] %vm288_vm2, %v1644_v31 }
 0xe5e   :  { %v4690_v3 = vld [vmem:[#allocation5] sm:$0xff] }
 0xea8   :  { %v1721_v18 = vpop.f32.mrf.mxu0 }
 0xea9   :  { %v1727_v36 = vadd.f32 %v1721_v18, %v4245_v50  ;;  %v4695_v50 = vld [vmem:[#allocation7] sm:$0xff] }
 0xeaa   :  { %v3642_v39 = vpop.f32.mrf.mxu0 }
 0xeab   :  { %3896 = vtanh.f32 %v1727_v36 }
 0xeac   :  { %v1724_v48 = vpop.f32.mrf.mxu0  ;;  %v1839_v38 = vpop.f32.mrf.mxu1 }
 0xead   :  { %v1845_v51 = vadd.f32 %v1839_v38, %v4243_v46  ;;  %v3372_v46 = vmul.f32 -1.442695, %v1727_v36 }
 0xeae   :  { %v3643_v53 = vpop.f32.mrf.mxu0  ;;  %v3650_v37 = vpop.f32.mrf.mxu1 }
 0xeaf   :  { %3898 = vtanh.f32 %v1845_v51  ;;  %v3376_v4 = vmul.f32 -1.442695, %v1845_v51 }
 0xeb0   :  { %v1842_v54 = vpop.f32.mrf.mxu1  ;;  %3900 = vpow2.f32 %v3372_v46  ;;  %v3792_v46 = vld [vmem:[%s5183_s3 + $0x8] sm:$0xff]  }
 0xeb1   :  { %3902 = vpow2.f32 %v3376_v4  ;;  %3653 = vmatpush3.bf16.msra.mxu0 %v3792_v46 }
 0xeb2   :  { %v3651_v55 = vpop.f32.mrf.mxu1  ;;  %3654 = vmatprep.subr.bf16.mxu0 %v4040_v1 }
 0xeb8   :  { %v3897_v24 = vpop.eup %3896 }
 0xeb9   :  { %1741 = vrot.lane.b32.xlu1 %v3897_v24, %s4042_s17 }
 0xebc   :  { %v3899_v2 = vpop.eup %3898 }
 0xebd   :  { %1859 = vrot.lane.b32.xlu0 %v3899_v2, %s4042_s17  ;;  %1736 = vrot.lane.b32.xlu1 %v4690_v3, %s4042_s17  ;;  %v3901_v6 = vpop.eup %3900 }
 0xebe   :  { %v1731_v0 = vadd.f32 1.0, %v3901_v6  ;;  %v3903_v58 = vpop.eup %3902  ;;  %v3793_v6 = vld [vmem:[%s5186_s6 + $0x8] sm:$0xff]  }
 0xebf   :  { %v1849_v52 = vadd.f32 1.0, %v3903_v58  ;;  %3661 = vmatpush3.bf16.msra.mxu1 %v3793_v6 }
 0xec0   :  { %3904 = vrcp.f32 %v1731_v0  ;;  %3662 = vmatprep.subr.bf16.mxu1 %v4040_v1 }
 0xec1   :  { %1854 = vrot.lane.b32.xlu0 %v4695_v50, %s4042_s17  ;;  %3906 = vrcp.f32 %v1849_v52 }
 0xecd   :  { %v3905_v44 = vpop.eup %3904 }
 0xece   :  { %v3907_v27 = vpop.eup %3906 }
 0xf2b   :  { %v1742_v11 = vpop.permute.xlu1 %1741 }
 0xf2c   :  { %v1744_v23 = vmul.f32 %v3905_v44, %v1742_v11 }
 0xf2e   :  { %1746 = vrot.lane.b32.xlu1 %v1744_v23, %s4042_s17  ;;  %v3795_v23 = vld [vmem:[%s5186_s6] sm:$0xff]  }
 0xf2f   :  { %v1860_v31 = vpop.permute.xlu0 %1859  ;;  %v1737_v36 = vpop.permute.xlu1 %1736  ;;  %3663 = vmatpush3.bf16.msra.mxu1 %v3795_v23 }
 0xf30   :  { %v1862_v18 = vmul.f32 %v3907_v27, %v1860_v31  ;;  %v1739_v39 = vmul.f32 %v3905_v44, %v1737_v36  ;;  %3676 = vmatprep.subr.bf16.mxu1 %v4040_v1 }
 0xf32   :  { %1864 = vrot.lane.b32.xlu0 %v1862_v18, %s4042_s17  ;;  %1765 = vperm.xlu1 %3760, %v1608_v47  }
 0xf33   :  { %v1855_v48 = vpop.permute.xlu0 %1854 }
 0xf34   :  { %v1857_v53 = vmul.f32 %v3907_v27, %v1855_v48 }
 0xf36   :  { %1883 = vperm.xlu0 %3759, %v1490_v42   ;;  %1758 = vperm.xlu1 %3760, %v4615_v49  }
 0xf3a   :  { %1876 = vperm.xlu0 %3759, %v4608_v32  }
 0xfa0   :  { %v1747_v38 = vpop.permute.xlu1 %1746 }
 0xfa1   :  { %v1749_v51 = vadd.f32 %v1747_v38, %v1739_v39 }
 0xfa3   :  { %3908 = vtanh.f32 %v1749_v51 }
 0xfa4   :  { %v1865_v37 = vpop.permute.xlu0 %1864 }
 0xfa5   :  { %v1867_v54 = vadd.f32 %v1865_v37, %v1857_v53 }
 0xfa7   :  { %3910 = vtanh.f32 %v1867_v54 }
 0xfad   :  { %v1766_v24 = vpop.permute.xlu1 %1765 }
 0xfae   :  { %v1768_v42 = vmul.f32 %v1766_v24, %v4670_v20  ;;  %v1775_v39 = vmul.f32 %v1766_v24, %v4690_v3 }
 0xfb0   :  { %v3909_v55 = vpop.eup %3908 }
 0xfb1   :  { %1752 = vrot.lane.b32.xlu1 %v3909_v55, %s4042_s17  ;;  %v1884_v49 = vpop.permute.xlu0 %1883  ;;  %v4713_v2 = vpop.permute.xlu1 %1758 }
 0xfb2   :  { %v1886_v32 = vmul.f32 %v1884_v49, %v4676_v59  ;;  %v3794_v59 = vld [vmem:[%s5183_s3] sm:$0xff]   ;;  %v1774_v53 = vmul.f32 %v4713_v2, %v1749_v51 }
 0xfb3   :  { %3655 = vmatpush3.bf16.msra.mxu0 %v3794_v59 }
 0xfb4   :  { %v3911_v47 = vpop.eup %3910  ;;  %3668 = vmatprep.subr.bf16.mxu0 %v4040_v1 }
 0xfb5   :  { %1870 = vrot.lane.b32.xlu0 %v3911_v47, %s4042_s17  ;;  %1770 = vrot.lane.b32.xlu1 %v1768_v42, %s4044_s5  ;;  %v4719_v20 = vpop.permute.xlu0 %1876 }
 0xfb6   :  { %v1892_v24 = vmul.f32 %v4719_v20, %v1867_v54 }
 0xfb9   :  { %1888 = vrot.lane.b32.xlu0 %v1886_v32, %s4044_s5 }
0x1023   :  { %v1753_v4 = vpop.permute.xlu1 %1752 }
0x1024   :  { %v1755_v0 = vmul.f32 %v3905_v44, %v1753_v4 }
0x1026   :  { %v1761_v58 = vmul.f32 %v4713_v2, %v1755_v0 }
0x1027   :  { %v1871_v52 = vpop.permute.xlu0 %1870  ;;  %v1771_v11 = vpop.permute.xlu1 %1770 }
0x1028   :  { %v1873_v31 = vmul.f32 %v3907_v27, %v1871_v52  ;;  %v4733_v18 = vadd.f32 %v1771_v11, %v1761_v58  ;;  %v1893_v27 = vmul.f32 %v1884_v49, %v4695_v50 }
0x102a   :  { %1900 = vrot.lane.b32.xlu1 %v4733_v18, %s4044_s5  ;;  %v1879_v44 = vmul.f32 %v4719_v20, %v1873_v31 }
0x102b   :  { %v1889_v36 = vpop.permute.xlu0 %1888 }
0x102c   :  { %v4740_v48 = vadd.f32 %v1889_v36, %v1879_v44 }
0x102e   :  { %1910 = vrot.lane.b32.xlu0 %v4740_v48, %s4044_s5  ;;  %1777 = vrot.lane.b32.xlu1 %v1775_v39, %s4042_s17 }
0x1032   :  { %1895 = vrot.lane.b32.xlu0 %v1893_v27, %s4042_s17 }
0x109c   :  { %v1901_v38 = vpop.permute.xlu1 %1900 }
0x109d   :  { %1903 = vst.msk [vmem:[#allocation4] sm:$0xff] %vm288_vm2, %v1901_v38 }
0x10a0   :  { %v1911_v37 = vpop.permute.xlu0 %1910  ;;  %v1778_v55 = vpop.permute.xlu1 %1777 }
0x10a1   :  { %1913 = vst.msk [vmem:[#allocation6] sm:$0xff] %vm288_vm2, %v1911_v37  ;;  %v1780_v3 = vadd.f32 %v1778_v55, %v1774_v53 }
0x10a3   :  { %1905 = vrot.lane.b32.xlu1 %v1780_v3, %s4045_s19 }
0x10a4   :  { %v1896_v42 = vpop.permute.xlu0 %1895  ;;  %v4752_v47 = vld [vmem:[#allocation4] sm:$0xff] }
0x10a5   :  { %v1898_v50 = vadd.f32 %v1896_v42, %v1892_v24  ;;  %v1937_v49 = vpack.c.bf16 %v4752_v47, %v4752_v47 }
0x10a7   :  { %1915 = vrot.lane.b32.xlu0 %v1898_v50, %s4045_s19  ;;  %3657 = vmatmul.mubr.msk.bf16.vlgmr.msra.gmra.mxu0 %vm288_vm2, %v1937_v49 }
0x10a8   :  { %v4758_v51 = vld [vmem:[#allocation6] sm:$0xff]  ;;  %3672 = vmatprep.mubr.msk.bf16.mxu0 %vm4041_vm0, %v4040_v1 }
0x10a9   :  { %v2055_v32 = vpack.c.bf16 %v4758_v51, %v4758_v51 }
0x10ab   :  { %3665 = vmatmul.mubr.msk.bf16.vlgmr.msra.gmra.mxu1 %vm288_vm2, %v2055_v32 }
0x10ac   :  { %3680 = vmatprep.mubr.msk.bf16.mxu1 %vm4041_vm0, %v4040_v1 }
0x1115   :  { %v1906_v54 = vpop.permute.xlu1 %1905 }
0x1116   :  { %1908 = vst.msk [vmem:[#allocation5] sm:$0xff] %vm288_vm2, %v1906_v54 }
0x1119   :  { %v1916_v46 = vpop.permute.xlu0 %1915 }
0x111a   :  { %1918 = vst.msk [vmem:[#allocation7] sm:$0xff] %vm288_vm2, %v1916_v46 }
0x111d   :  { %v4772_v27 = vld [vmem:[#allocation5] sm:$0xff] }
0x1167   :  { %v1991_v4 = vpop.f32.mrf.mxu0 }
0x1168   :  { %v1997_v6 = vadd.f32 %v1991_v4, %v4249_v56  ;;  %v4777_v56 = vld [vmem:[#allocation7] sm:$0xff] }
0x1169   :  { %v3658_v59 = vpop.f32.mrf.mxu0 }
0x116a   :  { %3912 = vtanh.f32 %v1997_v6 }
0x116b   :  { %v1994_v0 = vpop.f32.mrf.mxu0  ;;  %v2109_v58 = vpop.f32.mrf.mxu1 }
0x116c   :  { %v2115_v52 = vadd.f32 %v2109_v58, %v4239_v40  ;;  %v3382_v40 = vmul.f32 -1.442695, %v1997_v6 }
0x116d   :  { %v3659_v11 = vpop.f32.mrf.mxu0  ;;  %v3666_v23 = vpop.f32.mrf.mxu1 }
0x116e   :  { %3914 = vtanh.f32 %v2115_v52  ;;  %v3386_v38 = vmul.f32 -1.442695, %v2115_v52 }
0x116f   :  { %v2112_v31 = vpop.f32.mrf.mxu1  ;;  %3916 = vpow2.f32 %v3382_v40  ;;  %v3797_v40 = vld [vmem:[%s5186_s6 + $0x8] sm:$0xff]  }
0x1170   :  { %3918 = vpow2.f32 %v3386_v38  ;;  %3677 = vmatpush3.bf16.msra.mxu1 %v3797_v40 }
0x1171   :  { %v3667_v44 = vpop.f32.mrf.mxu1  ;;  %3678 = vmatprep.subr.bf16.mxu1 %v4040_v1 }
0x1177   :  { %v3913_v36 = vpop.eup %3912 }
0x1178   :  { %2011 = vrot.lane.b32.xlu1 %v3913_v36, %s4042_s17  ;;  %v3796_v36 = vld [vmem:[%s5183_s3 + $0x8] sm:$0xff]  }
0x1179   :  { %3669 = vmatpush3.bf16.msra.mxu0 %v3796_v36 }
0x117a   :  { %3670 = vmatprep.subr.bf16.mxu0 %v4040_v1 }
0x117b   :  { %v3915_v39 = vpop.eup %3914 }
0x117c   :  { %2129 = vrot.lane.b32.xlu0 %v3915_v39, %s4042_s17  ;;  %2006 = vrot.lane.b32.xlu1 %v4772_v27, %s4042_s17  ;;  %v3917_v53 = vpop.eup %3916 }
0x117d   :  { %v2001_v37 = vadd.f32 1.0, %v3917_v53  ;;  %v3919_v55 = vpop.eup %3918 }
0x117e   :  { %v2119_v3 = vadd.f32 1.0, %v3919_v55 }
0x117f   :  { %3920 = vrcp.f32 %v2001_v37 }
0x1180   :  { %2124 = vrot.lane.b32.xlu0 %v4777_v56, %s4042_s17  ;;  %3922 = vrcp.f32 %v2119_v3  ;;  %v3799_v3 = vld [vmem:[%s5186_s6] sm:$0xff]  }
0x1181   :  { %3679 = vmatpush3.bf16.msra.mxu1 %v3799_v3 }
0x1182   :  { %3692 = vmatprep.subr.bf16.mxu1 %v4040_v1 }
0x118c   :  { %v3921_v24 = vpop.eup %3920 }
0x118d   :  { %v3923_v49 = vpop.eup %3922 }
0x11ea   :  { %v2012_v42 = vpop.permute.xlu1 %2011 }
0x11eb   :  { %v2014_v50 = vmul.f32 %v3921_v24, %v2012_v42 }
0x11ed   :  { %2016 = vrot.lane.b32.xlu1 %v2014_v50, %s4042_s17 }
0x11ee   :  { %v2130_v32 = vpop.permute.xlu0 %2129  ;;  %v2007_v46 = vpop.permute.xlu1 %2006 }
0x11ef   :  { %v2132_v54 = vmul.f32 %v3923_v49, %v2130_v32  ;;  %v2009_v4 = vmul.f32 %v3921_v24, %v2007_v46 }
0x11f1   :  { %2134 = vrot.lane.b32.xlu0 %v2132_v54, %s4042_s17  ;;  %2035 = vperm.xlu1 %3760, %v1334_v12  }
0x11f2   :  { %v2125_v6 = vpop.permute.xlu0 %2124 }
0x11f3   :  { %v2127_v58 = vmul.f32 %v3923_v49, %v2125_v6 }
0x11f5   :  { %2153 = vperm.xlu0 %3759, %v1216_v7   ;;  %2028 = vperm.xlu1 %3760, %v4521_v33  }
0x11f9   :  { %2146 = vperm.xlu0 %3759, %v4514_v22  }
0x125f   :  { %v2017_v59 = vpop.permute.xlu1 %2016 }
0x1260   :  { %v2019_v0 = vadd.f32 %v2017_v59, %v2009_v4 }
0x1262   :  { %3924 = vtanh.f32 %v2019_v0 }
0x1263   :  { %v2135_v52 = vpop.permute.xlu0 %2134 }
0x1264   :  { %v2137_v11 = vadd.f32 %v2135_v52, %v2127_v58 }
0x1266   :  { %3926 = vtanh.f32 %v2137_v11 }
0x126c   :  { %v2036_v31 = vpop.permute.xlu1 %2035 }
0x126d   :  { %v2038_v7 = vmul.f32 %v2036_v31, %v4752_v47  ;;  %v2045_v54 = vmul.f32 %v2036_v31, %v4772_v27 }
0x126f   :  { %v3925_v23 = vpop.eup %3924 }
0x1270   :  { %2022 = vrot.lane.b32.xlu1 %v3925_v23, %s4042_s17  ;;  %v2154_v33 = vpop.permute.xlu0 %2153  ;;  %v4795_v44 = vpop.permute.xlu1 %2028 }
0x1271   :  { %v2156_v22 = vmul.f32 %v2154_v33, %v4758_v51  ;;  %v3798_v51 = vld [vmem:[%s5183_s3] sm:$0xff]   ;;  %v2044_v6 = vmul.f32 %v4795_v44, %v2019_v0 }
0x1272   :  { %3671 = vmatpush3.bf16.msra.mxu0 %v3798_v51 }
0x1273   :  { %v3927_v12 = vpop.eup %3926  ;;  %3684 = vmatprep.subr.bf16.mxu0 %v4040_v1 }
0x1274   :  { %2140 = vrot.lane.b32.xlu0 %v3927_v12, %s4042_s17  ;;  %2040 = vrot.lane.b32.xlu1 %v2038_v7, %s4044_s5  ;;  %v4801_v47 = vpop.permute.xlu0 %2146 }
0x1275   :  { %v2162_v52 = vmul.f32 %v4801_v47, %v2137_v11 }
0x1278   :  { %2158 = vrot.lane.b32.xlu0 %v2156_v22, %s4044_s5 }
0x12e2   :  { %v2023_v39 = vpop.permute.xlu1 %2022 }
0x12e3   :  { %v2025_v38 = vmul.f32 %v3921_v24, %v2023_v39 }
0x12e5   :  { %v2031_v53 = vmul.f32 %v4795_v44, %v2025_v38 }
0x12e6   :  { %v2141_v37 = vpop.permute.xlu0 %2140  ;;  %v2041_v55 = vpop.permute.xlu1 %2040 }
0x12e7   :  { %v2143_v42 = vmul.f32 %v3923_v49, %v2141_v37  ;;  %v4815_v50 = vadd.f32 %v2041_v55, %v2031_v53  ;;  %v2163_v49 = vmul.f32 %v2154_v33, %v4777_v56 }
0x12e9   :  { %2170 = vrot.lane.b32.xlu1 %v4815_v50, %s4044_s5  ;;  %v2149_v24 = vmul.f32 %v4801_v47, %v2143_v42 }
0x12ea   :  { %v2159_v32 = vpop.permute.xlu0 %2158 }
0x12eb   :  { %v4822_v46 = vadd.f32 %v2159_v32, %v2149_v24 }
0x12ed   :  { %2180 = vrot.lane.b32.xlu0 %v4822_v46, %s4044_s5  ;;  %2047 = vrot.lane.b32.xlu1 %v2045_v54, %s4042_s17 }
0x12f1   :  { %2165 = vrot.lane.b32.xlu0 %v2163_v49, %s4042_s17 }
0x135b   :  { %v2171_v4 = vpop.permute.xlu1 %2170 }
0x135c   :  { %2173 = vst.msk [vmem:[#allocation4] sm:$0xff] %vm288_vm2, %v2171_v4 }
0x135f   :  { %v2181_v59 = vpop.permute.xlu0 %2180  ;;  %v2048_v58 = vpop.permute.xlu1 %2047 }
0x1360   :  { %2183 = vst.msk [vmem:[#allocation6] sm:$0xff] %vm288_vm2, %v2181_v59  ;;  %v2050_v27 = vadd.f32 %v2048_v58, %v2044_v6 }
0x1362   :  { %2175 = vrot.lane.b32.xlu1 %v2050_v27, %s4045_s19 }
0x1363   :  { %v2166_v23 = vpop.permute.xlu0 %2165  ;;  %v4834_v31 = vld [vmem:[#allocation4] sm:$0xff] }
0x1364   :  { %v2168_v56 = vadd.f32 %v2166_v23, %v2162_v52  ;;  %v2207_v7 = vpack.c.bf16 %v4834_v31, %v4834_v31  ;;  %v3387_v52 = vld [vmem:[%s5181_s1 + $0x38] sm:$0xff] }
0x1366   :  { %2185 = vrot.lane.b32.xlu0 %v2168_v56, %s4045_s19  ;;  %3673 = vmatmul.mubr.msk.bf16.vlgmr.msra.gmra.mxu0 %vm288_vm2, %v2207_v7  ;;  %v2302_v56 = vsub.f32 1.0, %v3387_v52 }
0x1367   :  { %v4840_v0 = vld [vmem:[#allocation6] sm:$0xff]  ;;  %3688 = vmatprep.mubr.msk.bf16.mxu0 %vm4041_vm0, %v4040_v1 }
0x1368   :  { %v2325_v12 = vpack.c.bf16 %v4840_v0, %v4840_v0 }
0x136a   :  { %3681 = vmatmul.mubr.msk.bf16.vlgmr.msra.gmra.mxu1 %vm288_vm2, %v2325_v12 }
0x136b   :  { %3696 = vmatprep.mubr.msk.bf16.mxu1 %vm4041_vm0, %v4040_v1 }
0x13d4   :  { %v2176_v11 = vpop.permute.xlu1 %2175 }
0x13d5   :  { %2178 = vst.msk [vmem:[#allocation5] sm:$0xff] %vm288_vm2, %v2176_v11  ;;  %v3388_v11 = vld [vmem:[%s5181_s1 + $0x10] sm:$0xff] }
0x13d8   :  { %v2186_v33 = vpop.permute.xlu0 %2185 }
0x13d9   :  { %2188 = vst.msk [vmem:[#allocation7] sm:$0xff] %vm288_vm2, %v2186_v33 }
0x13dc   :  { %v4854_v32 = vld [vmem:[#allocation5] sm:$0xff] }
0x1426   :  { %v2261_v22 = vpop.f32.mrf.mxu0 }
0x1427   :  { %v2267_v36 = vadd.f32 %v2261_v22, %v4253_v62  ;;  %v4859_v62 = vld [vmem:[#allocation7] sm:$0xff]  ;;  %v2420_v22 = vsub.f32 1.0, %v3388_v11 }
0x1428   :  { %v3674_v39 = vpop.f32.mrf.mxu0 }
0x1429   :  { %3928 = vtanh.f32 %v2267_v36 }
0x142a   :  { %v2264_v40 = vpop.f32.mrf.mxu0  ;;  %v2379_v51 = vpop.f32.mrf.mxu1 }
0x142b   :  { %v2385_v38 = vadd.f32 %v2379_v51, %v4235_v34  ;;  %v3392_v34 = vmul.f32 -1.442695, %v2267_v36 }
0x142c   :  { %v3675_v53 = vpop.f32.mrf.mxu0  ;;  %v3682_v37 = vpop.f32.mrf.mxu1 }
0x142d   :  { %3930 = vtanh.f32 %v2385_v38  ;;  %v3396_v54 = vmul.f32 -1.442695, %v2385_v38 }
0x142e   :  { %v2382_v55 = vpop.f32.mrf.mxu1  ;;  %3932 = vpow2.f32 %v3392_v34 }
0x142f   :  { %3934 = vpow2.f32 %v3396_v54 }
0x1430   :  { %v3683_v3 = vpop.f32.mrf.mxu1 }
0x1436   :  { %v3929_v42 = vpop.eup %3928 }
0x1437   :  { %2281 = vrot.lane.b32.xlu1 %v3929_v42, %s4042_s17 }
0x143a   :  { %v3931_v24 = vpop.eup %3930 }
0x143b   :  { %2399 = vrot.lane.b32.xlu0 %v3931_v24, %s4042_s17  ;;  %2276 = vrot.lane.b32.xlu1 %v4854_v32, %s4042_s17  ;;  %v3933_v49 = vpop.eup %3932 }
0x143c   :  { %v2271_v4 = vadd.f32 1.0, %v3933_v49  ;;  %v3935_v6 = vpop.eup %3934 }
0x143d   :  { %v2389_v59 = vadd.f32 1.0, %v3935_v6  ;;  %v3800_v6 = vld [vmem:[%s5183_s3 + $0x8] sm:$0xff]  }
0x143e   :  { %3936 = vrcp.f32 %v2271_v4  ;;  %3685 = vmatpush3.bf16.msra.mxu0 %v3800_v6 }
0x143f   :  { %2394 = vrot.lane.b32.xlu0 %v4859_v62, %s4042_s17  ;;  %3938 = vrcp.f32 %v2389_v59  ;;  %3686 = vmatprep.subr.bf16.mxu0 %v4040_v1 }
0x144b   :  { %v3937_v58 = vpop.eup %3936 }
0x144c   :  { %v3939_v7 = vpop.eup %3938 }
0x14a9   :  { %v2282_v27 = vpop.permute.xlu1 %2281 }
0x14aa   :  { %v2284_v23 = vmul.f32 %v3937_v58, %v2282_v27  ;;  %v3801_v27 = vld [vmem:[%s5186_s6 + $0x8] sm:$0xff]  }
0x14ab   :  { %3693 = vmatpush3.bf16.msra.mxu1 %v3801_v27 }
0x14ac   :  { %2286 = vrot.lane.b32.xlu1 %v2284_v23, %s4042_s17  ;;  %3694 = vmatprep.subr.bf16.mxu1 %v4040_v1 }
0x14ad   :  { %v2400_v12 = vpop.permute.xlu0 %2399  ;;  %v2277_v36 = vpop.permute.xlu1 %2276 }
0x14ae   :  { %v2402_v33 = vmul.f32 %v3939_v7, %v2400_v12  ;;  %v2279_v39 = vmul.f32 %v3937_v58, %v2277_v36 }
0x14b0   :  { %2404 = vrot.lane.b32.xlu0 %v2402_v33, %s4042_s17  ;;  %2305 = vperm.xlu1 %3760, %v2302_v56  }
0x14b1   :  { %v2395_v40 = vpop.permute.xlu0 %2394 }
0x14b2   :  { %v2397_v53 = vmul.f32 %v3939_v7, %v2395_v40 }
0x14b4   :  { %2423 = vperm.xlu0 %3759, %v2420_v22   ;;  %2298 = vperm.xlu1 %3760, %v3387_v52  }
0x14b8   :  { %2416 = vperm.xlu0 %3759, %v3388_v11   ;;  %v3803_v11 = vld [vmem:[%s5186_s6] sm:$0xff]  }
0x14b9   :  { %3695 = vmatpush3.bf16.msra.mxu1 %v3803_v11 }
0x14ba   :  { %3708 = vmatprep.subr.bf16.mxu1 %v4040_v1 }
0x151e   :  { %v2287_v51 = vpop.permute.xlu1 %2286 }
0x151f   :  { %v2289_v38 = vadd.f32 %v2287_v51, %v2279_v39 }
0x1521   :  { %3940 = vtanh.f32 %v2289_v38 }
0x1522   :  { %v2405_v37 = vpop.permute.xlu0 %2404 }
0x1523   :  { %v2407_v55 = vadd.f32 %v2405_v37, %v2397_v53 }
0x1525   :  { %3942 = vtanh.f32 %v2407_v55 }
0x152b   :  { %v2306_v42 = vpop.permute.xlu1 %2305 }
0x152c   :  { %v2308_v24 = vmul.f32 %v2306_v42, %v4834_v31  ;;  %v2315_v39 = vmul.f32 %v2306_v42, %v4854_v32 }
0x152e   :  { %v3941_v3 = vpop.eup %3940 }
0x152f   :  { %2292 = vrot.lane.b32.xlu1 %v3941_v3, %s4042_s17  ;;  %v2424_v54 = vpop.permute.xlu0 %2423  ;;  %v4877_v4 = vpop.permute.xlu1 %2298 }
0x1530   :  { %v2426_v49 = vmul.f32 %v2424_v54, %v4840_v0  ;;  %v3802_v0 = vld [vmem:[%s5183_s3] sm:$0xff]   ;;  %v2314_v53 = vmul.f32 %v4877_v4, %v2289_v38 }
0x1531   :  { %3687 = vmatpush3.bf16.msra.mxu0 %v3802_v0 }
0x1532   :  { %v3943_v34 = vpop.eup %3942  ;;  %3700 = vmatprep.subr.bf16.mxu0 %v4040_v1 }
0x1533   :  { %2410 = vrot.lane.b32.xlu0 %v3943_v34, %s4042_s17  ;;  %2310 = vrot.lane.b32.xlu1 %v2308_v24, %s4044_s5  ;;  %v4883_v31 = vpop.permute.xlu0 %2416 }
0x1534   :  { %v2432_v42 = vmul.f32 %v4883_v31, %v2407_v55 }
0x1537   :  { %2428 = vrot.lane.b32.xlu0 %v2426_v49, %s4044_s5 }
0x15a1   :  { %v2293_v59 = vpop.permute.xlu1 %2292 }
0x15a2   :  { %v2295_v52 = vmul.f32 %v3937_v58, %v2293_v59 }
0x15a4   :  { %v2301_v23 = vmul.f32 %v4877_v4, %v2295_v52 }
0x15a5   :  { %v2411_v56 = vpop.permute.xlu0 %2410  ;;  %v2311_v12 = vpop.permute.xlu1 %2310 }
0x15a6   :  { %v2413_v33 = vmul.f32 %v3939_v7, %v2411_v56  ;;  %v4897_v22 = vadd.f32 %v2311_v12, %v2301_v23  ;;  %v2433_v7 = vmul.f32 %v2424_v54, %v4859_v62 }
0x15a8   :  { %2440 = vrot.lane.b32.xlu1 %v4897_v22, %s4044_s5  ;;  %v2419_v58 = vmul.f32 %v4883_v31, %v2413_v33 }
0x15a9   :  { %v2429_v36 = vpop.permute.xlu0 %2428 }
0x15aa   :  { %v4904_v40 = vadd.f32 %v2429_v36, %v2419_v58 }
0x15ac   :  { %2450 = vrot.lane.b32.xlu0 %v4904_v40, %s4044_s5  ;;  %2317 = vrot.lane.b32.xlu1 %v2315_v39, %s4042_s17 }
0x15b0   :  { %2435 = vrot.lane.b32.xlu0 %v2433_v7, %s4042_s17 }
0x161a   :  { %v2441_v51 = vpop.permute.xlu1 %2440 }
0x161b   :  { %2443 = vst.msk [vmem:[#allocation4] sm:$0xff] %vm288_vm2, %v2441_v51 }
0x161e   :  { %v2451_v37 = vpop.permute.xlu0 %2450  ;;  %v2318_v3 = vpop.permute.xlu1 %2317 }
0x161f   :  { %2453 = vst.msk [vmem:[#allocation6] sm:$0xff] %vm288_vm2, %v2451_v37  ;;  %v2320_v32 = vadd.f32 %v2318_v3, %v2314_v53 }
0x1621   :  { %2445 = vrot.lane.b32.xlu1 %v2320_v32, %s4045_s19 }
0x1622   :  { %v2436_v24 = vpop.permute.xlu0 %2435  ;;  %v4916_v34 = vld [vmem:[#allocation4] sm:$0xff] }
0x1623   :  { %v2438_v62 = vadd.f32 %v2436_v24, %v2432_v42  ;;  %v2477_v54 = vpack.c.bf16 %v4916_v34, %v4916_v34 }
0x1625   :  { %2455 = vrot.lane.b32.xlu0 %v2438_v62, %s4045_s19  ;;  %3689 = vmatmul.mubr.msk.bf16.vlgmr.msra.gmra.mxu0 %vm288_vm2, %v2477_v54  ;;  %v3397_v62 = vld [vmem:[%s5181_s1 + $0x40] sm:$0xff] }
0x1626   :  { %v4922_v38 = vld [vmem:[#allocation6] sm:$0xff]  ;;  %3704 = vmatprep.mubr.msk.bf16.mxu0 %vm4041_vm0, %v4040_v1 }
0x1627   :  { %v2595_v49 = vpack.c.bf16 %v4922_v38, %v4922_v38 }
0x1629   :  { %3697 = vmatmul.mubr.msk.bf16.vlgmr.msra.gmra.mxu1 %vm288_vm2, %v2595_v49  ;;  %v2572_v49 = vsub.f32 1.0, %v3397_v62 }
0x162a   :  { %3712 = vmatprep.mubr.msk.bf16.mxu1 %vm4041_vm0, %v4040_v1 }
0x1693   :  { %v2446_v55 = vpop.permute.xlu1 %2445 }
0x1694   :  { %2448 = vst.msk [vmem:[#allocation5] sm:$0xff] %vm288_vm2, %v2446_v55 }
0x1697   :  { %v2456_v6 = vpop.permute.xlu0 %2455 }
0x1698   :  { %2458 = vst.msk [vmem:[#allocation7] sm:$0xff] %vm288_vm2, %v2456_v6 }
0x169b   :  { %v4936_v7 = vld [vmem:[#allocation5] sm:$0xff] }
0x16e5   :  { %v2531_v59 = vpop.f32.mrf.mxu0 }
0x16e6   :  { %v2537_v27 = vadd.f32 %v2531_v59, %v4257_v5  ;;  %v4941_v5 = vld [vmem:[#allocation7] sm:$0xff]  ;;  %v3398_v59 = vld [vmem:[%s5181_s1 + $0x8] sm:$0xff] }
0x16e7   :  { %v3690_v0 = vpop.f32.mrf.mxu0 }
0x16e8   :  { %3944 = vtanh.f32 %v2537_v27  ;;  %v2690_v0 = vsub.f32 1.0, %v3398_v59 }
0x16e9   :  { %v2534_v52 = vpop.f32.mrf.mxu0  ;;  %v2649_v23 = vpop.f32.mrf.mxu1 }
0x16ea   :  { %v2655_v56 = vadd.f32 %v2649_v23, %v4231_v28  ;;  %v3402_v28 = vmul.f32 -1.442695, %v2537_v27 }
0x16eb   :  { %v3691_v12 = vpop.f32.mrf.mxu0  ;;  %v3698_v11 = vpop.f32.mrf.mxu1 }
0x16ec   :  { %3946 = vtanh.f32 %v2655_v56  ;;  %v3406_v51 = vmul.f32 -1.442695, %v2655_v56 }
0x16ed   :  { %v2652_v33 = vpop.f32.mrf.mxu1  ;;  %3948 = vpow2.f32 %v3402_v28 }
0x16ee   :  { %3950 = vpow2.f32 %v3406_v51 }
0x16ef   :  { %v3699_v58 = vpop.f32.mrf.mxu1 }
0x16f5   :  { %v3945_v36 = vpop.eup %3944 }
0x16f6   :  { %2551 = vrot.lane.b32.xlu1 %v3945_v36, %s4042_s17 }
0x16f9   :  { %v3947_v39 = vpop.eup %3946 }
0x16fa   :  { %2669 = vrot.lane.b32.xlu0 %v3947_v39, %s4042_s17  ;;  %2546 = vrot.lane.b32.xlu1 %v4936_v7, %s4042_s17  ;;  %v3949_v53 = vpop.eup %3948 }
0x16fb   :  { %v2541_v37 = vadd.f32 1.0, %v3949_v53  ;;  %v3951_v3 = vpop.eup %3950 }
0x16fc   :  { %v2659_v32 = vadd.f32 1.0, %v3951_v3 }
0x16fd   :  { %3952 = vrcp.f32 %v2541_v37 }
0x16fe   :  { %2664 = vrot.lane.b32.xlu0 %v4941_v5, %s4042_s17  ;;  %3954 = vrcp.f32 %v2659_v32 }
0x170a   :  { %v3953_v42 = vpop.eup %3952 }
0x170b   :  { %v3955_v55 = vpop.eup %3954 }
0x1768   :  { %v2552_v24 = vpop.permute.xlu1 %2551 }
0x1769   :  { %v2554_v54 = vmul.f32 %v3953_v42, %v2552_v24  ;;  %v3804_v24 = vld [vmem:[%s5183_s3 + $0x8] sm:$0xff]  }
0x176a   :  { %3701 = vmatpush3.bf16.msra.mxu0 %v3804_v24 }
0x176b   :  { %2556 = vrot.lane.b32.xlu1 %v2554_v54, %s4042_s17  ;;  %3702 = vmatprep.subr.bf16.mxu0 %v4040_v1  ;;  %v3805_v54 = vld [vmem:[%s5186_s6 + $0x8] sm:$0xff]  }
0x176c   :  { %v2670_v6 = vpop.permute.xlu0 %2669  ;;  %v2547_v52 = vpop.permute.xlu1 %2546  ;;  %3709 = vmatpush3.bf16.msra.mxu1 %v3805_v54 }
0x176d   :  { %v2672_v27 = vmul.f32 %v3955_v55, %v2670_v6  ;;  %v2549_v23 = vmul.f32 %v3953_v42, %v2547_v52  ;;  %3710 = vmatprep.subr.bf16.mxu1 %v4040_v1 }
0x176f   :  { %2674 = vrot.lane.b32.xlu0 %v2672_v27, %s4042_s17  ;;  %2575 = vperm.xlu1 %3760, %v2572_v49  }
0x1770   :  { %v2665_v56 = vpop.permute.xlu0 %2664 }
0x1771   :  { %v2667_v33 = vmul.f32 %v3955_v55, %v2665_v56 }
0x1773   :  { %2693 = vperm.xlu0 %3759, %v2690_v0   ;;  %2568 = vperm.xlu1 %3760, %v3397_v62   ;;  %v3807_v0 = vld [vmem:[%s5186_s6] sm:$0xff]  }
0x1774   :  { %3711 = vmatpush3.bf16.msra.mxu1 %v3807_v0 }
0x1775   :  { %3724 = vmatprep.subr.bf16.mxu1 %v4040_v1 }
0x1777   :  { %2686 = vperm.xlu0 %3759, %v3398_v59  }
0x17dd   :  { %v2557_v12 = vpop.permute.xlu1 %2556 }
0x17de   :  { %v2559_v11 = vadd.f32 %v2557_v12, %v2549_v23 }
0x17e0   :  { %3956 = vtanh.f32 %v2559_v11 }
0x17e1   :  { %v2675_v58 = vpop.permute.xlu0 %2674 }
0x17e2   :  { %v2677_v36 = vadd.f32 %v2675_v58, %v2667_v33 }
0x17e4   :  { %3958 = vtanh.f32 %v2677_v36 }
0x17ea   :  { %v2576_v28 = vpop.permute.xlu1 %2575 }
0x17eb   :  { %v2578_v51 = vmul.f32 %v2576_v28, %v4916_v34  ;;  %v2585_v12 = vmul.f32 %v2576_v28, %v4936_v7 }
0x17ed   :  { %v3957_v39 = vpop.eup %3956 }
0x17ee   :  { %2562 = vrot.lane.b32.xlu1 %v3957_v39, %s4042_s17  ;;  %v2694_v37 = vpop.permute.xlu0 %2693  ;;  %v4959_v32 = vpop.permute.xlu1 %2568 }
0x17ef   :  { %v2696_v3 = vmul.f32 %v2694_v37, %v4922_v38  ;;  %v3806_v38 = vld [vmem:[%s5183_s3] sm:$0xff]   ;;  %v2584_v39 = vmul.f32 %v4959_v32, %v2559_v11 }
0x17f0   :  { %3703 = vmatpush3.bf16.msra.mxu0 %v3806_v38 }
0x17f1   :  { %v3959_v53 = vpop.eup %3958  ;;  %3716 = vmatprep.subr.bf16.mxu0 %v4040_v1 }
0x17f2   :  { %2680 = vrot.lane.b32.xlu0 %v3959_v53, %s4042_s17  ;;  %2580 = vrot.lane.b32.xlu1 %v2578_v51, %s4044_s5  ;;  %v4965_v34 = vpop.permute.xlu0 %2686 }
0x17f3   :  { %v2702_v28 = vmul.f32 %v4965_v34, %v2677_v36 }
0x17f6   :  { %2698 = vrot.lane.b32.xlu0 %v2696_v3, %s4044_s5 }
0x1860   :  { %v2563_v62 = vpop.permute.xlu1 %2562 }
0x1861   :  { %v2565_v49 = vmul.f32 %v3953_v42, %v2563_v62 }
0x1863   :  { %v2571_v6 = vmul.f32 %v4959_v32, %v2565_v49 }
0x1864   :  { %v2681_v59 = vpop.permute.xlu0 %2680  ;;  %v2581_v27 = vpop.permute.xlu1 %2580 }
0x1865   :  { %v2683_v52 = vmul.f32 %v3955_v55, %v2681_v59  ;;  %v4979_v23 = vadd.f32 %v2581_v27, %v2571_v6  ;;  %v2703_v55 = vmul.f32 %v2694_v37, %v4941_v5 }
0x1867   :  { %2710 = vrot.lane.b32.xlu1 %v4979_v23, %s4044_s5  ;;  %v2689_v42 = vmul.f32 %v4965_v34, %v2683_v52 }
0x1868   :  { %v2699_v56 = vpop.permute.xlu0 %2698 }
0x1869   :  { %v4986_v33 = vadd.f32 %v2699_v56, %v2689_v42 }
0x186b   :  { %2720 = vrot.lane.b32.xlu0 %v4986_v33, %s4044_s5  ;;  %2587 = vrot.lane.b32.xlu1 %v2585_v12, %s4042_s17 }
0x186f   :  { %2705 = vrot.lane.b32.xlu0 %v2703_v55, %s4042_s17 }
0x18d9   :  { %v2711_v58 = vpop.permute.xlu1 %2710 }
0x18da   :  { %2713 = vst.msk [vmem:[#allocation4] sm:$0xff] %vm288_vm2, %v2711_v58 }
0x18dd   :  { %v2721_v51 = vpop.permute.xlu0 %2720  ;;  %v2588_v53 = vpop.permute.xlu1 %2587 }
0x18de   :  { %2723 = vst.msk [vmem:[#allocation6] sm:$0xff] %vm288_vm2, %v2721_v51  ;;  %v2590_v7 = vadd.f32 %v2588_v53, %v2584_v39 }
0x18e0   :  { %2715 = vrot.lane.b32.xlu1 %v2590_v7, %s4045_s19 }
0x18e1   :  { %v2706_v3 = vpop.permute.xlu0 %2705  ;;  %v4998_v24 = vld [vmem:[#allocation4] sm:$0xff] }
0x18e2   :  { %v2708_v5 = vadd.f32 %v2706_v3, %v2702_v28  ;;  %v2747_v37 = vpack.c.bf16 %v4998_v24, %v4998_v24 }
0x18e4   :  { %2725 = vrot.lane.b32.xlu0 %v2708_v5, %s4045_s19  ;;  %3705 = vmatmul.mubr.msk.bf16.vlgmr.msra.gmra.mxu0 %vm288_vm2, %v2747_v37 }
0x18e5   :  { %v5004_v11 = vld [vmem:[#allocation6] sm:$0xff]  ;;  %3720 = vmatprep.mubr.msk.bf16.mxu0 %vm4041_vm0, %v4040_v1 }
0x18e6   :  { %v2864_v62 = vpack.c.bf16 %v5004_v11, %v5004_v11 }
0x18e8   :  { %3713 = vmatmul.mubr.msk.bf16.vlgmr.msra.gmra.mxu1 %vm288_vm2, %v2864_v62  ;;  %v3407_v62 = vld [vmem:[%s5181_s1 + $0x48] sm:$0xff] }
0x18e9   :  { %3728 = vmatprep.mubr.msk.bf16.mxu1 %vm4041_vm0, %v4040_v1 }
0x1952   :  { %v2716_v36 = vpop.permute.xlu1 %2715 }
0x1953   :  { %2718 = vst.msk [vmem:[#allocation5] sm:$0xff] %vm288_vm2, %v2716_v36 }
0x1956   :  { %v2726_v54 = vpop.permute.xlu0 %2725 }
0x1957   :  { %2728 = vst.msk [vmem:[#allocation7] sm:$0xff] %vm288_vm2, %v2726_v54  ;;  %v2842_v54 = vsub.f32 1.0, %v3407_v62 }
0x195a   :  { %v2746_v39 = vld [vmem:[#allocation5] sm:$0xff] }
0x19a4   :  { %v2801_v38 = vpop.f32.mrf.mxu0 }
0x19a5   :  { %v2807_v49 = vadd.f32 %v2801_v38, %v4261_v13  ;;  %v2863_v13 = vld [vmem:[#allocation7] sm:$0xff] }
0x19a6   :  { %v3706_v6 = vpop.f32.mrf.mxu0 }
0x19a7   :  { %3960 = vtanh.f32 %v2807_v49  ;;  %v3411_v51 = vmul.f32 -1.442695, %v2807_v49  ;;  %v2742_v6 = vld [vmem:[%s5181_s1] sm:$0xff] }
0x19a8   :  { %v2804_v59 = vpop.f32.mrf.mxu0  ;;  %v2918_v27 = vpop.f32.mrf.mxu1 }
0x19a9   :  { %v2924_v0 = vadd.f32 %v2918_v27, %v4224_v21  ;;  %v2959_v27 = vsub.f32 1.0, %v2742_v6 }
0x19aa   :  { %v3707_v52 = vpop.f32.mrf.mxu0  ;;  %v3714_v42 = vpop.f32.mrf.mxu1 }
0x19ab   :  { %3962 = vtanh.f32 %v2924_v0  ;;  %v3415_v21 = vmul.f32 -1.442695, %v2924_v0 }
0x19ac   :  { %v2921_v56 = vpop.f32.mrf.mxu1  ;;  %3964 = vpow2.f32 %v3411_v51 }
0x19ad   :  { %3966 = vpow2.f32 %v3415_v21 }
0x19ae   :  { %v3715_v12 = vpop.f32.mrf.mxu1 }
0x19b4   :  { %v3961_v55 = vpop.eup %3960 }
0x19b5   :  { %2821 = vrot.lane.b32.xlu1 %v3961_v55, %s4042_s17 }
0x19b8   :  { %v3963_v58 = vpop.eup %3962 }
0x19b9   :  { %2938 = vrot.lane.b32.xlu0 %v3963_v58, %s4042_s17  ;;  %2816 = vrot.lane.b32.xlu1 %v2746_v39, %s4042_s17  ;;  %v3965_v53 = vpop.eup %3964 }
0x19ba   :  { %v2811_v7 = vadd.f32 1.0, %v3965_v53  ;;  %v3967_v28 = vpop.eup %3966 }
0x19bb   :  { %v2928_v3 = vadd.f32 1.0, %v3967_v28 }
0x19bc   :  { %3968 = vrcp.f32 %v2811_v7 }
0x19bd   :  { %2933 = vrot.lane.b32.xlu0 %v2863_v13, %s4042_s17  ;;  %3970 = vrcp.f32 %v2928_v3 }
0x19c9   :  { %v3969_v5 = vpop.eup %3968 }
0x19ca   :  { %v3971_v38 = vpop.eup %3970 }
0x1a27   :  { %v2822_v37 = vpop.permute.xlu1 %2821 }
0x1a28   :  { %v2824_v36 = vmul.f32 %v3969_v5, %v2822_v37 }
0x1a2a   :  { %2826 = vrot.lane.b32.xlu1 %v2824_v36, %s4042_s17 }
0x1a2b   :  { %v2939_v49 = vpop.permute.xlu0 %2938  ;;  %v2817_v0 = vpop.permute.xlu1 %2816 }
0x1a2c   :  { %v2941_v59 = vmul.f32 %v3971_v38, %v2939_v49  ;;  %v2819_v52 = vmul.f32 %v3969_v5, %v2817_v0 }
0x1a2e   :  { %2943 = vrot.lane.b32.xlu0 %v2941_v59, %s4042_s17  ;;  %2845 = vperm.xlu1 %3760, %v2842_v54  }
0x1a2f   :  { %v2934_v42 = vpop.permute.xlu0 %2933 }
0x1a30   :  { %v2936_v55 = vmul.f32 %v3971_v38, %v2934_v42 }
0x1a32   :  { %2962 = vperm.xlu0 %3759, %v2959_v27   ;;  %2838 = vperm.xlu1 %3760, %v3407_v62  }
0x1a36   :  { %2955 = vperm.xlu0 %3759, %v2742_v6  }
0x1a9c   :  { %v2827_v56 = vpop.permute.xlu1 %2826 }
0x1a9d   :  { %v2829_v12 = vadd.f32 %v2827_v56, %v2819_v52  ;;  %v3811_v52 = vld [vmem:[%s5188_s8 + $0x10] sm:$0xff]  }
0x1a9f   :  { %3972 = vtanh.f32 %v2829_v12 }
0x1aa0   :  { %v2944_v58 = vpop.permute.xlu0 %2943 }
0x1aa1   :  { %v2946_v51 = vadd.f32 %v2944_v58, %v2936_v55 }
0x1aa3   :  { %3974 = vtanh.f32 %v2946_v51 }
0x1aa9   :  { %v2846_v53 = vpop.permute.xlu1 %2845 }
0x1aaa   :  { %v2848_v7 = vmul.f32 %v2846_v53, %v4998_v24  ;;  %v2855_v37 = vmul.f32 %v2846_v53, %v2746_v39  ;;  %v3808_v24 = vld [vmem:[%s5188_s8 + $0x8] sm:$0xff]  }
0x1aab   :  { %3725 = vmatpush3.bf16.msra.mxu1 %v3808_v24 }
0x1aac   :  { %v3973_v21 = vpop.eup %3972  ;;  %3726 = vmatprep.subr.bf16.mxu1 %v4040_v1 }
0x1aad   :  { %2832 = vrot.lane.b32.xlu1 %v3973_v21, %s4042_s17  ;;  %v2963_v3 = vpop.permute.xlu0 %2962  ;;  %v5040_v54 = vpop.permute.xlu1 %2838 }
0x1aae   :  { %v2965_v62 = vmul.f32 %v2963_v3, %v5004_v11  ;;  %v2972_v36 = vmul.f32 %v2963_v3, %v2863_v13  ;;  %v3809_v11 = vld [vmem:[%s5188_s8] sm:$0xff]   ;;  %v3810_v13 = vld [vmem:[%s5188_s8 + $0x18] sm:$0xff]   ;;  %v2854_v55 = vmul.f32 %v5040_v54, %v2829_v12  ;;  %v551_v3 = vmul.f32 %v4299_v19, %v4282_v30 }
0x1aaf   :  { %3727 = vmatpush3.bf16.msra.mxu1 %v3809_v11  ;;  %3717 = vmatpush3.bf16.msra.mxu0 %v3810_v13  ;;  %v557_v12 = vmul.f32 %v4306_v45, %v4285_v14  ;;  %v1099_v30 = vmul.f32 %v4463_v17, %v4443_v61  ;;  %v1106_v14 = vmul.f32 %v4470_v25, %v4449_v43 }
0x1ab0   :  { %v3975_v28 = vpop.eup %3974  ;;  %3740 = vmatprep.subr.bf16.mxu1 %v4040_v1  ;;  %3718 = vmatprep.subr.bf16.mxu0 %v4040_v1  ;;  %v1373_v19 = vmul.f32 %v4557_v16, %v4537_v10  ;;  %v1380_v45 = vmul.f32 %v4564_v15, %v4543_v41  ;;  %v2189_v61 = vmul.f32 %v4815_v50, %v4795_v44 }
0x1ab1   :  { %2949 = vrot.lane.b32.xlu0 %v3975_v28, %s4042_s17  ;;  %2850 = vrot.lane.b32.xlu1 %v2848_v7, %s4044_s5  ;;  %v5046_v39 = vpop.permute.xlu0 %2955  ;;  %v2195_v43 = vmul.f32 %v4822_v46, %v4801_v47  ;;  %v2459_v17 = vmul.f32 %v4897_v22, %v4877_v4  ;;  %v2465_v25 = vmul.f32 %v4904_v40, %v4883_v31  ;;  %v3813_v46 = vld [vmem:[%s5189_s9 + $0x18] sm:$0xff]   ;;  %v3814_v4 = vld [vmem:[%s5189_s9] sm:$0xff]  }
0x1ab2   :  { %v2729_v10 = vmul.f32 %v4979_v23, %v4959_v32  ;;  %v2735_v41 = vmul.f32 %v4986_v33, %v4965_v34  ;;  %v3815_v34 = vld [vmem:[%s5189_s9 + $0x10] sm:$0xff]  }
0x1ab3   :  { %3719 = vmatpush3.bf16.msra.mxu0 %v3811_v52 }
0x1ab4   :  { %3732 = vmatprep.subr.bf16.mxu0 %v4040_v1 }
0x1ab5   :  { %2967 = vrot.lane.b32.xlu0 %v2965_v62, %s4044_s5  ;;  %2857 = vrot.lane.b32.xlu1 %v2855_v37, %s4042_s17  ;;  %v825_v62 = vmul.f32 %v4381_v29, %v4361_v8  ;;  %v1647_v8 = vmul.f32 %v4651_v9, %v4631_v60  ;;  %v1919_v29 = vmul.f32 %v4733_v18, %v4713_v2  ;;  %v3812_v18 = vld [vmem:[%s5189_s9 + $0x8] sm:$0xff]   ;;  %s4046_s9 = smov [#allocation8]  }
0x1ab6   :  { %s3261_s21 = sshll.u32 %s4046_s9, 4  ;;  %s3262_s21 = int_to_ptr.vmem [resolvable:$true] %s3261_s21 }
0x1ab7   :  { %s3976_s22 = scalar_lea.vmem %s3262_s21, 1280  ;;  %p3981_p1 = scmp.lt.s32.totalorder %s3262_s21, %s3262_s21 }
0x1ab8   :  { %p3977_p0 = scmp.ne.s32.totalorder %s3262_s21, %s3976_s22  ;;  %p3982_p2 = scmp.lt.s32.totalorder %s3976_s22, %s3976_s22 }
0x1ab9   :  { %2974 = vrot.lane.b32.xlu0 %v2972_v36, %s4042_s17 }
0x1aba   :  { %p3983_p3 = por %p3982_p2, %p3981_p1 }
0x1abc   :  { %p3984_p4 = pnand %p3983_p3, %p3977_p0 }
0x1b1f   :  { %v2833_v49 = vpop.permute.xlu1 %2832 }
0x1b20   :  { %v2835_v6 = vmul.f32 %v3969_v5, %v2833_v49 }
0x1b22   :  { %v2841_v59 = vmul.f32 %v5040_v54, %v2835_v6 }
0x1b23   :  { %v2950_v27 = vpop.permute.xlu0 %2949  ;;  %v2851_v0 = vpop.permute.xlu1 %2850 }
0x1b24   :  { %v2952_v42 = vmul.f32 %v3971_v38, %v2950_v27  ;;  %v2853_v56 = vadd.f32 %v2851_v0, %v2841_v59  ;;  %v2971_v38 = vmul.f32 %v5046_v39, %v2946_v51  ;;  %v832_v51 = vmul.f32 %v4388_v35, %v4367_v57 }
0x1b25   :  { %v1654_v57 = vmul.f32 %v4658_v63, %v4637_v26  ;;  %v1925_v35 = vmul.f32 %v4740_v48, %v4719_v20 }
0x1b26   :  { %2979 = vrot.lane.b32.xlu1 %v2853_v56, %s4044_s5  ;;  %v2958_v5 = vmul.f32 %v5046_v39, %v2952_v42  ;;  %v2998_v16 = vmul.f32 %v2853_v56, %v5040_v54 }
0x1b27   :  { %v2968_v58 = vpop.permute.xlu0 %2967  ;;  %v2858_v21 = vpop.permute.xlu1 %2857 }
0x1b28   :  { %v2970_v53 = vadd.f32 %v2968_v58, %v2958_v5  ;;  %v2860_v7 = vadd.f32 %v2858_v21, %v2854_v55 }
0x1b2a   :  { %2989 = vrot.lane.b32.xlu0 %v2970_v53, %s4044_s5  ;;  %2984 = vrot.lane.b32.xlu1 %v2860_v7, %s4045_s19  ;;  %v3004_v15 = vmul.f32 %v2970_v53, %v5046_v39 }
0x1b2b   :  { %v2975_v28 = vpop.permute.xlu0 %2974 }
0x1b2c   :  { %v2977_v37 = vadd.f32 %v2975_v28, %v2971_v38 }
0x1b2e   :  { %2994 = vrot.lane.b32.xlu0 %v2977_v37, %s4045_s19  ;;  %553 = vrot.lane.b32.xlu1 %v551_v3, %s4044_s5 }
0x1b32   :  { %559 = vrot.lane.b32.xlu0 %v557_v12, %s4045_s19  ;;  %827 = vrot.lane.b32.xlu1 %v825_v62, %s4044_s5 }
0x1b36   :  { %834 = vrot.lane.b32.xlu0 %v832_v51, %s4045_s19  ;;  %1101 = vrot.lane.b32.xlu1 %v1099_v30, %s4044_s5 }
0x1b3a   :  { %1108 = vrot.lane.b32.xlu0 %v1106_v14, %s4045_s19  ;;  %1375 = vrot.lane.b32.xlu1 %v1373_v19, %s4044_s5 }
0x1b3e   :  { %1382 = vrot.lane.b32.xlu0 %v1380_v45, %s4045_s19  ;;  %1649 = vrot.lane.b32.xlu1 %v1647_v8, %s4044_s5 }
0x1b42   :  { %1656 = vrot.lane.b32.xlu0 %v1654_v57, %s4045_s19  ;;  %1921 = vrot.lane.b32.xlu1 %v1919_v29, %s4044_s5 }
0x1b46   :  { %1927 = vrot.lane.b32.xlu0 %v1925_v35, %s4045_s19  ;;  %2191 = vrot.lane.b32.xlu1 %v2189_v61, %s4044_s5 }
0x1b4a   :  { %2197 = vrot.lane.b32.xlu0 %v2195_v43, %s4045_s19  ;;  %2461 = vrot.lane.b32.xlu1 %v2459_v17, %s4044_s5 }
0x1b4e   :  { %2467 = vrot.lane.b32.xlu0 %v2465_v25, %s4045_s19  ;;  %2731 = vrot.lane.b32.xlu1 %v2729_v10, %s4044_s5 }
0x1b52   :  { %2737 = vrot.lane.b32.xlu0 %v2735_v41, %s4045_s19  ;;  %3000 = vrot.lane.b32.xlu1 %v2998_v16, %s4044_s5 }
0x1b56   :  { %3006 = vrot.lane.b32.xlu0 %v3004_v15, %s4045_s19 }
0x1b98   :  { %v2980_v60 = vpop.permute.xlu1 %2979 }
0x1b99   :  { %2982 = vst.msk [vmem:[#allocation4] sm:$0xff] %vm288_vm2, %v2980_v60 }
0x1b9c   :  { %v2990_v26 = vpop.permute.xlu0 %2989  ;;  %v2985_v9 = vpop.permute.xlu1 %2984 }
0x1b9d   :  { %2992 = vst.msk [vmem:[#allocation6] sm:$0xff] %vm288_vm2, %v2990_v26  ;;  %2987 = vst.msk [vmem:[#allocation5] sm:$0xff] %vm288_vm2, %v2985_v9 }
0x1ba0   :  { %v2995_v63 = vpop.permute.xlu0 %2994  ;;  %v554_v2 = vpop.permute.xlu1 %553  ;;  %v3010_v20 = vld [vmem:[#allocation4] sm:$0xff] }
0x1ba1   :  { %2997 = vst.msk [vmem:[#allocation7] sm:$0xff] %vm288_vm2, %v2995_v63  ;;  %556 = vst.msk [vmem:[#allocation8] sm:$0xff] %vm288_vm2, %v554_v2  ;;  %v3011_v48 = vpack.c.bf16 %v3010_v20, %v3010_v20 }
0x1ba3   :  { %3729 = vmatmul.mubr.msk.bf16.vlgmr.msra.gmra.mxu1 %vm288_vm2, %v3011_v48 }
0x1ba4   :  { %v560_v44 = vpop.permute.xlu0 %559  ;;  %3741 = vmatpush3.bf16.msra.mxu1 %v3812_v18  ;;  %v828_v47 = vpop.permute.xlu1 %827  ;;  %v3012_v50 = vld [vmem:[#allocation6] sm:$0xff]  ;;  %3744 = vmatprep.mubr.msk.bf16.mxu1 %vm4041_vm0, %v4040_v1  ;;  %v3014_v22 = vld [vmem:[#allocation5] sm:$0xff] }
0x1ba5   :  { %564 = vst.msk [vmem:[#allocation8 + $0x48] sm:$0xff] %vm563_vm3, %v560_v44  ;;  %v3013_v31 = vpack.c.bf16 %v3012_v50, %v3012_v50  ;;  %3742 = vmatprep.subr.bf16.mxu1 %v4040_v1  ;;  %v3015_v23 = vpack.c.bf16 %v3014_v22, %v3014_v22 }
0x1ba6   :  { %831 = vst.msk [vmem:[#allocation8 + $0x8] sm:$0xff] %vm288_vm2, %v828_v47 }
0x1ba7   :  { %3721 = vmatmul.mubr.msk.bf16.vlgmr.msra.gmra.mxu0 %vm288_vm2, %v3013_v31 }
0x1ba8   :  { %v835_v40 = vpop.permute.xlu0 %834  ;;  %3733 = vmatpush3.bf16.msra.mxu0 %v3813_v46  ;;  %3743 = vmatpush3.bf16.msra.mxu1 %v3814_v4  ;;  %v1102_v32 = vpop.permute.xlu1 %1101  ;;  %v3016_v33 = vld [vmem:[#allocation7] sm:$0xff] }
0x1ba9   :  { %838 = vst.msk [vmem:[#allocation8 + $0x40] sm:$0xff] %vm563_vm3, %v835_v40  ;;  %3734 = vmatprep.subr.bf16.mxu0 %v4040_v1  ;;  %3736 = vmatprep.mubr.msk.bf16.mxu0 %vm4041_vm0, %v4040_v1  ;;  %v3017_v54 = vpack.c.bf16 %v3016_v33, %v3016_v33 }
0x1baa   :  { %1105 = vst.msk [vmem:[#allocation8 + $0x10] sm:$0xff] %vm288_vm2, %v1102_v32 }
0x1bab   :  { %3745 = vmatmul.mubr.msk.bf16.vlgmr.msra.gmra.mxu1 %vm288_vm2, %v3015_v23 }
0x1bac   :  { %v1109_v36 = vpop.permute.xlu0 %1108  ;;  %3735 = vmatpush3.bf16.msra.mxu0 %v3815_v34  ;;  %v1376_v24 = vpop.permute.xlu1 %1375 }
0x1bad   :  { %1112 = vst.msk [vmem:[#allocation8 + $0x38] sm:$0xff] %vm563_vm3, %v1109_v36 }
0x1bae   :  { %1379 = vst.msk [vmem:[#allocation8 + $0x18] sm:$0xff] %vm288_vm2, %v1376_v24 }
0x1baf   :  { %3737 = vmatmul.mubr.msk.bf16.vlgmr.msra.gmra.mxu0 %vm288_vm2, %v3017_v54 }
0x1bb0   :  { %v1383_v11 = vpop.permute.xlu0 %1382  ;;  %v1650_v39 = vpop.permute.xlu1 %1649 }
0x1bb1   :  { %1386 = vst.msk [vmem:[#allocation8 + $0x30] sm:$0xff] %vm563_vm3, %v1383_v11 }
0x1bb2   :  { %1653 = vst.msk [vmem:[#allocation8 + $0x20] sm:$0xff] %vm288_vm2, %v1650_v39 }
0x1bb4   :  { %v1657_v1 = vpop.permute.xlu0 %1656  ;;  %v1922_v49 = vpop.permute.xlu1 %1921 }
0x1bb5   :  { %1660 = vst.msk [vmem:[#allocation8 + $0x28] sm:$0xff] %vm563_vm3, %v1657_v1 }
0x1bb6   :  { %1924 = vst.msk [vmem:[#allocation8 + $0x28] sm:$0xff] %vm288_vm2, %v1922_v49 }
0x1bb8   :  { %v1928_v13 = vpop.permute.xlu0 %1927  ;;  %v2192_v6 = vpop.permute.xlu1 %2191 }
0x1bb9   :  { %1930 = vst.msk [vmem:[#allocation8 + $0x20] sm:$0xff] %vm563_vm3, %v1928_v13 }
0x1bba   :  { %2194 = vst.msk [vmem:[#allocation8 + $0x30] sm:$0xff] %vm288_vm2, %v2192_v6 }
0x1bbc   :  { %v2198_v59 = vpop.permute.xlu0 %2197  ;;  %v2462_v27 = vpop.permute.xlu1 %2461 }
0x1bbd   :  { %2200 = vst.msk [vmem:[#allocation8 + $0x18] sm:$0xff] %vm563_vm3, %v2198_v59 }
0x1bbe   :  { %2464 = vst.msk [vmem:[#allocation8 + $0x38] sm:$0xff] %vm288_vm2, %v2462_v27 }
0x1bc0   :  { %v2468_v0 = vpop.permute.xlu0 %2467  ;;  %v2732_v52 = vpop.permute.xlu1 %2731 }
0x1bc1   :  { %2470 = vst.msk [vmem:[#allocation8 + $0x10] sm:$0xff] %vm563_vm3, %v2468_v0 }
0x1bc2   :  { %2734 = vst.msk [vmem:[#allocation8 + $0x40] sm:$0xff] %vm288_vm2, %v2732_v52 }
0x1bc4   :  { %v2738_v42 = vpop.permute.xlu0 %2737  ;;  %v3001_v56 = vpop.permute.xlu1 %3000 }
0x1bc5   :  { %2740 = vst.msk [vmem:[#allocation8 + $0x8] sm:$0xff] %vm563_vm3, %v2738_v42 }
0x1bc6   :  { %3003 = vst.msk [vmem:[#allocation8 + $0x48] sm:$0xff] %vm288_vm2, %v3001_v56 }
0x1bc8   :  { %v3007_v5 = vpop.permute.xlu0 %3006 }
0x1bc9   :  { %3009 = vst.msk [vmem:[#allocation8] sm:$0xff] %vm563_vm3, %v3007_v5 }
0x1bca   :  { %3987 = shalt.err (!%p3984_p4)
}
0x1bcb   :  { %s4047_s23 = smov 128   ;;  %s4048_s0 = smov 8  }
0x1bcc   :  { %3267 = dma.vmem_to_hbm [thread:$0]  %s3262_s21, 1280, %s5190_s10, [#allocation9], %s4047_s23, %s4047_s23, %s4048_s0  }
0x1bcd   :  { %s4049_s26 = smov [#allocation10]  }
0x1bce   :  { %s3274_s3 = sshll.u32 %s4049_s26, 4  ;;  %s3275_s3 = int_to_ptr.vmem [resolvable:$true] %s3274_s3 }
0x1bcf   :  { %s3996_s6 = scalar_lea.vmem %s3275_s3, 128  ;;  %p4001_p6 = scmp.lt.s32.totalorder %s3275_s3, %s3275_s3 }
0x1bd0   :  { %p3997_p5 = scmp.ne.s32.totalorder %s3275_s3, %s3996_s6  ;;  %p4002_p7 = scmp.lt.s32.totalorder %s3996_s6, %s3996_s6 }
0x1bd2   :  { %p4003_p8 = por %p4002_p7, %p4001_p6 }
0x1bd4   :  { %p4004_p9 = pnand %p4003_p8, %p3997_p5 }
0x1c63   :  { %v3130_v55 = vpop.f32.mrf.mxu1 }
0x1c65   :  { %v3730_v58 = vpop.f32.mrf.mxu1 }
0x1c67   :  { %v3075_v21 = vpop.f32.mrf.mxu0  ;;  %v3133_v53 = vpop.f32.mrf.mxu1 }
0x1c68   :  { %v3131_v7 = vadd.f32 %v3130_v55, %v3075_v21 }
0x1c69   :  { %v3722_v38 = vpop.f32.mrf.mxu0  ;;  %v3731_v28 = vpop.f32.mrf.mxu1 }
0x1c6a   :  { %3136 = vst.msk [vmem:[#allocation10] sm:$0xff] %vm288_vm2, %v3131_v7 }
0x1c6b   :  { %v3078_v3 = vpop.f32.mrf.mxu0  ;;  %v3249_v37 = vpop.f32.mrf.mxu1 }
0x1c6c   :  { %4007 = shalt.err (!%p4004_p9)
}
0x1c6d   :  { %3277 = dma.vmem_to_hbm [thread:$0]  %s3275_s3, 128, %s5191_s11, [#allocation11]   ;;  %v3723_v12 = vpop.f32.mrf.mxu0  ;;  %v3746_v62 = vpop.f32.mrf.mxu1 }
0x1c6e   :  { %s4050_s7 = smov [#allocation12]  }
0x1c6f   :  { %s3284_s1 = sshll.u32 %s4050_s7, 4  ;;  %v3194_v51 = vpop.f32.mrf.mxu0  ;;  %v3252_v30 = vpop.f32.mrf.mxu1  ;;  %s3285_s1 = int_to_ptr.vmem [resolvable:$true] %s3284_s1 }
0x1c70   :  { %v3250_v14 = vadd.f32 %v3249_v37, %v3194_v51  ;;  %s4016_s2 = scalar_lea.vmem %s3285_s1, 128  ;;  %p4021_p11 = scmp.lt.s32.totalorder %s3285_s1, %s3285_s1 }
0x1c71   :  { %v3738_v19 = vpop.f32.mrf.mxu0  ;;  %v3747_v45 = vpop.f32.mrf.mxu1  ;;  %p4017_p10 = scmp.ne.s32.totalorder %s3285_s1, %s4016_s2  ;;  %p4022_p12 = scmp.lt.s32.totalorder %s4016_s2, %s4016_s2 }
0x1c72   :  { %3255 = vst.msk [vmem:[#allocation12] sm:$0xff] %vm288_vm2, %v3250_v14 }
0x1c73   :  { %v3197_v8 = vpop.f32.mrf.mxu0  ;;  %p4023_p13 = por %p4022_p12, %p4021_p11 }
0x1c75   :  { %p4024_p0 = pnand %p4023_p13, %p4017_p10 }
0x1c77   :  { %4027 = shalt.err (!%p4024_p0)
}
0x1c78   :  { %3287 = dma.vmem_to_hbm [thread:$0]  %s3285_s1, 128, %s5192_s12, [#allocation11]   ;;  %v3739_v57 = vpop.f32.mrf.mxu0 }
0x1c79   :  { %4036 = dma.done.wait [#allocation9], 1280  }
0x1c7a   :  { %4037 = vsyncadd [#allocation9], 4294966016 }
0x1c7b   :  { %4038 = dma.done.wait [#allocation11], 256  }
0x1c7c   :  { %4039 = vsyncadd [#allocation11], 4294967040 }
0x1c7d   :  { %3297 = vsyncpa [#allocation9], 1 }
0x1c7e   :  { %3298 = vsyncpa [#allocation11], 1 }

</bundles_post_ra>
